<compile_context>
chip_gen: v5e
topology: v5e:2x2
jax: 0.10.0
libtpu: 0.0.40
codegen_flags: <defaults>
</compile_context>

<pallas_src>
import functools

import jax
import jax.numpy as jnp
import numpy as np
from jax import lax
from jax.experimental import pallas as pl
from jax.experimental.pallas import tpu as pltpu


def _round_up(x, m):
    return ((x + m - 1) // m) * m


# --------------------------------------------------------------------------
# Fused kernel: 6x (conv1d 'same' + bias [+ ReLU]) + masked logsumexp.
# One batch element per grid step; everything stays on-chip.
# --------------------------------------------------------------------------
def _psc_fused_kernel(len_ref, x_ref, w_ref, b_ref, fs_ref, out_ref, hbuf,
                      *, n_layers, K, temp_ratio):
    # len_ref : SMEM (B,) int32                 (scalar prefetch)
    # x_ref   : (1, T, C)  bf16                 (channel-padded input, NLC)
    # w_ref   : (L, K, C, C) bf16               (all conv weights, zero padded)
    # b_ref   : (L, C) f32                      (all biases, zero padded)
    # fs_ref  : (1, T, C) f32  out              (masked frame scores)
    # out_ref : (1, 1, C) f32  out              (logsumexp-pooled scores)
    # hbuf    : VMEM (Tc, C) bf16 scratch       (circular conv buffer)
    b = pl.program_id(0)
    T = x_ref.shape[1]
    C = x_ref.shape[2]
    Tc = hbuf.shape[0]
    PAD = K // 2
    inv_temp = 1.0 / temp_ratio

    # Stage the input into a zero-tailed buffer: rows [0,T) = x, rows [T,Tc)=0.
    hbuf[...] = jnp.zeros_like(hbuf)
    hbuf[0:T, :] = x_ref[0]
    h = hbuf[...]                                            # (Tc, C) bf16

    row_ids = lax.broadcasted_iota(jnp.int32, (Tc, C), 0)    # time ids (hoisted)
    in_seq = row_ids < T                                     # valid sequence rows
    length = len_ref[b]
    in_len = row_ids < length                                # un-padded frames

    for layer in range(n_layers):                            # static -> unrolled
        acc = jnp.zeros((Tc, C), jnp.float32)
        for k in range(K):
            # Full-buffer matmul (aligned, lane-dense), then shift the tap's
            # contribution with an XLU sublane roll.  Because rows [T, Tc) of
            # h are zero and Tc >= T + 2*PAD, the circular wrap reproduces
            # exact zero 'same' padding for output rows [0, T).
            z = jnp.dot(h, w_ref[layer, k],
                        preferred_element_type=jnp.float32)  # (Tc, C) f32
            acc = acc + pltpu.roll(z, shift=(PAD - k) % Tc, axis=0)
        acc = acc + b_ref[layer][None, :]

        if layer < n_layers - 1:
            acc = jnp.maximum(acc, 0.0)                      # ReLU
            acc = jnp.where(in_seq, acc, 0.0)                # keep tail zero
            h = acc.astype(h.dtype)                          # bf16 for next MXU
        else:
            # ---- fused classifier on the last conv output (no ReLU) ----
            masked = jnp.where(in_len, acc, -jnp.inf)        # (Tc, C) f32
            fs_ref[0] = masked[0:T, :]                       # frame scores
            scaled = temp_ratio * masked
            m = jnp.max(scaled, axis=0, keepdims=True)       # (1, C)
            s = jnp.sum(jnp.exp(scaled - m), axis=0, keepdims=True)
            out_ref[0] = ((jnp.log(s) + m) * inv_temp).astype(out_ref.dtype)


# --------------------------------------------------------------------------
# Wrapper: parameter packing + single pallas_call + output unpadding.
# --------------------------------------------------------------------------
def psc_forward(params, x_ncl, x_lengths, temp_ratio, *, lane=128, k_max=11):
    # x_ncl: (B, input_dim, T) in PyTorch NCL layout.
    B, Cin, T = x_ncl.shape
    L = len(params)
    out_dim = params[-1][1].shape[0]

    # Pack all layers into one weight / bias block:
    #   - channels zero-padded to `lane`
    #   - taps zero-padded symmetrically to k_max (exact for odd K)
    w_stack = jnp.zeros((L, k_max, lane, lane), jnp.float32)
    b_stack = jnp.zeros((L, lane), jnp.float32)
    for l, (w, bias) in enumerate(params):
        Kl, Ci, Co = w.shape
        off = (k_max - Kl) // 2
        w_stack = w_stack.at[l, off:off + Kl, :Ci, :Co].set(w)
        b_stack = b_stack.at[l, :Co].set(bias)
    w_stack = w_stack.astype(jnp.bfloat16)

    # Input: NCL -> NLC, channels zero-padded to the lane width, bf16.
    x_nlc = jnp.transpose(x_ncl, (0, 2, 1))
    x_nlc = jnp.pad(x_nlc, ((0, 0), (0, 0), (0, lane - Cin))).astype(jnp.bfloat16)

    pad = k_max // 2
    Tc = _round_up(T + 2 * pad, 16)        # circular buffer rows (bf16 sublanes)

    kernel = functools.partial(_psc_fused_kernel, n_layers=L, K=k_max,
                               temp_ratio=float(temp_ratio))
    fs_full, out_full = pl.pallas_call(
        kernel,
        out_shape=(jax.ShapeDtypeStruct((B, T, lane), jnp.float32),
                   jax.ShapeDtypeStruct((B, 1, lane), jnp.float32)),
        grid_spec=pltpu.PrefetchScalarGridSpec(
            num_scalar_prefetch=1,
            grid=(B,),
            in_specs=[
                pl.BlockSpec((1, T, lane), lambda b, lens: (b, 0, 0)),
                pl.BlockSpec((L, k_max, lane, lane), lambda b, lens: (0, 0, 0, 0)),
                pl.BlockSpec((L, lane), lambda b, lens: (0, 0)),
            ],
            out_specs=(
                pl.BlockSpec((1, T, lane), lambda b, lens: (b, 0, 0)),
                pl.BlockSpec((1, 1, lane), lambda b, lens: (b, 0, 0)),
            ),
            scratch_shapes=[pltpu.VMEM((Tc, lane), jnp.bfloat16)],
        ),
        compiler_params=pltpu.CompilerParams(
            dimension_semantics=("parallel",),      # batch elems independent
            vmem_limit_bytes=48 * 1024 * 1024,      # headroom for v7x's 64 MiB
        ),
    )(x_lengths.astype(jnp.int32), x_nlc, w_stack, b_stack)

    out = out_full[:, 0, :out_dim]                            # (B, out_dim)
    frame_scores = jnp.transpose(fs_full[:, :, :out_dim], (0, 2, 1))  # (B,out,T)
    return out, frame_scores


# --------------------------------------------------------------------------
# Pure-JAX f32 reference (for correctness check only).
# --------------------------------------------------------------------------
def ref_forward(params, x_ncl, x_lengths, temp_ratio):
    x = x_ncl
    for i, (w_kio, b) in enumerate(params):
        w_oik = jnp.transpose(w_kio, (2, 1, 0))               # (Co, Ci, K)
        K = w_oik.shape[-1]
        y = lax.conv_general_dilated(
            x, w_oik, window_strides=(1,), padding=[(K // 2, K // 2)],
            dimension_numbers=("NCH", "OIH", "NCH"))
        y = y + b[None, :, None]
        if i < len(params) - 1:
            y = jnp.maximum(y, 0.0)
        x = y
    T = x.shape[-1]
    mask = jnp.arange(T)[None, :] < x_lengths[:, None]
    fs = jnp.where(mask[:, None, :], x, -jnp.inf)
    out = (1.0 / temp_ratio) * jax.scipy.special.logsumexp(temp_ratio * fs, axis=-1)
    return out, fs


if __name__ == "__main__":
    B, input_dim, T = 2, 4, 16
    out_dim, temp_ratio = 8, 2.0

    # Deterministic param init (PyTorch Conv1d default: U(+-1/sqrt(Ci*K))).
    # Weights stored as (K, Ci, Co) for the NLC kernel layout.
    layer_cfg = [(input_dim, 96, 9), (96, 96, 11), (96, 96, 11),
                 (96, 96, 11), (96, 96, 11), (96, out_dim, 11)]
    key = jax.random.PRNGKey(0)
    params = []
    for ci, co, k in layer_cfg:
        key, kw, kb = jax.random.split(key, 3)
        bound = 1.0 / np.sqrt(ci * k)
        w = jax.random.uniform(kw, (k, ci, co), jnp.float32, -bound, bound)
        b = jax.random.uniform(kb, (co,), jnp.float32, -bound, bound)
        params.append((w, b))

    key, kx = jax.random.split(key)
    x = jax.random.normal(kx, (B, input_dim, T), jnp.float32)   # NCL like PyTorch
    x_lengths = jnp.array([16, 10], dtype=jnp.int32)

    out, frame_scores = psc_forward(params, x, x_lengths, temp_ratio)
    jax.block_until_ready((out, frame_scores))

    ref_out, ref_fs = ref_forward(params, x, x_lengths, temp_ratio)
    # bf16 pipeline with f32 accumulation vs. f32 reference -> loose tolerance.
    np.testing.assert_allclose(np.asarray(out), np.asarray(ref_out),
                               rtol=5e-2, atol=5e-2)
    np.testing.assert_allclose(np.asarray(frame_scores), np.asarray(ref_fs),
                               rtol=5e-2, atol=5e-2)
    print("KERNEL_OK")
</pallas_src>

<mosaic_0001>
module attributes {stable_mosaic.version = 11 : i64} {
  func.func @_psc_fused_kernel(%arg0: i32, %arg1: memref<2xi32, #tpu.memory_space<smem>>, %arg2: memref<1x16x128xbf16, #tpu.memory_space<vmem>>, %arg3: memref<6x11x128x128xbf16, #tpu.memory_space<vmem>>, %arg4: memref<6x128xf32, #tpu.memory_space<vmem>>, %arg5: memref<1x16x128xf32, #tpu.memory_space<vmem>>, %arg6: memref<1x1x128xf32, #tpu.memory_space<vmem>>, %arg7: memref<32x128xbf16, #tpu.memory_space<vmem>>) attributes {dimension_semantics = [#tpu.dimension_semantics<parallel>], iteration_bounds = array<i64: 2>, scalar_prefetch = 1 : i64, scratch_operands = 1 : i64, tpu.core_type = #tpu.core_type<tc>, window_params = [{transform_indices = @transform_0, window_bounds = array<i64: 1, 16, 128>}, {pipeline_mode = #tpu.pipeline_mode<synchronous>, transform_indices = @transform_1, window_bounds = array<i64: 6, 11, 128, 128>}, {pipeline_mode = #tpu.pipeline_mode<synchronous>, transform_indices = @transform_2, window_bounds = array<i64: 6, 128>}, {transform_indices = @transform_3, window_bounds = array<i64: 1, 16, 128>}, {transform_indices = @transform_4, window_bounds = array<i64: 1, 1, 128>}]} {
    %cst = arith.constant 0.000000e+00 : bf16
    %0 = vector.broadcast %cst : bf16 to vector<32x128xbf16>
    %c0 = arith.constant 0 : index
    %c0_0 = arith.constant 0 : index
    %1 = vector.load %arg7[%c0, %c0_0] : memref<32x128xbf16, #tpu.memory_space<vmem>>, vector<32x128xbf16>
    tpu.vector_store %arg7[%c0, %c0_0], %0 {strides = array<i32>} : memref<32x128xbf16, #tpu.memory_space<vmem>>, vector<32x128xbf16>,
    %c0_1 = arith.constant 0 : index
    %c0_2 = arith.constant 0 : index
    %c0_3 = arith.constant 0 : index
    %2 = vector.load %arg2[%c0_1, %c0_2, %c0_3] : memref<1x16x128xbf16, #tpu.memory_space<vmem>>, vector<1x16x128xbf16>
    %3 = vector.shape_cast %2 : vector<1x16x128xbf16> to vector<16x128xbf16>
    %c0_4 = arith.constant 0 : index
    %c0_5 = arith.constant 0 : index
    %4 = vector.load %arg7[%c0_4, %c0_5] : memref<32x128xbf16, #tpu.memory_space<vmem>>, vector<16x128xbf16>
    tpu.vector_store %arg7[%c0_4, %c0_5], %3 {strides = array<i32>} : memref<32x128xbf16, #tpu.memory_space<vmem>>, vector<16x128xbf16>,
    %c0_6 = arith.constant 0 : index
    %c0_7 = arith.constant 0 : index
    %5 = vector.load %arg7[%c0_6, %c0_7] : memref<32x128xbf16, #tpu.memory_space<vmem>>, vector<32x128xbf16>
    %6 = tpu.iota {dimensions = array<i32: 0>} : vector<32x128xi32>
    %c16_i32 = arith.constant 16 : i32
    %7 = vector.broadcast %c16_i32 : i32 to vector<32x128xi32>
    %8 = arith.cmpi slt, %6, %7 : vector<32x128xi32>
    %9 = arith.index_cast %arg0 : i32 to index
    %10 = memref.load %arg1[%9] : memref<2xi32, #tpu.memory_space<smem>>
    %11 = vector.broadcast %10 : i32 to vector<32x128xi32>
    %12 = arith.cmpi slt, %6, %11 : vector<32x128xi32>
    %cst_8 = arith.constant 0.000000e+00 : f32
    %13 = vector.broadcast %cst_8 : f32 to vector<32x128xf32>
    %c0_9 = arith.constant 0 : index
    %c0_10 = arith.constant 0 : index
    %c0_11 = arith.constant 0 : index
    %c0_12 = arith.constant 0 : index
    %14 = vector.load %arg3[%c0_9, %c0_10, %c0_11, %c0_12] : memref<6x11x128x128xbf16, #tpu.memory_space<vmem>>, vector<1x1x128x128xbf16>
    %15 = vector.shape_cast %14 : vector<1x1x128x128xbf16> to vector<128x128xbf16>
    %cst_13 = arith.constant dense<0.000000e+00> : vector<32x128xf32>
    %16 = tpu.matmul %5, %15, %cst_13 {dimension_numbers = #tpu.dot_dimension_numbers<[1], [0], [0], [1], [0, 0, 1, 1], [], []>} : vector<32x128xbf16>, vector<128x128xbf16>, vector<32x128xf32> -> vector<32x128xf32>
    %c5_i32 = arith.constant 5 : i32
    %17 = tpu.dynamic_rotate %16 by %c5_i32 dim 0 : vector<32x128xf32>, i32 -> vector<32x128xf32>
    %18 = arith.addf %13, %17 : vector<32x128xf32>
    %c0_14 = arith.constant 0 : index
    %c1 = arith.constant 1 : index
    %c0_15 = arith.constant 0 : index
    %c0_16 = arith.constant 0 : index
    %19 = vector.load %arg3[%c0_14, %c1, %c0_15, %c0_16] : memref<6x11x128x128xbf16, #tpu.memory_space<vmem>>, vector<1x1x128x128xbf16>
    %20 = vector.shape_cast %19 : vector<1x1x128x128xbf16> to vector<128x128xbf16>
    %cst_17 = arith.constant dense<0.000000e+00> : vector<32x128xf32>
    %21 = tpu.matmul %5, %20, %cst_17 {dimension_numbers = #tpu.dot_dimension_numbers<[1], [0], [0], [1], [0, 0, 1, 1], [], []>} : vector<32x128xbf16>, vector<128x128xbf16>, vector<32x128xf32> -> vector<32x128xf32>
    %c4_i32 = arith.constant 4 : i32
    %22 = tpu.dynamic_rotate %21 by %c4_i32 dim 0 : vector<32x128xf32>, i32 -> vector<32x128xf32>
    %23 = arith.addf %18, %22 : vector<32x128xf32>
    %c0_18 = arith.constant 0 : index
    %c2 = arith.constant 2 : index
    %c0_19 = arith.constant 0 : index
    %c0_20 = arith.constant 0 : index
    %24 = vector.load %arg3[%c0_18, %c2, %c0_19, %c0_20] : memref<6x11x128x128xbf16, #tpu.memory_space<vmem>>, vector<1x1x128x128xbf16>
    %25 = vector.shape_cast %24 : vector<1x1x128x128xbf16> to vector<128x128xbf16>
    %cst_21 = arith.constant dense<0.000000e+00> : vector<32x128xf32>
    %26 = tpu.matmul %5, %25, %cst_21 {dimension_numbers = #tpu.dot_dimension_numbers<[1], [0], [0], [1], [0, 0, 1, 1], [], []>} : vector<32x128xbf16>, vector<128x128xbf16>, vector<32x128xf32> -> vector<32x128xf32>
    %c3_i32 = arith.constant 3 : i32
    %27 = tpu.dynamic_rotate %26 by %c3_i32 dim 0 : vector<32x128xf32>, i32 -> vector<32x128xf32>
    %28 = arith.addf %23, %27 : vector<32x128xf32>
    %c0_22 = arith.constant 0 : index
    %c3 = arith.constant 3 : index
    %c0_23 = arith.constant 0 : index
    %c0_24 = arith.constant 0 : index
    %29 = vector.load %arg3[%c0_22, %c3, %c0_23, %c0_24] : memref<6x11x128x128xbf16, #tpu.memory_space<vmem>>, vector<1x1x128x128xbf16>
    %30 = vector.shape_cast %29 : vector<1x1x128x128xbf16> to vector<128x128xbf16>
    %cst_25 = arith.constant dense<0.000000e+00> : vector<32x128xf32>
    %31 = tpu.matmul %5, %30, %cst_25 {dimension_numbers = #tpu.dot_dimension_numbers<[1], [0], [0], [1], [0, 0, 1, 1], [], []>} : vector<32x128xbf16>, vector<128x128xbf16>, vector<32x128xf32> -> vector<32x128xf32>
    %c2_i32 = arith.constant 2 : i32
    %32 = tpu.dynamic_rotate %31 by %c2_i32 dim 0 : vector<32x128xf32>, i32 -> vector<32x128xf32>
    %33 = arith.addf %28, %32 : vector<32x128xf32>
    %c0_26 = arith.constant 0 : index
    %c4 = arith.constant 4 : index
    %c0_27 = arith.constant 0 : index
    %c0_28 = arith.constant 0 : index
    %34 = vector.load %arg3[%c0_26, %c4, %c0_27, %c0_28] : memref<6x11x128x128xbf16, #tpu.memory_space<vmem>>, vector<1x1x128x128xbf16>
    %35 = vector.shape_cast %34 : vector<1x1x128x128xbf16> to vector<128x128xbf16>
    %cst_29 = arith.constant dense<0.000000e+00> : vector<32x128xf32>
    %36 = tpu.matmul %5, %35, %cst_29 {dimension_numbers = #tpu.dot_dimension_numbers<[1], [0], [0], [1], [0, 0, 1, 1], [], []>} : vector<32x128xbf16>, vector<128x128xbf16>, vector<32x128xf32> -> vector<32x128xf32>
    %c1_i32 = arith.constant 1 : i32
    %37 = tpu.dynamic_rotate %36 by %c1_i32 dim 0 : vector<32x128xf32>, i32 -> vector<32x128xf32>
    %38 = arith.addf %33, %37 : vector<32x128xf32>
    %c0_30 = arith.constant 0 : index
    %c5 = arith.constant 5 : index
    %c0_31 = arith.constant 0 : index
    %c0_32 = arith.constant 0 : index
    %39 = vector.load %arg3[%c0_30, %c5, %c0_31, %c0_32] : memref<6x11x128x128xbf16, #tpu.memory_space<vmem>>, vector<1x1x128x128xbf16>
    %40 = vector.shape_cast %39 : vector<1x1x128x128xbf16> to vector<128x128xbf16>
    %cst_33 = arith.constant dense<0.000000e+00> : vector<32x128xf32>
    %41 = tpu.matmul %5, %40, %cst_33 {dimension_numbers = #tpu.dot_dimension_numbers<[1], [0], [0], [1], [0, 0, 1, 1], [], []>} : vector<32x128xbf16>, vector<128x128xbf16>, vector<32x128xf32> -> vector<32x128xf32>
    %c0_i32 = arith.constant 0 : i32
    %42 = tpu.dynamic_rotate %41 by %c0_i32 dim 0 : vector<32x128xf32>, i32 -> vector<32x128xf32>
    %43 = arith.addf %38, %42 : vector<32x128xf32>
    %c0_34 = arith.constant 0 : index
    %c6 = arith.constant 6 : index
    %c0_35 = arith.constant 0 : index
    %c0_36 = arith.constant 0 : index
    %44 = vector.load %arg3[%c0_34, %c6, %c0_35, %c0_36] : memref<6x11x128x128xbf16, #tpu.memory_space<vmem>>, vector<1x1x128x128xbf16>
    %45 = vector.shape_cast %44 : vector<1x1x128x128xbf16> to vector<128x128xbf16>
    %cst_37 = arith.constant dense<0.000000e+00> : vector<32x128xf32>
    %46 = tpu.matmul %5, %45, %cst_37 {dimension_numbers = #tpu.dot_dimension_numbers<[1], [0], [0], [1], [0, 0, 1, 1], [], []>} : vector<32x128xbf16>, vector<128x128xbf16>, vector<32x128xf32> -> vector<32x128xf32>
    %c31_i32 = arith.constant 31 : i32
    %47 = tpu.dynamic_rotate %46 by %c31_i32 dim 0 : vector<32x128xf32>, i32 -> vector<32x128xf32>
    %48 = arith.addf %43, %47 : vector<32x128xf32>
    %c0_38 = arith.constant 0 : index
    %c7 = arith.constant 7 : index
    %c0_39 = arith.constant 0 : index
    %c0_40 = arith.constant 0 : index
    %49 = vector.load %arg3[%c0_38, %c7, %c0_39, %c0_40] : memref<6x11x128x128xbf16, #tpu.memory_space<vmem>>, vector<1x1x128x128xbf16>
    %50 = vector.shape_cast %49 : vector<1x1x128x128xbf16> to vector<128x128xbf16>
    %cst_41 = arith.constant dense<0.000000e+00> : vector<32x128xf32>
    %51 = tpu.matmul %5, %50, %cst_41 {dimension_numbers = #tpu.dot_dimension_numbers<[1], [0], [0], [1], [0, 0, 1, 1], [], []>} : vector<32x128xbf16>, vector<128x128xbf16>, vector<32x128xf32> -> vector<32x128xf32>
    %c30_i32 = arith.constant 30 : i32
    %52 = tpu.dynamic_rotate %51 by %c30_i32 dim 0 : vector<32x128xf32>, i32 -> vector<32x128xf32>
    %53 = arith.addf %48, %52 : vector<32x128xf32>
    %c0_42 = arith.constant 0 : index
    %c8 = arith.constant 8 : index
    %c0_43 = arith.constant 0 : index
    %c0_44 = arith.constant 0 : index
    %54 = vector.load %arg3[%c0_42, %c8, %c0_43, %c0_44] : memref<6x11x128x128xbf16, #tpu.memory_space<vmem>>, vector<1x1x128x128xbf16>
    %55 = vector.shape_cast %54 : vector<1x1x128x128xbf16> to vector<128x128xbf16>
    %cst_45 = arith.constant dense<0.000000e+00> : vector<32x128xf32>
    %56 = tpu.matmul %5, %55, %cst_45 {dimension_numbers = #tpu.dot_dimension_numbers<[1], [0], [0], [1], [0, 0, 1, 1], [], []>} : vector<32x128xbf16>, vector<128x128xbf16>, vector<32x128xf32> -> vector<32x128xf32>
    %c29_i32 = arith.constant 29 : i32
    %57 = tpu.dynamic_rotate %56 by %c29_i32 dim 0 : vector<32x128xf32>, i32 -> vector<32x128xf32>
    %58 = arith.addf %53, %57 : vector<32x128xf32>
    %c0_46 = arith.constant 0 : index
    %c9 = arith.constant 9 : index
    %c0_47 = arith.constant 0 : index
    %c0_48 = arith.constant 0 : index
    %59 = vector.load %arg3[%c0_46, %c9, %c0_47, %c0_48] : memref<6x11x128x128xbf16, #tpu.memory_space<vmem>>, vector<1x1x128x128xbf16>
    %60 = vector.shape_cast %59 : vector<1x1x128x128xbf16> to vector<128x128xbf16>
    %cst_49 = arith.constant dense<0.000000e+00> : vector<32x128xf32>
    %61 = tpu.matmul %5, %60, %cst_49 {dimension_numbers = #tpu.dot_dimension_numbers<[1], [0], [0], [1], [0, 0, 1, 1], [], []>} : vector<32x128xbf16>, vector<128x128xbf16>, vector<32x128xf32> -> vector<32x128xf32>
    %c28_i32 = arith.constant 28 : i32
    %62 = tpu.dynamic_rotate %61 by %c28_i32 dim 0 : vector<32x128xf32>, i32 -> vector<32x128xf32>
    %63 = arith.addf %58, %62 : vector<32x128xf32>
    %c0_50 = arith.constant 0 : index
    %c10 = arith.constant 10 : index
    %c0_51 = arith.constant 0 : index
    %c0_52 = arith.constant 0 : index
    %64 = vector.load %arg3[%c0_50, %c10, %c0_51, %c0_52] : memref<6x11x128x128xbf16, #tpu.memory_space<vmem>>, vector<1x1x128x128xbf16>
    %65 = vector.shape_cast %64 : vector<1x1x128x128xbf16> to vector<128x128xbf16>
    %cst_53 = arith.constant dense<0.000000e+00> : vector<32x128xf32>
    %66 = tpu.matmul %5, %65, %cst_53 {dimension_numbers = #tpu.dot_dimension_numbers<[1], [0], [0], [1], [0, 0, 1, 1], [], []>} : vector<32x128xbf16>, vector<128x128xbf16>, vector<32x128xf32> -> vector<32x128xf32>
    %c27_i32 = arith.constant 27 : i32
    %67 = tpu.dynamic_rotate %66 by %c27_i32 dim 0 : vector<32x128xf32>, i32 -> vector<32x128xf32>
    %68 = arith.addf %63, %67 : vector<32x128xf32>
    %c0_54 = arith.constant 0 : index
    %c0_55 = arith.constant 0 : index
    %69 = vector.load %arg4[%c0_54, %c0_55] : memref<6x128xf32, #tpu.memory_space<vmem>>, vector<1x128xf32>
    %70 = vector.shape_cast %69 : vector<1x128xf32> to vector<128xf32>
    %71 = vector.shape_cast %70 : vector<128xf32> to vector<1x128xf32>
    %72 = vector.broadcast %71 : vector<1x128xf32> to vector<32x128xf32>
    %73 = arith.addf %68, %72 : vector<32x128xf32>
    %cst_56 = arith.constant 0.000000e+00 : f32
    %74 = vector.broadcast %cst_56 : f32 to vector<32x128xf32>
    %75 = arith.maximumf %73, %74 : vector<32x128xf32>
    %cst_57 = arith.constant 0.000000e+00 : f32
    %76 = vector.broadcast %cst_57 : f32 to vector<32x128xf32>
    %77 = arith.select %8, %75, %76 : vector<32x128xi1>, vector<32x128xf32>
    %78 = arith.truncf %77 : vector<32x128xf32> to vector<32x128xbf16>
    %cst_58 = arith.constant 0.000000e+00 : f32
    %79 = vector.broadcast %cst_58 : f32 to vector<32x128xf32>
    %c1_59 = arith.constant 1 : index
    %c0_60 = arith.constant 0 : index
    %c0_61 = arith.constant 0 : index
    %c0_62 = arith.constant 0 : index
    %80 = vector.load %arg3[%c1_59, %c0_60, %c0_61, %c0_62] : memref<6x11x128x128xbf16, #tpu.memory_space<vmem>>, vector<1x1x128x128xbf16>
    %81 = vector.shape_cast %80 : vector<1x1x128x128xbf16> to vector<128x128xbf16>
    %cst_63 = arith.constant dense<0.000000e+00> : vector<32x128xf32>
    %82 = tpu.matmul %78, %81, %cst_63 {dimension_numbers = #tpu.dot_dimension_numbers<[1], [0], [0], [1], [0, 0, 1, 1], [], []>} : vector<32x128xbf16>, vector<128x128xbf16>, vector<32x128xf32> -> vector<32x128xf32>
    %c5_i32_64 = arith.constant 5 : i32
    %83 = tpu.dynamic_rotate %82 by %c5_i32_64 dim 0 : vector<32x128xf32>, i32 -> vector<32x128xf32>
    %84 = arith.addf %79, %83 : vector<32x128xf32>
    %c1_65 = arith.constant 1 : index
    %c1_66 = arith.constant 1 : index
    %c0_67 = arith.constant 0 : index
    %c0_68 = arith.constant 0 : index
    %85 = vector.load %arg3[%c1_65, %c1_66, %c0_67, %c0_68] : memref<6x11x128x128xbf16, #tpu.memory_space<vmem>>, vector<1x1x128x128xbf16>
    %86 = vector.shape_cast %85 : vector<1x1x128x128xbf16> to vector<128x128xbf16>
    %cst_69 = arith.constant dense<0.000000e+00> : vector<32x128xf32>
    %87 = tpu.matmul %78, %86, %cst_69 {dimension_numbers = #tpu.dot_dimension_numbers<[1], [0], [0], [1], [0, 0, 1, 1], [], []>} : vector<32x128xbf16>, vector<128x128xbf16>, vector<32x128xf32> -> vector<32x128xf32>
    %c4_i32_70 = arith.constant 4 : i32
    %88 = tpu.dynamic_rotate %87 by %c4_i32_70 dim 0 : vector<32x128xf32>, i32 -> vector<32x128xf32>
    %89 = arith.addf %84, %88 : vector<32x128xf32>
    %c1_71 = arith.constant 1 : index
    %c2_72 = arith.constant 2 : index
    %c0_73 = arith.constant 0 : index
    %c0_74 = arith.constant 0 : index
    %90 = vector.load %arg3[%c1_71, %c2_72, %c0_73, %c0_74] : memref<6x11x128x128xbf16, #tpu.memory_space<vmem>>, vector<1x1x128x128xbf16>
    %91 = vector.shape_cast %90 : vector<1x1x128x128xbf16> to vector<128x128xbf16>
    %cst_75 = arith.constant dense<0.000000e+00> : vector<32x128xf32>
    %92 = tpu.matmul %78, %91, %cst_75 {dimension_numbers = #tpu.dot_dimension_numbers<[1], [0], [0], [1], [0, 0, 1, 1], [], []>} : vector<32x128xbf16>, vector<128x128xbf16>, vector<32x128xf32> -> vector<32x128xf32>
    %c3_i32_76 = arith.constant 3 : i32
    %93 = tpu.dynamic_rotate %92 by %c3_i32_76 dim 0 : vector<32x128xf32>, i32 -> vector<32x128xf32>
    %94 = arith.addf %89, %93 : vector<32x128xf32>
    %c1_77 = arith.constant 1 : index
    %c3_78 = arith.constant 3 : index
    %c0_79 = arith.constant 0 : index
    %c0_80 = arith.constant 0 : index
    %95 = vector.load %arg3[%c1_77, %c3_78, %c0_79, %c0_80] : memref<6x11x128x128xbf16, #tpu.memory_space<vmem>>, vector<1x1x128x128xbf16>
    %96 = vector.shape_cast %95 : vector<1x1x128x128xbf16> to vector<128x128xbf16>
    %cst_81 = arith.constant dense<0.000000e+00> : vector<32x128xf32>
    %97 = tpu.matmul %78, %96, %cst_81 {dimension_numbers = #tpu.dot_dimension_numbers<[1], [0], [0], [1], [0, 0, 1, 1], [], []>} : vector<32x128xbf16>, vector<128x128xbf16>, vector<32x128xf32> -> vector<32x128xf32>
    %c2_i32_82 = arith.constant 2 : i32
    %98 = tpu.dynamic_rotate %97 by %c2_i32_82 dim 0 : vector<32x128xf32>, i32 -> vector<32x128xf32>
    %99 = arith.addf %94, %98 : vector<32x128xf32>
    %c1_83 = arith.constant 1 : index
    %c4_84 = arith.constant 4 : index
    %c0_85 = arith.constant 0 : index
    %c0_86 = arith.constant 0 : index
    %100 = vector.load %arg3[%c1_83, %c4_84, %c0_85, %c0_86] : memref<6x11x128x128xbf16, #tpu.memory_space<vmem>>, vector<1x1x128x128xbf16>
    %101 = vector.shape_cast %100 : vector<1x1x128x128xbf16> to vector<128x128xbf16>
    %cst_87 = arith.constant dense<0.000000e+00> : vector<32x128xf32>
    %102 = tpu.matmul %78, %101, %cst_87 {dimension_numbers = #tpu.dot_dimension_numbers<[1], [0], [0], [1], [0, 0, 1, 1], [], []>} : vector<32x128xbf16>, vector<128x128xbf16>, vector<32x128xf32> -> vector<32x128xf32>
    %c1_i32_88 = arith.constant 1 : i32
    %103 = tpu.dynamic_rotate %102 by %c1_i32_88 dim 0 : vector<32x128xf32>, i32 -> vector<32x128xf32>
    %104 = arith.addf %99, %103 : vector<32x128xf32>
    %c1_89 = arith.constant 1 : index
    %c5_90 = arith.constant 5 : index
    %c0_91 = arith.constant 0 : index
    %c0_92 = arith.constant 0 : index
    %105 = vector.load %arg3[%c1_89, %c5_90, %c0_91, %c0_92] : memref<6x11x128x128xbf16, #tpu.memory_space<vmem>>, vector<1x1x128x128xbf16>
    %106 = vector.shape_cast %105 : vector<1x1x128x128xbf16> to vector<128x128xbf16>
    %cst_93 = arith.constant dense<0.000000e+00> : vector<32x128xf32>
    %107 = tpu.matmul %78, %106, %cst_93 {dimension_numbers = #tpu.dot_dimension_numbers<[1], [0], [0], [1], [0, 0, 1, 1], [], []>} : vector<32x128xbf16>, vector<128x128xbf16>, vector<32x128xf32> -> vector<32x128xf32>
    %c0_i32_94 = arith.constant 0 : i32
    %108 = tpu.dynamic_rotate %107 by %c0_i32_94 dim 0 : vector<32x128xf32>, i32 -> vector<32x128xf32>
    %109 = arith.addf %104, %108 : vector<32x128xf32>
    %c1_95 = arith.constant 1 : index
    %c6_96 = arith.constant 6 : index
    %c0_97 = arith.constant 0 : index
    %c0_98 = arith.constant 0 : index
    %110 = vector.load %arg3[%c1_95, %c6_96, %c0_97, %c0_98] : memref<6x11x128x128xbf16, #tpu.memory_space<vmem>>, vector<1x1x128x128xbf16>
    %111 = vector.shape_cast %110 : vector<1x1x128x128xbf16> to vector<128x128xbf16>
    %cst_99 = arith.constant dense<0.000000e+00> : vector<32x128xf32>
    %112 = tpu.matmul %78, %111, %cst_99 {dimension_numbers = #tpu.dot_dimension_numbers<[1], [0], [0], [1], [0, 0, 1, 1], [], []>} : vector<32x128xbf16>, vector<128x128xbf16>, vector<32x128xf32> -> vector<32x128xf32>
    %c31_i32_100 = arith.constant 31 : i32
    %113 = tpu.dynamic_rotate %112 by %c31_i32_100 dim 0 : vector<32x128xf32>, i32 -> vector<32x128xf32>
    %114 = arith.addf %109, %113 : vector<32x128xf32>
    %c1_101 = arith.constant 1 : index
    %c7_102 = arith.constant 7 : index
    %c0_103 = arith.constant 0 : index
    %c0_104 = arith.constant 0 : index
    %115 = vector.load %arg3[%c1_101, %c7_102, %c0_103, %c0_104] : memref<6x11x128x128xbf16, #tpu.memory_space<vmem>>, vector<1x1x128x128xbf16>
    %116 = vector.shape_cast %115 : vector<1x1x128x128xbf16> to vector<128x128xbf16>
    %cst_105 = arith.constant dense<0.000000e+00> : vector<32x128xf32>
    %117 = tpu.matmul %78, %116, %cst_105 {dimension_numbers = #tpu.dot_dimension_numbers<[1], [0], [0], [1], [0, 0, 1, 1], [], []>} : vector<32x128xbf16>, vector<128x128xbf16>, vector<32x128xf32> -> vector<32x128xf32>
    %c30_i32_106 = arith.constant 30 : i32
    %118 = tpu.dynamic_rotate %117 by %c30_i32_106 dim 0 : vector<32x128xf32>, i32 -> vector<32x128xf32>
    %119 = arith.addf %114, %118 : vector<32x128xf32>
    %c1_107 = arith.constant 1 : index
    %c8_108 = arith.constant 8 : index
    %c0_109 = arith.constant 0 : index
    %c0_110 = arith.constant 0 : index
    %120 = vector.load %arg3[%c1_107, %c8_108, %c0_109, %c0_110] : memref<6x11x128x128xbf16, #tpu.memory_space<vmem>>, vector<1x1x128x128xbf16>
    %121 = vector.shape_cast %120 : vector<1x1x128x128xbf16> to vector<128x128xbf16>
    %cst_111 = arith.constant dense<0.000000e+00> : vector<32x128xf32>
    %122 = tpu.matmul %78, %121, %cst_111 {dimension_numbers = #tpu.dot_dimension_numbers<[1], [0], [0], [1], [0, 0, 1, 1], [], []>} : vector<32x128xbf16>, vector<128x128xbf16>, vector<32x128xf32> -> vector<32x128xf32>
    %c29_i32_112 = arith.constant 29 : i32
    %123 = tpu.dynamic_rotate %122 by %c29_i32_112 dim 0 : vector<32x128xf32>, i32 -> vector<32x128xf32>
    %124 = arith.addf %119, %123 : vector<32x128xf32>
    %c1_113 = arith.constant 1 : index
    %c9_114 = arith.constant 9 : index
    %c0_115 = arith.constant 0 : index
    %c0_116 = arith.constant 0 : index
    %125 = vector.load %arg3[%c1_113, %c9_114, %c0_115, %c0_116] : memref<6x11x128x128xbf16, #tpu.memory_space<vmem>>, vector<1x1x128x128xbf16>
    %126 = vector.shape_cast %125 : vector<1x1x128x128xbf16> to vector<128x128xbf16>
    %cst_117 = arith.constant dense<0.000000e+00> : vector<32x128xf32>
    %127 = tpu.matmul %78, %126, %cst_117 {dimension_numbers = #tpu.dot_dimension_numbers<[1], [0], [0], [1], [0, 0, 1, 1], [], []>} : vector<32x128xbf16>, vector<128x128xbf16>, vector<32x128xf32> -> vector<32x128xf32>
    %c28_i32_118 = arith.constant 28 : i32
    %128 = tpu.dynamic_rotate %127 by %c28_i32_118 dim 0 : vector<32x128xf32>, i32 -> vector<32x128xf32>
    %129 = arith.addf %124, %128 : vector<32x128xf32>
    %c1_119 = arith.constant 1 : index
    %c10_120 = arith.constant 10 : index
    %c0_121 = arith.constant 0 : index
    %c0_122 = arith.constant 0 : index
    %130 = vector.load %arg3[%c1_119, %c10_120, %c0_121, %c0_122] : memref<6x11x128x128xbf16, #tpu.memory_space<vmem>>, vector<1x1x128x128xbf16>
    %131 = vector.shape_cast %130 : vector<1x1x128x128xbf16> to vector<128x128xbf16>
    %cst_123 = arith.constant dense<0.000000e+00> : vector<32x128xf32>
    %132 = tpu.matmul %78, %131, %cst_123 {dimension_numbers = #tpu.dot_dimension_numbers<[1], [0], [0], [1], [0, 0, 1, 1], [], []>} : vector<32x128xbf16>, vector<128x128xbf16>, vector<32x128xf32> -> vector<32x128xf32>
    %c27_i32_124 = arith.constant 27 : i32
    %133 = tpu.dynamic_rotate %132 by %c27_i32_124 dim 0 : vector<32x128xf32>, i32 -> vector<32x128xf32>
    %134 = arith.addf %129, %133 : vector<32x128xf32>
    %c1_125 = arith.constant 1 : index
    %c0_126 = arith.constant 0 : index
    %135 = vector.load %arg4[%c1_125, %c0_126] : memref<6x128xf32, #tpu.memory_space<vmem>>, vector<1x128xf32>
    %136 = vector.shape_cast %135 : vector<1x128xf32> to vector<128xf32>
    %137 = vector.shape_cast %136 : vector<128xf32> to vector<1x128xf32>
    %138 = vector.broadcast %137 : vector<1x128xf32> to vector<32x128xf32>
    %139 = arith.addf %134, %138 : vector<32x128xf32>
    %cst_127 = arith.constant 0.000000e+00 : f32
    %140 = vector.broadcast %cst_127 : f32 to vector<32x128xf32>
    %141 = arith.maximumf %139, %140 : vector<32x128xf32>
    %cst_128 = arith.constant 0.000000e+00 : f32
    %142 = vector.broadcast %cst_128 : f32 to vector<32x128xf32>
    %143 = arith.select %8, %141, %142 : vector<32x128xi1>, vector<32x128xf32>
    %144 = arith.truncf %143 : vector<32x128xf32> to vector<32x128xbf16>
    %cst_129 = arith.constant 0.000000e+00 : f32
    %145 = vector.broadcast %cst_129 : f32 to vector<32x128xf32>
    %c2_130 = arith.constant 2 : index
    %c0_131 = arith.constant 0 : index
    %c0_132 = arith.constant 0 : index
    %c0_133 = arith.constant 0 : index
    %146 = vector.load %arg3[%c2_130, %c0_131, %c0_132, %c0_133] : memref<6x11x128x128xbf16, #tpu.memory_space<vmem>>, vector<1x1x128x128xbf16>
    %147 = vector.shape_cast %146 : vector<1x1x128x128xbf16> to vector<128x128xbf16>
    %cst_134 = arith.constant dense<0.000000e+00> : vector<32x128xf32>
    %148 = tpu.matmul %144, %147, %cst_134 {dimension_numbers = #tpu.dot_dimension_numbers<[1], [0], [0], [1], [0, 0, 1, 1], [], []>} : vector<32x128xbf16>, vector<128x128xbf16>, vector<32x128xf32> -> vector<32x128xf32>
    %c5_i32_135 = arith.constant 5 : i32
    %149 = tpu.dynamic_rotate %148 by %c5_i32_135 dim 0 : vector<32x128xf32>, i32 -> vector<32x128xf32>
    %150 = arith.addf %145, %149 : vector<32x128xf32>
    %c2_136 = arith.constant 2 : index
    %c1_137 = arith.constant 1 : index
    %c0_138 = arith.constant 0 : index
    %c0_139 = arith.constant 0 : index
    %151 = vector.load %arg3[%c2_136, %c1_137, %c0_138, %c0_139] : memref<6x11x128x128xbf16, #tpu.memory_space<vmem>>, vector<1x1x128x128xbf16>
    %152 = vector.shape_cast %151 : vector<1x1x128x128xbf16> to vector<128x128xbf16>
    %cst_140 = arith.constant dense<0.000000e+00> : vector<32x128xf32>
    %153 = tpu.matmul %144, %152, %cst_140 {dimension_numbers = #tpu.dot_dimension_numbers<[1], [0], [0], [1], [0, 0, 1, 1], [], []>} : vector<32x128xbf16>, vector<128x128xbf16>, vector<32x128xf32> -> vector<32x128xf32>
    %c4_i32_141 = arith.constant 4 : i32
    %154 = tpu.dynamic_rotate %153 by %c4_i32_141 dim 0 : vector<32x128xf32>, i32 -> vector<32x128xf32>
    %155 = arith.addf %150, %154 : vector<32x128xf32>
    %c2_142 = arith.constant 2 : index
    %c2_143 = arith.constant 2 : index
    %c0_144 = arith.constant 0 : index
    %c0_145 = arith.constant 0 : index
    %156 = vector.load %arg3[%c2_142, %c2_143, %c0_144, %c0_145] : memref<6x11x128x128xbf16, #tpu.memory_space<vmem>>, vector<1x1x128x128xbf16>
    %157 = vector.shape_cast %156 : vector<1x1x128x128xbf16> to vector<128x128xbf16>
    %cst_146 = arith.constant dense<0.000000e+00> : vector<32x128xf32>
    %158 = tpu.matmul %144, %157, %cst_146 {dimension_numbers = #tpu.dot_dimension_numbers<[1], [0], [0], [1], [0, 0, 1, 1], [], []>} : vector<32x128xbf16>, vector<128x128xbf16>, vector<32x128xf32> -> vector<32x128xf32>
    %c3_i32_147 = arith.constant 3 : i32
    %159 = tpu.dynamic_rotate %158 by %c3_i32_147 dim 0 : vector<32x128xf32>, i32 -> vector<32x128xf32>
    %160 = arith.addf %155, %159 : vector<32x128xf32>
    %c2_148 = arith.constant 2 : index
    %c3_149 = arith.constant 3 : index
    %c0_150 = arith.constant 0 : index
    %c0_151 = arith.constant 0 : index
    %161 = vector.load %arg3[%c2_148, %c3_149, %c0_150, %c0_151] : memref<6x11x128x128xbf16, #tpu.memory_space<vmem>>, vector<1x1x128x128xbf16>
    %162 = vector.shape_cast %161 : vector<1x1x128x128xbf16> to vector<128x128xbf16>
    %cst_152 = arith.constant dense<0.000000e+00> : vector<32x128xf32>
    %163 = tpu.matmul %144, %162, %cst_152 {dimension_numbers = #tpu.dot_dimension_numbers<[1], [0], [0], [1], [0, 0, 1, 1], [], []>} : vector<32x128xbf16>, vector<128x128xbf16>, vector<32x128xf32> -> vector<32x128xf32>
    %c2_i32_153 = arith.constant 2 : i32
    %164 = tpu.dynamic_rotate %163 by %c2_i32_153 dim 0 : vector<32x128xf32>, i32 -> vector<32x128xf32>
    %165 = arith.addf %160, %164 : vector<32x128xf32>
    %c2_154 = arith.constant 2 : index
    %c4_155 = arith.constant 4 : index
    %c0_156 = arith.constant 0 : index
    %c0_157 = arith.constant 0 : index
    %166 = vector.load %arg3[%c2_154, %c4_155, %c0_156, %c0_157] : memref<6x11x128x128xbf16, #tpu.memory_space<vmem>>, vector<1x1x128x128xbf16>
    %167 = vector.shape_cast %166 : vector<1x1x128x128xbf16> to vector<128x128xbf16>
    %cst_158 = arith.constant dense<0.000000e+00> : vector<32x128xf32>
    %168 = tpu.matmul %144, %167, %cst_158 {dimension_numbers = #tpu.dot_dimension_numbers<[1], [0], [0], [1], [0, 0, 1, 1], [], []>} : vector<32x128xbf16>, vector<128x128xbf16>, vector<32x128xf32> -> vector<32x128xf32>
    %c1_i32_159 = arith.constant 1 : i32
    %169 = tpu.dynamic_rotate %168 by %c1_i32_159 dim 0 : vector<32x128xf32>, i32 -> vector<32x128xf32>
    %170 = arith.addf %165, %169 : vector<32x128xf32>
    %c2_160 = arith.constant 2 : index
    %c5_161 = arith.constant 5 : index
    %c0_162 = arith.constant 0 : index
    %c0_163 = arith.constant 0 : index
    %171 = vector.load %arg3[%c2_160, %c5_161, %c0_162, %c0_163] : memref<6x11x128x128xbf16, #tpu.memory_space<vmem>>, vector<1x1x128x128xbf16>
    %172 = vector.shape_cast %171 : vector<1x1x128x128xbf16> to vector<128x128xbf16>
    %cst_164 = arith.constant dense<0.000000e+00> : vector<32x128xf32>
    %173 = tpu.matmul %144, %172, %cst_164 {dimension_numbers = #tpu.dot_dimension_numbers<[1], [0], [0], [1], [0, 0, 1, 1], [], []>} : vector<32x128xbf16>, vector<128x128xbf16>, vector<32x128xf32> -> vector<32x128xf32>
    %c0_i32_165 = arith.constant 0 : i32
    %174 = tpu.dynamic_rotate %173 by %c0_i32_165 dim 0 : vector<32x128xf32>, i32 -> vector<32x128xf32>
    %175 = arith.addf %170, %174 : vector<32x128xf32>
    %c2_166 = arith.constant 2 : index
    %c6_167 = arith.constant 6 : index
    %c0_168 = arith.constant 0 : index
    %c0_169 = arith.constant 0 : index
    %176 = vector.load %arg3[%c2_166, %c6_167, %c0_168, %c0_169] : memref<6x11x128x128xbf16, #tpu.memory_space<vmem>>, vector<1x1x128x128xbf16>
    %177 = vector.shape_cast %176 : vector<1x1x128x128xbf16> to vector<128x128xbf16>
    %cst_170 = arith.constant dense<0.000000e+00> : vector<32x128xf32>
    %178 = tpu.matmul %144, %177, %cst_170 {dimension_numbers = #tpu.dot_dimension_numbers<[1], [0], [0], [1], [0, 0, 1, 1], [], []>} : vector<32x128xbf16>, vector<128x128xbf16>, vector<32x128xf32> -> vector<32x128xf32>
    %c31_i32_171 = arith.constant 31 : i32
    %179 = tpu.dynamic_rotate %178 by %c31_i32_171 dim 0 : vector<32x128xf32>, i32 -> vector<32x128xf32>
    %180 = arith.addf %175, %179 : vector<32x128xf32>
    %c2_172 = arith.constant 2 : index
    %c7_173 = arith.constant 7 : index
    %c0_174 = arith.constant 0 : index
    %c0_175 = arith.constant 0 : index
    %181 = vector.load %arg3[%c2_172, %c7_173, %c0_174, %c0_175] : memref<6x11x128x128xbf16, #tpu.memory_space<vmem>>, vector<1x1x128x128xbf16>
    %182 = vector.shape_cast %181 : vector<1x1x128x128xbf16> to vector<128x128xbf16>
    %cst_176 = arith.constant dense<0.000000e+00> : vector<32x128xf32>
    %183 = tpu.matmul %144, %182, %cst_176 {dimension_numbers = #tpu.dot_dimension_numbers<[1], [0], [0], [1], [0, 0, 1, 1], [], []>} : vector<32x128xbf16>, vector<128x128xbf16>, vector<32x128xf32> -> vector<32x128xf32>
    %c30_i32_177 = arith.constant 30 : i32
    %184 = tpu.dynamic_rotate %183 by %c30_i32_177 dim 0 : vector<32x128xf32>, i32 -> vector<32x128xf32>
    %185 = arith.addf %180, %184 : vector<32x128xf32>
    %c2_178 = arith.constant 2 : index
    %c8_179 = arith.constant 8 : index
    %c0_180 = arith.constant 0 : index
    %c0_181 = arith.constant 0 : index
    %186 = vector.load %arg3[%c2_178, %c8_179, %c0_180, %c0_181] : memref<6x11x128x128xbf16, #tpu.memory_space<vmem>>, vector<1x1x128x128xbf16>
    %187 = vector.shape_cast %186 : vector<1x1x128x128xbf16> to vector<128x128xbf16>
    %cst_182 = arith.constant dense<0.000000e+00> : vector<32x128xf32>
    %188 = tpu.matmul %144, %187, %cst_182 {dimension_numbers = #tpu.dot_dimension_numbers<[1], [0], [0], [1], [0, 0, 1, 1], [], []>} : vector<32x128xbf16>, vector<128x128xbf16>, vector<32x128xf32> -> vector<32x128xf32>
    %c29_i32_183 = arith.constant 29 : i32
    %189 = tpu.dynamic_rotate %188 by %c29_i32_183 dim 0 : vector<32x128xf32>, i32 -> vector<32x128xf32>
    %190 = arith.addf %185, %189 : vector<32x128xf32>
    %c2_184 = arith.constant 2 : index
    %c9_185 = arith.constant 9 : index
    %c0_186 = arith.constant 0 : index
    %c0_187 = arith.constant 0 : index
    %191 = vector.load %arg3[%c2_184, %c9_185, %c0_186, %c0_187] : memref<6x11x128x128xbf16, #tpu.memory_space<vmem>>, vector<1x1x128x128xbf16>
    %192 = vector.shape_cast %191 : vector<1x1x128x128xbf16> to vector<128x128xbf16>
    %cst_188 = arith.constant dense<0.000000e+00> : vector<32x128xf32>
    %193 = tpu.matmul %144, %192, %cst_188 {dimension_numbers = #tpu.dot_dimension_numbers<[1], [0], [0], [1], [0, 0, 1, 1], [], []>} : vector<32x128xbf16>, vector<128x128xbf16>, vector<32x128xf32> -> vector<32x128xf32>
    %c28_i32_189 = arith.constant 28 : i32
    %194 = tpu.dynamic_rotate %193 by %c28_i32_189 dim 0 : vector<32x128xf32>, i32 -> vector<32x128xf32>
    %195 = arith.addf %190, %194 : vector<32x128xf32>
    %c2_190 = arith.constant 2 : index
    %c10_191 = arith.constant 10 : index
    %c0_192 = arith.constant 0 : index
    %c0_193 = arith.constant 0 : index
    %196 = vector.load %arg3[%c2_190, %c10_191, %c0_192, %c0_193] : memref<6x11x128x128xbf16, #tpu.memory_space<vmem>>, vector<1x1x128x128xbf16>
    %197 = vector.shape_cast %196 : vector<1x1x128x128xbf16> to vector<128x128xbf16>
    %cst_194 = arith.constant dense<0.000000e+00> : vector<32x128xf32>
    %198 = tpu.matmul %144, %197, %cst_194 {dimension_numbers = #tpu.dot_dimension_numbers<[1], [0], [0], [1], [0, 0, 1, 1], [], []>} : vector<32x128xbf16>, vector<128x128xbf16>, vector<32x128xf32> -> vector<32x128xf32>
    %c27_i32_195 = arith.constant 27 : i32
    %199 = tpu.dynamic_rotate %198 by %c27_i32_195 dim 0 : vector<32x128xf32>, i32 -> vector<32x128xf32>
    %200 = arith.addf %195, %199 : vector<32x128xf32>
    %c2_196 = arith.constant 2 : index
    %c0_197 = arith.constant 0 : index
    %201 = vector.load %arg4[%c2_196, %c0_197] : memref<6x128xf32, #tpu.memory_space<vmem>>, vector<1x128xf32>
    %202 = vector.shape_cast %201 : vector<1x128xf32> to vector<128xf32>
    %203 = vector.shape_cast %202 : vector<128xf32> to vector<1x128xf32>
    %204 = vector.broadcast %203 : vector<1x128xf32> to vector<32x128xf32>
    %205 = arith.addf %200, %204 : vector<32x128xf32>
    %cst_198 = arith.constant 0.000000e+00 : f32
    %206 = vector.broadcast %cst_198 : f32 to vector<32x128xf32>
    %207 = arith.maximumf %205, %206 : vector<32x128xf32>
    %cst_199 = arith.constant 0.000000e+00 : f32
    %208 = vector.broadcast %cst_199 : f32 to vector<32x128xf32>
    %209 = arith.select %8, %207, %208 : vector<32x128xi1>, vector<32x128xf32>
    %210 = arith.truncf %209 : vector<32x128xf32> to vector<32x128xbf16>
    %cst_200 = arith.constant 0.000000e+00 : f32
    %211 = vector.broadcast %cst_200 : f32 to vector<32x128xf32>
    %c3_201 = arith.constant 3 : index
    %c0_202 = arith.constant 0 : index
    %c0_203 = arith.constant 0 : index
    %c0_204 = arith.constant 0 : index
    %212 = vector.load %arg3[%c3_201, %c0_202, %c0_203, %c0_204] : memref<6x11x128x128xbf16, #tpu.memory_space<vmem>>, vector<1x1x128x128xbf16>
    %213 = vector.shape_cast %212 : vector<1x1x128x128xbf16> to vector<128x128xbf16>
    %cst_205 = arith.constant dense<0.000000e+00> : vector<32x128xf32>
    %214 = tpu.matmul %210, %213, %cst_205 {dimension_numbers = #tpu.dot_dimension_numbers<[1], [0], [0], [1], [0, 0, 1, 1], [], []>} : vector<32x128xbf16>, vector<128x128xbf16>, vector<32x128xf32> -> vector<32x128xf32>
    %c5_i32_206 = arith.constant 5 : i32
    %215 = tpu.dynamic_rotate %214 by %c5_i32_206 dim 0 : vector<32x128xf32>, i32 -> vector<32x128xf32>
    %216 = arith.addf %211, %215 : vector<32x128xf32>
    %c3_207 = arith.constant 3 : index
    %c1_208 = arith.constant 1 : index
    %c0_209 = arith.constant 0 : index
    %c0_210 = arith.constant 0 : index
    %217 = vector.load %arg3[%c3_207, %c1_208, %c0_209, %c0_210] : memref<6x11x128x128xbf16, #tpu.memory_space<vmem>>, vector<1x1x128x128xbf16>
    %218 = vector.shape_cast %217 : vector<1x1x128x128xbf16> to vector<128x128xbf16>
    %cst_211 = arith.constant dense<0.000000e+00> : vector<32x128xf32>
    %219 = tpu.matmul %210, %218, %cst_211 {dimension_numbers = #tpu.dot_dimension_numbers<[1], [0], [0], [1], [0, 0, 1, 1], [], []>} : vector<32x128xbf16>, vector<128x128xbf16>, vector<32x128xf32> -> vector<32x128xf32>
    %c4_i32_212 = arith.constant 4 : i32
    %220 = tpu.dynamic_rotate %219 by %c4_i32_212 dim 0 : vector<32x128xf32>, i32 -> vector<32x128xf32>
    %221 = arith.addf %216, %220 : vector<32x128xf32>
    %c3_213 = arith.constant 3 : index
    %c2_214 = arith.constant 2 : index
    %c0_215 = arith.constant 0 : index
    %c0_216 = arith.constant 0 : index
    %222 = vector.load %arg3[%c3_213, %c2_214, %c0_215, %c0_216] : memref<6x11x128x128xbf16, #tpu.memory_space<vmem>>, vector<1x1x128x128xbf16>
    %223 = vector.shape_cast %222 : vector<1x1x128x128xbf16> to vector<128x128xbf16>
    %cst_217 = arith.constant dense<0.000000e+00> : vector<32x128xf32>
    %224 = tpu.matmul %210, %223, %cst_217 {dimension_numbers = #tpu.dot_dimension_numbers<[1], [0], [0], [1], [0, 0, 1, 1], [], []>} : vector<32x128xbf16>, vector<128x128xbf16>, vector<32x128xf32> -> vector<32x128xf32>
    %c3_i32_218 = arith.constant 3 : i32
    %225 = tpu.dynamic_rotate %224 by %c3_i32_218 dim 0 : vector<32x128xf32>, i32 -> vector<32x128xf32>
    %226 = arith.addf %221, %225 : vector<32x128xf32>
    %c3_219 = arith.constant 3 : index
    %c3_220 = arith.constant 3 : index
    %c0_221 = arith.constant 0 : index
    %c0_222 = arith.constant 0 : index
    %227 = vector.load %arg3[%c3_219, %c3_220, %c0_221, %c0_222] : memref<6x11x128x128xbf16, #tpu.memory_space<vmem>>, vector<1x1x128x128xbf16>
    %228 = vector.shape_cast %227 : vector<1x1x128x128xbf16> to vector<128x128xbf16>
    %cst_223 = arith.constant dense<0.000000e+00> : vector<32x128xf32>
    %229 = tpu.matmul %210, %228, %cst_223 {dimension_numbers = #tpu.dot_dimension_numbers<[1], [0], [0], [1], [0, 0, 1, 1], [], []>} : vector<32x128xbf16>, vector<128x128xbf16>, vector<32x128xf32> -> vector<32x128xf32>
    %c2_i32_224 = arith.constant 2 : i32
    %230 = tpu.dynamic_rotate %229 by %c2_i32_224 dim 0 : vector<32x128xf32>, i32 -> vector<32x128xf32>
    %231 = arith.addf %226, %230 : vector<32x128xf32>
    %c3_225 = arith.constant 3 : index
    %c4_226 = arith.constant 4 : index
    %c0_227 = arith.constant 0 : index
    %c0_228 = arith.constant 0 : index
    %232 = vector.load %arg3[%c3_225, %c4_226, %c0_227, %c0_228] : memref<6x11x128x128xbf16, #tpu.memory_space<vmem>>, vector<1x1x128x128xbf16>
    %233 = vector.shape_cast %232 : vector<1x1x128x128xbf16> to vector<128x128xbf16>
    %cst_229 = arith.constant dense<0.000000e+00> : vector<32x128xf32>
    %234 = tpu.matmul %210, %233, %cst_229 {dimension_numbers = #tpu.dot_dimension_numbers<[1], [0], [0], [1], [0, 0, 1, 1], [], []>} : vector<32x128xbf16>, vector<128x128xbf16>, vector<32x128xf32> -> vector<32x128xf32>
    %c1_i32_230 = arith.constant 1 : i32
    %235 = tpu.dynamic_rotate %234 by %c1_i32_230 dim 0 : vector<32x128xf32>, i32 -> vector<32x128xf32>
    %236 = arith.addf %231, %235 : vector<32x128xf32>
    %c3_231 = arith.constant 3 : index
    %c5_232 = arith.constant 5 : index
    %c0_233 = arith.constant 0 : index
    %c0_234 = arith.constant 0 : index
    %237 = vector.load %arg3[%c3_231, %c5_232, %c0_233, %c0_234] : memref<6x11x128x128xbf16, #tpu.memory_space<vmem>>, vector<1x1x128x128xbf16>
    %238 = vector.shape_cast %237 : vector<1x1x128x128xbf16> to vector<128x128xbf16>
    %cst_235 = arith.constant dense<0.000000e+00> : vector<32x128xf32>
    %239 = tpu.matmul %210, %238, %cst_235 {dimension_numbers = #tpu.dot_dimension_numbers<[1], [0], [0], [1], [0, 0, 1, 1], [], []>} : vector<32x128xbf16>, vector<128x128xbf16>, vector<32x128xf32> -> vector<32x128xf32>
    %c0_i32_236 = arith.constant 0 : i32
    %240 = tpu.dynamic_rotate %239 by %c0_i32_236 dim 0 : vector<32x128xf32>, i32 -> vector<32x128xf32>
    %241 = arith.addf %236, %240 : vector<32x128xf32>
    %c3_237 = arith.constant 3 : index
    %c6_238 = arith.constant 6 : index
    %c0_239 = arith.constant 0 : index
    %c0_240 = arith.constant 0 : index
    %242 = vector.load %arg3[%c3_237, %c6_238, %c0_239, %c0_240] : memref<6x11x128x128xbf16, #tpu.memory_space<vmem>>, vector<1x1x128x128xbf16>
    %243 = vector.shape_cast %242 : vector<1x1x128x128xbf16> to vector<128x128xbf16>
    %cst_241 = arith.constant dense<0.000000e+00> : vector<32x128xf32>
    %244 = tpu.matmul %210, %243, %cst_241 {dimension_numbers = #tpu.dot_dimension_numbers<[1], [0], [0], [1], [0, 0, 1, 1], [], []>} : vector<32x128xbf16>, vector<128x128xbf16>, vector<32x128xf32> -> vector<32x128xf32>
    %c31_i32_242 = arith.constant 31 : i32
    %245 = tpu.dynamic_rotate %244 by %c31_i32_242 dim 0 : vector<32x128xf32>, i32 -> vector<32x128xf32>
    %246 = arith.addf %241, %245 : vector<32x128xf32>
    %c3_243 = arith.constant 3 : index
    %c7_244 = arith.constant 7 : index
    %c0_245 = arith.constant 0 : index
    %c0_246 = arith.constant 0 : index
    %247 = vector.load %arg3[%c3_243, %c7_244, %c0_245, %c0_246] : memref<6x11x128x128xbf16, #tpu.memory_space<vmem>>, vector<1x1x128x128xbf16>
    %248 = vector.shape_cast %247 : vector<1x1x128x128xbf16> to vector<128x128xbf16>
    %cst_247 = arith.constant dense<0.000000e+00> : vector<32x128xf32>
    %249 = tpu.matmul %210, %248, %cst_247 {dimension_numbers = #tpu.dot_dimension_numbers<[1], [0], [0], [1], [0, 0, 1, 1], [], []>} : vector<32x128xbf16>, vector<128x128xbf16>, vector<32x128xf32> -> vector<32x128xf32>
    %c30_i32_248 = arith.constant 30 : i32
    %250 = tpu.dynamic_rotate %249 by %c30_i32_248 dim 0 : vector<32x128xf32>, i32 -> vector<32x128xf32>
    %251 = arith.addf %246, %250 : vector<32x128xf32>
    %c3_249 = arith.constant 3 : index
    %c8_250 = arith.constant 8 : index
    %c0_251 = arith.constant 0 : index
    %c0_252 = arith.constant 0 : index
    %252 = vector.load %arg3[%c3_249, %c8_250, %c0_251, %c0_252] : memref<6x11x128x128xbf16, #tpu.memory_space<vmem>>, vector<1x1x128x128xbf16>
    %253 = vector.shape_cast %252 : vector<1x1x128x128xbf16> to vector<128x128xbf16>
    %cst_253 = arith.constant dense<0.000000e+00> : vector<32x128xf32>
    %254 = tpu.matmul %210, %253, %cst_253 {dimension_numbers = #tpu.dot_dimension_numbers<[1], [0], [0], [1], [0, 0, 1, 1], [], []>} : vector<32x128xbf16>, vector<128x128xbf16>, vector<32x128xf32> -> vector<32x128xf32>
    %c29_i32_254 = arith.constant 29 : i32
    %255 = tpu.dynamic_rotate %254 by %c29_i32_254 dim 0 : vector<32x128xf32>, i32 -> vector<32x128xf32>
    %256 = arith.addf %251, %255 : vector<32x128xf32>
    %c3_255 = arith.constant 3 : index
    %c9_256 = arith.constant 9 : index
    %c0_257 = arith.constant 0 : index
    %c0_258 = arith.constant 0 : index
    %257 = vector.load %arg3[%c3_255, %c9_256, %c0_257, %c0_258] : memref<6x11x128x128xbf16, #tpu.memory_space<vmem>>, vector<1x1x128x128xbf16>
    %258 = vector.shape_cast %257 : vector<1x1x128x128xbf16> to vector<128x128xbf16>
    %cst_259 = arith.constant dense<0.000000e+00> : vector<32x128xf32>
    %259 = tpu.matmul %210, %258, %cst_259 {dimension_numbers = #tpu.dot_dimension_numbers<[1], [0], [0], [1], [0, 0, 1, 1], [], []>} : vector<32x128xbf16>, vector<128x128xbf16>, vector<32x128xf32> -> vector<32x128xf32>
    %c28_i32_260 = arith.constant 28 : i32
    %260 = tpu.dynamic_rotate %259 by %c28_i32_260 dim 0 : vector<32x128xf32>, i32 -> vector<32x128xf32>
    %261 = arith.addf %256, %260 : vector<32x128xf32>
    %c3_261 = arith.constant 3 : index
    %c10_262 = arith.constant 10 : index
    %c0_263 = arith.constant 0 : index
    %c0_264 = arith.constant 0 : index
    %262 = vector.load %arg3[%c3_261, %c10_262, %c0_263, %c0_264] : memref<6x11x128x128xbf16, #tpu.memory_space<vmem>>, vector<1x1x128x128xbf16>
    %263 = vector.shape_cast %262 : vector<1x1x128x128xbf16> to vector<128x128xbf16>
    %cst_265 = arith.constant dense<0.000000e+00> : vector<32x128xf32>
    %264 = tpu.matmul %210, %263, %cst_265 {dimension_numbers = #tpu.dot_dimension_numbers<[1], [0], [0], [1], [0, 0, 1, 1], [], []>} : vector<32x128xbf16>, vector<128x128xbf16>, vector<32x128xf32> -> vector<32x128xf32>
    %c27_i32_266 = arith.constant 27 : i32
    %265 = tpu.dynamic_rotate %264 by %c27_i32_266 dim 0 : vector<32x128xf32>, i32 -> vector<32x128xf32>
    %266 = arith.addf %261, %265 : vector<32x128xf32>
    %c3_267 = arith.constant 3 : index
    %c0_268 = arith.constant 0 : index
    %267 = vector.load %arg4[%c3_267, %c0_268] : memref<6x128xf32, #tpu.memory_space<vmem>>, vector<1x128xf32>
    %268 = vector.shape_cast %267 : vector<1x128xf32> to vector<128xf32>
    %269 = vector.shape_cast %268 : vector<128xf32> to vector<1x128xf32>
    %270 = vector.broadcast %269 : vector<1x128xf32> to vector<32x128xf32>
    %271 = arith.addf %266, %270 : vector<32x128xf32>
    %cst_269 = arith.constant 0.000000e+00 : f32
    %272 = vector.broadcast %cst_269 : f32 to vector<32x128xf32>
    %273 = arith.maximumf %271, %272 : vector<32x128xf32>
    %cst_270 = arith.constant 0.000000e+00 : f32
    %274 = vector.broadcast %cst_270 : f32 to vector<32x128xf32>
    %275 = arith.select %8, %273, %274 : vector<32x128xi1>, vector<32x128xf32>
    %276 = arith.truncf %275 : vector<32x128xf32> to vector<32x128xbf16>
    %cst_271 = arith.constant 0.000000e+00 : f32
    %277 = vector.broadcast %cst_271 : f32 to vector<32x128xf32>
    %c4_272 = arith.constant 4 : index
    %c0_273 = arith.constant 0 : index
    %c0_274 = arith.constant 0 : index
    %c0_275 = arith.constant 0 : index
    %278 = vector.load %arg3[%c4_272, %c0_273, %c0_274, %c0_275] : memref<6x11x128x128xbf16, #tpu.memory_space<vmem>>, vector<1x1x128x128xbf16>
    %279 = vector.shape_cast %278 : vector<1x1x128x128xbf16> to vector<128x128xbf16>
    %cst_276 = arith.constant dense<0.000000e+00> : vector<32x128xf32>
    %280 = tpu.matmul %276, %279, %cst_276 {dimension_numbers = #tpu.dot_dimension_numbers<[1], [0], [0], [1], [0, 0, 1, 1], [], []>} : vector<32x128xbf16>, vector<128x128xbf16>, vector<32x128xf32> -> vector<32x128xf32>
    %c5_i32_277 = arith.constant 5 : i32
    %281 = tpu.dynamic_rotate %280 by %c5_i32_277 dim 0 : vector<32x128xf32>, i32 -> vector<32x128xf32>
    %282 = arith.addf %277, %281 : vector<32x128xf32>
    %c4_278 = arith.constant 4 : index
    %c1_279 = arith.constant 1 : index
    %c0_280 = arith.constant 0 : index
    %c0_281 = arith.constant 0 : index
    %283 = vector.load %arg3[%c4_278, %c1_279, %c0_280, %c0_281] : memref<6x11x128x128xbf16, #tpu.memory_space<vmem>>, vector<1x1x128x128xbf16>
    %284 = vector.shape_cast %283 : vector<1x1x128x128xbf16> to vector<128x128xbf16>
    %cst_282 = arith.constant dense<0.000000e+00> : vector<32x128xf32>
    %285 = tpu.matmul %276, %284, %cst_282 {dimension_numbers = #tpu.dot_dimension_numbers<[1], [0], [0], [1], [0, 0, 1, 1], [], []>} : vector<32x128xbf16>, vector<128x128xbf16>, vector<32x128xf32> -> vector<32x128xf32>
    %c4_i32_283 = arith.constant 4 : i32
    %286 = tpu.dynamic_rotate %285 by %c4_i32_283 dim 0 : vector<32x128xf32>, i32 -> vector<32x128xf32>
    %287 = arith.addf %282, %286 : vector<32x128xf32>
    %c4_284 = arith.constant 4 : index
    %c2_285 = arith.constant 2 : index
    %c0_286 = arith.constant 0 : index
    %c0_287 = arith.constant 0 : index
    %288 = vector.load %arg3[%c4_284, %c2_285, %c0_286, %c0_287] : memref<6x11x128x128xbf16, #tpu.memory_space<vmem>>, vector<1x1x128x128xbf16>
    %289 = vector.shape_cast %288 : vector<1x1x128x128xbf16> to vector<128x128xbf16>
    %cst_288 = arith.constant dense<0.000000e+00> : vector<32x128xf32>
    %290 = tpu.matmul %276, %289, %cst_288 {dimension_numbers = #tpu.dot_dimension_numbers<[1], [0], [0], [1], [0, 0, 1, 1], [], []>} : vector<32x128xbf16>, vector<128x128xbf16>, vector<32x128xf32> -> vector<32x128xf32>
    %c3_i32_289 = arith.constant 3 : i32
    %291 = tpu.dynamic_rotate %290 by %c3_i32_289 dim 0 : vector<32x128xf32>, i32 -> vector<32x128xf32>
    %292 = arith.addf %287, %291 : vector<32x128xf32>
    %c4_290 = arith.constant 4 : index
    %c3_291 = arith.constant 3 : index
    %c0_292 = arith.constant 0 : index
    %c0_293 = arith.constant 0 : index
    %293 = vector.load %arg3[%c4_290, %c3_291, %c0_292, %c0_293] : memref<6x11x128x128xbf16, #tpu.memory_space<vmem>>, vector<1x1x128x128xbf16>
    %294 = vector.shape_cast %293 : vector<1x1x128x128xbf16> to vector<128x128xbf16>
    %cst_294 = arith.constant dense<0.000000e+00> : vector<32x128xf32>
    %295 = tpu.matmul %276, %294, %cst_294 {dimension_numbers = #tpu.dot_dimension_numbers<[1], [0], [0], [1], [0, 0, 1, 1], [], []>} : vector<32x128xbf16>, vector<128x128xbf16>, vector<32x128xf32> -> vector<32x128xf32>
    %c2_i32_295 = arith.constant 2 : i32
    %296 = tpu.dynamic_rotate %295 by %c2_i32_295 dim 0 : vector<32x128xf32>, i32 -> vector<32x128xf32>
    %297 = arith.addf %292, %296 : vector<32x128xf32>
    %c4_296 = arith.constant 4 : index
    %c4_297 = arith.constant 4 : index
    %c0_298 = arith.constant 0 : index
    %c0_299 = arith.constant 0 : index
    %298 = vector.load %arg3[%c4_296, %c4_297, %c0_298, %c0_299] : memref<6x11x128x128xbf16, #tpu.memory_space<vmem>>, vector<1x1x128x128xbf16>
    %299 = vector.shape_cast %298 : vector<1x1x128x128xbf16> to vector<128x128xbf16>
    %cst_300 = arith.constant dense<0.000000e+00> : vector<32x128xf32>
    %300 = tpu.matmul %276, %299, %cst_300 {dimension_numbers = #tpu.dot_dimension_numbers<[1], [0], [0], [1], [0, 0, 1, 1], [], []>} : vector<32x128xbf16>, vector<128x128xbf16>, vector<32x128xf32> -> vector<32x128xf32>
    %c1_i32_301 = arith.constant 1 : i32
    %301 = tpu.dynamic_rotate %300 by %c1_i32_301 dim 0 : vector<32x128xf32>, i32 -> vector<32x128xf32>
    %302 = arith.addf %297, %301 : vector<32x128xf32>
    %c4_302 = arith.constant 4 : index
    %c5_303 = arith.constant 5 : index
    %c0_304 = arith.constant 0 : index
    %c0_305 = arith.constant 0 : index
    %303 = vector.load %arg3[%c4_302, %c5_303, %c0_304, %c0_305] : memref<6x11x128x128xbf16, #tpu.memory_space<vmem>>, vector<1x1x128x128xbf16>
    %304 = vector.shape_cast %303 : vector<1x1x128x128xbf16> to vector<128x128xbf16>
    %cst_306 = arith.constant dense<0.000000e+00> : vector<32x128xf32>
    %305 = tpu.matmul %276, %304, %cst_306 {dimension_numbers = #tpu.dot_dimension_numbers<[1], [0], [0], [1], [0, 0, 1, 1], [], []>} : vector<32x128xbf16>, vector<128x128xbf16>, vector<32x128xf32> -> vector<32x128xf32>
    %c0_i32_307 = arith.constant 0 : i32
    %306 = tpu.dynamic_rotate %305 by %c0_i32_307 dim 0 : vector<32x128xf32>, i32 -> vector<32x128xf32>
    %307 = arith.addf %302, %306 : vector<32x128xf32>
    %c4_308 = arith.constant 4 : index
    %c6_309 = arith.constant 6 : index
    %c0_310 = arith.constant 0 : index
    %c0_311 = arith.constant 0 : index
    %308 = vector.load %arg3[%c4_308, %c6_309, %c0_310, %c0_311] : memref<6x11x128x128xbf16, #tpu.memory_space<vmem>>, vector<1x1x128x128xbf16>
    %309 = vector.shape_cast %308 : vector<1x1x128x128xbf16> to vector<128x128xbf16>
    %cst_312 = arith.constant dense<0.000000e+00> : vector<32x128xf32>
    %310 = tpu.matmul %276, %309, %cst_312 {dimension_numbers = #tpu.dot_dimension_numbers<[1], [0], [0], [1], [0, 0, 1, 1], [], []>} : vector<32x128xbf16>, vector<128x128xbf16>, vector<32x128xf32> -> vector<32x128xf32>
    %c31_i32_313 = arith.constant 31 : i32
    %311 = tpu.dynamic_rotate %310 by %c31_i32_313 dim 0 : vector<32x128xf32>, i32 -> vector<32x128xf32>
    %312 = arith.addf %307, %311 : vector<32x128xf32>
    %c4_314 = arith.constant 4 : index
    %c7_315 = arith.constant 7 : index
    %c0_316 = arith.constant 0 : index
    %c0_317 = arith.constant 0 : index
    %313 = vector.load %arg3[%c4_314, %c7_315, %c0_316, %c0_317] : memref<6x11x128x128xbf16, #tpu.memory_space<vmem>>, vector<1x1x128x128xbf16>
    %314 = vector.shape_cast %313 : vector<1x1x128x128xbf16> to vector<128x128xbf16>
    %cst_318 = arith.constant dense<0.000000e+00> : vector<32x128xf32>
    %315 = tpu.matmul %276, %314, %cst_318 {dimension_numbers = #tpu.dot_dimension_numbers<[1], [0], [0], [1], [0, 0, 1, 1], [], []>} : vector<32x128xbf16>, vector<128x128xbf16>, vector<32x128xf32> -> vector<32x128xf32>
    %c30_i32_319 = arith.constant 30 : i32
    %316 = tpu.dynamic_rotate %315 by %c30_i32_319 dim 0 : vector<32x128xf32>, i32 -> vector<32x128xf32>
    %317 = arith.addf %312, %316 : vector<32x128xf32>
    %c4_320 = arith.constant 4 : index
    %c8_321 = arith.constant 8 : index
    %c0_322 = arith.constant 0 : index
    %c0_323 = arith.constant 0 : index
    %318 = vector.load %arg3[%c4_320, %c8_321, %c0_322, %c0_323] : memref<6x11x128x128xbf16, #tpu.memory_space<vmem>>, vector<1x1x128x128xbf16>
    %319 = vector.shape_cast %318 : vector<1x1x128x128xbf16> to vector<128x128xbf16>
    %cst_324 = arith.constant dense<0.000000e+00> : vector<32x128xf32>
    %320 = tpu.matmul %276, %319, %cst_324 {dimension_numbers = #tpu.dot_dimension_numbers<[1], [0], [0], [1], [0, 0, 1, 1], [], []>} : vector<32x128xbf16>, vector<128x128xbf16>, vector<32x128xf32> -> vector<32x128xf32>
    %c29_i32_325 = arith.constant 29 : i32
    %321 = tpu.dynamic_rotate %320 by %c29_i32_325 dim 0 : vector<32x128xf32>, i32 -> vector<32x128xf32>
    %322 = arith.addf %317, %321 : vector<32x128xf32>
    %c4_326 = arith.constant 4 : index
    %c9_327 = arith.constant 9 : index
    %c0_328 = arith.constant 0 : index
    %c0_329 = arith.constant 0 : index
    %323 = vector.load %arg3[%c4_326, %c9_327, %c0_328, %c0_329] : memref<6x11x128x128xbf16, #tpu.memory_space<vmem>>, vector<1x1x128x128xbf16>
    %324 = vector.shape_cast %323 : vector<1x1x128x128xbf16> to vector<128x128xbf16>
    %cst_330 = arith.constant dense<0.000000e+00> : vector<32x128xf32>
    %325 = tpu.matmul %276, %324, %cst_330 {dimension_numbers = #tpu.dot_dimension_numbers<[1], [0], [0], [1], [0, 0, 1, 1], [], []>} : vector<32x128xbf16>, vector<128x128xbf16>, vector<32x128xf32> -> vector<32x128xf32>
    %c28_i32_331 = arith.constant 28 : i32
    %326 = tpu.dynamic_rotate %325 by %c28_i32_331 dim 0 : vector<32x128xf32>, i32 -> vector<32x128xf32>
    %327 = arith.addf %322, %326 : vector<32x128xf32>
    %c4_332 = arith.constant 4 : index
    %c10_333 = arith.constant 10 : index
    %c0_334 = arith.constant 0 : index
    %c0_335 = arith.constant 0 : index
    %328 = vector.load %arg3[%c4_332, %c10_333, %c0_334, %c0_335] : memref<6x11x128x128xbf16, #tpu.memory_space<vmem>>, vector<1x1x128x128xbf16>
    %329 = vector.shape_cast %328 : vector<1x1x128x128xbf16> to vector<128x128xbf16>
    %cst_336 = arith.constant dense<0.000000e+00> : vector<32x128xf32>
    %330 = tpu.matmul %276, %329, %cst_336 {dimension_numbers = #tpu.dot_dimension_numbers<[1], [0], [0], [1], [0, 0, 1, 1], [], []>} : vector<32x128xbf16>, vector<128x128xbf16>, vector<32x128xf32> -> vector<32x128xf32>
    %c27_i32_337 = arith.constant 27 : i32
    %331 = tpu.dynamic_rotate %330 by %c27_i32_337 dim 0 : vector<32x128xf32>, i32 -> vector<32x128xf32>
    %332 = arith.addf %327, %331 : vector<32x128xf32>
    %c4_338 = arith.constant 4 : index
    %c0_339 = arith.constant 0 : index
    %333 = vector.load %arg4[%c4_338, %c0_339] : memref<6x128xf32, #tpu.memory_space<vmem>>, vector<1x128xf32>
    %334 = vector.shape_cast %333 : vector<1x128xf32> to vector<128xf32>
    %335 = vector.shape_cast %334 : vector<128xf32> to vector<1x128xf32>
    %336 = vector.broadcast %335 : vector<1x128xf32> to vector<32x128xf32>
    %337 = arith.addf %332, %336 : vector<32x128xf32>
    %cst_340 = arith.constant 0.000000e+00 : f32
    %338 = vector.broadcast %cst_340 : f32 to vector<32x128xf32>
    %339 = arith.maximumf %337, %338 : vector<32x128xf32>
    %cst_341 = arith.constant 0.000000e+00 : f32
    %340 = vector.broadcast %cst_341 : f32 to vector<32x128xf32>
    %341 = arith.select %8, %339, %340 : vector<32x128xi1>, vector<32x128xf32>
    %342 = arith.truncf %341 : vector<32x128xf32> to vector<32x128xbf16>
    %cst_342 = arith.constant 0.000000e+00 : f32
    %343 = vector.broadcast %cst_342 : f32 to vector<32x128xf32>
    %c5_343 = arith.constant 5 : index
    %c0_344 = arith.constant 0 : index
    %c0_345 = arith.constant 0 : index
    %c0_346 = arith.constant 0 : index
    %344 = vector.load %arg3[%c5_343, %c0_344, %c0_345, %c0_346] : memref<6x11x128x128xbf16, #tpu.memory_space<vmem>>, vector<1x1x128x128xbf16>
    %345 = vector.shape_cast %344 : vector<1x1x128x128xbf16> to vector<128x128xbf16>
    %cst_347 = arith.constant dense<0.000000e+00> : vector<32x128xf32>
    %346 = tpu.matmul %342, %345, %cst_347 {dimension_numbers = #tpu.dot_dimension_numbers<[1], [0], [0], [1], [0, 0, 1, 1], [], []>} : vector<32x128xbf16>, vector<128x128xbf16>, vector<32x128xf32> -> vector<32x128xf32>
    %c5_i32_348 = arith.constant 5 : i32
    %347 = tpu.dynamic_rotate %346 by %c5_i32_348 dim 0 : vector<32x128xf32>, i32 -> vector<32x128xf32>
    %348 = arith.addf %343, %347 : vector<32x128xf32>
    %c5_349 = arith.constant 5 : index
    %c1_350 = arith.constant 1 : index
    %c0_351 = arith.constant 0 : index
    %c0_352 = arith.constant 0 : index
    %349 = vector.load %arg3[%c5_349, %c1_350, %c0_351, %c0_352] : memref<6x11x128x128xbf16, #tpu.memory_space<vmem>>, vector<1x1x128x128xbf16>
    %350 = vector.shape_cast %349 : vector<1x1x128x128xbf16> to vector<128x128xbf16>
    %cst_353 = arith.constant dense<0.000000e+00> : vector<32x128xf32>
    %351 = tpu.matmul %342, %350, %cst_353 {dimension_numbers = #tpu.dot_dimension_numbers<[1], [0], [0], [1], [0, 0, 1, 1], [], []>} : vector<32x128xbf16>, vector<128x128xbf16>, vector<32x128xf32> -> vector<32x128xf32>
    %c4_i32_354 = arith.constant 4 : i32
    %352 = tpu.dynamic_rotate %351 by %c4_i32_354 dim 0 : vector<32x128xf32>, i32 -> vector<32x128xf32>
    %353 = arith.addf %348, %352 : vector<32x128xf32>
    %c5_355 = arith.constant 5 : index
    %c2_356 = arith.constant 2 : index
    %c0_357 = arith.constant 0 : index
    %c0_358 = arith.constant 0 : index
    %354 = vector.load %arg3[%c5_355, %c2_356, %c0_357, %c0_358] : memref<6x11x128x128xbf16, #tpu.memory_space<vmem>>, vector<1x1x128x128xbf16>
    %355 = vector.shape_cast %354 : vector<1x1x128x128xbf16> to vector<128x128xbf16>
    %cst_359 = arith.constant dense<0.000000e+00> : vector<32x128xf32>
    %356 = tpu.matmul %342, %355, %cst_359 {dimension_numbers = #tpu.dot_dimension_numbers<[1], [0], [0], [1], [0, 0, 1, 1], [], []>} : vector<32x128xbf16>, vector<128x128xbf16>, vector<32x128xf32> -> vector<32x128xf32>
    %c3_i32_360 = arith.constant 3 : i32
    %357 = tpu.dynamic_rotate %356 by %c3_i32_360 dim 0 : vector<32x128xf32>, i32 -> vector<32x128xf32>
    %358 = arith.addf %353, %357 : vector<32x128xf32>
    %c5_361 = arith.constant 5 : index
    %c3_362 = arith.constant 3 : index
    %c0_363 = arith.constant 0 : index
    %c0_364 = arith.constant 0 : index
    %359 = vector.load %arg3[%c5_361, %c3_362, %c0_363, %c0_364] : memref<6x11x128x128xbf16, #tpu.memory_space<vmem>>, vector<1x1x128x128xbf16>
    %360 = vector.shape_cast %359 : vector<1x1x128x128xbf16> to vector<128x128xbf16>
    %cst_365 = arith.constant dense<0.000000e+00> : vector<32x128xf32>
    %361 = tpu.matmul %342, %360, %cst_365 {dimension_numbers = #tpu.dot_dimension_numbers<[1], [0], [0], [1], [0, 0, 1, 1], [], []>} : vector<32x128xbf16>, vector<128x128xbf16>, vector<32x128xf32> -> vector<32x128xf32>
    %c2_i32_366 = arith.constant 2 : i32
    %362 = tpu.dynamic_rotate %361 by %c2_i32_366 dim 0 : vector<32x128xf32>, i32 -> vector<32x128xf32>
    %363 = arith.addf %358, %362 : vector<32x128xf32>
    %c5_367 = arith.constant 5 : index
    %c4_368 = arith.constant 4 : index
    %c0_369 = arith.constant 0 : index
    %c0_370 = arith.constant 0 : index
    %364 = vector.load %arg3[%c5_367, %c4_368, %c0_369, %c0_370] : memref<6x11x128x128xbf16, #tpu.memory_space<vmem>>, vector<1x1x128x128xbf16>
    %365 = vector.shape_cast %364 : vector<1x1x128x128xbf16> to vector<128x128xbf16>
    %cst_371 = arith.constant dense<0.000000e+00> : vector<32x128xf32>
    %366 = tpu.matmul %342, %365, %cst_371 {dimension_numbers = #tpu.dot_dimension_numbers<[1], [0], [0], [1], [0, 0, 1, 1], [], []>} : vector<32x128xbf16>, vector<128x128xbf16>, vector<32x128xf32> -> vector<32x128xf32>
    %c1_i32_372 = arith.constant 1 : i32
    %367 = tpu.dynamic_rotate %366 by %c1_i32_372 dim 0 : vector<32x128xf32>, i32 -> vector<32x128xf32>
    %368 = arith.addf %363, %367 : vector<32x128xf32>
    %c5_373 = arith.constant 5 : index
    %c5_374 = arith.constant 5 : index
    %c0_375 = arith.constant 0 : index
    %c0_376 = arith.constant 0 : index
    %369 = vector.load %arg3[%c5_373, %c5_374, %c0_375, %c0_376] : memref<6x11x128x128xbf16, #tpu.memory_space<vmem>>, vector<1x1x128x128xbf16>
    %370 = vector.shape_cast %369 : vector<1x1x128x128xbf16> to vector<128x128xbf16>
    %cst_377 = arith.constant dense<0.000000e+00> : vector<32x128xf32>
    %371 = tpu.matmul %342, %370, %cst_377 {dimension_numbers = #tpu.dot_dimension_numbers<[1], [0], [0], [1], [0, 0, 1, 1], [], []>} : vector<32x128xbf16>, vector<128x128xbf16>, vector<32x128xf32> -> vector<32x128xf32>
    %c0_i32_378 = arith.constant 0 : i32
    %372 = tpu.dynamic_rotate %371 by %c0_i32_378 dim 0 : vector<32x128xf32>, i32 -> vector<32x128xf32>
    %373 = arith.addf %368, %372 : vector<32x128xf32>
    %c5_379 = arith.constant 5 : index
    %c6_380 = arith.constant 6 : index
    %c0_381 = arith.constant 0 : index
    %c0_382 = arith.constant 0 : index
    %374 = vector.load %arg3[%c5_379, %c6_380, %c0_381, %c0_382] : memref<6x11x128x128xbf16, #tpu.memory_space<vmem>>, vector<1x1x128x128xbf16>
    %375 = vector.shape_cast %374 : vector<1x1x128x128xbf16> to vector<128x128xbf16>
    %cst_383 = arith.constant dense<0.000000e+00> : vector<32x128xf32>
    %376 = tpu.matmul %342, %375, %cst_383 {dimension_numbers = #tpu.dot_dimension_numbers<[1], [0], [0], [1], [0, 0, 1, 1], [], []>} : vector<32x128xbf16>, vector<128x128xbf16>, vector<32x128xf32> -> vector<32x128xf32>
    %c31_i32_384 = arith.constant 31 : i32
    %377 = tpu.dynamic_rotate %376 by %c31_i32_384 dim 0 : vector<32x128xf32>, i32 -> vector<32x128xf32>
    %378 = arith.addf %373, %377 : vector<32x128xf32>
    %c5_385 = arith.constant 5 : index
    %c7_386 = arith.constant 7 : index
    %c0_387 = arith.constant 0 : index
    %c0_388 = arith.constant 0 : index
    %379 = vector.load %arg3[%c5_385, %c7_386, %c0_387, %c0_388] : memref<6x11x128x128xbf16, #tpu.memory_space<vmem>>, vector<1x1x128x128xbf16>
    %380 = vector.shape_cast %379 : vector<1x1x128x128xbf16> to vector<128x128xbf16>
    %cst_389 = arith.constant dense<0.000000e+00> : vector<32x128xf32>
    %381 = tpu.matmul %342, %380, %cst_389 {dimension_numbers = #tpu.dot_dimension_numbers<[1], [0], [0], [1], [0, 0, 1, 1], [], []>} : vector<32x128xbf16>, vector<128x128xbf16>, vector<32x128xf32> -> vector<32x128xf32>
    %c30_i32_390 = arith.constant 30 : i32
    %382 = tpu.dynamic_rotate %381 by %c30_i32_390 dim 0 : vector<32x128xf32>, i32 -> vector<32x128xf32>
    %383 = arith.addf %378, %382 : vector<32x128xf32>
    %c5_391 = arith.constant 5 : index
    %c8_392 = arith.constant 8 : index
    %c0_393 = arith.constant 0 : index
    %c0_394 = arith.constant 0 : index
    %384 = vector.load %arg3[%c5_391, %c8_392, %c0_393, %c0_394] : memref<6x11x128x128xbf16, #tpu.memory_space<vmem>>, vector<1x1x128x128xbf16>
    %385 = vector.shape_cast %384 : vector<1x1x128x128xbf16> to vector<128x128xbf16>
    %cst_395 = arith.constant dense<0.000000e+00> : vector<32x128xf32>
    %386 = tpu.matmul %342, %385, %cst_395 {dimension_numbers = #tpu.dot_dimension_numbers<[1], [0], [0], [1], [0, 0, 1, 1], [], []>} : vector<32x128xbf16>, vector<128x128xbf16>, vector<32x128xf32> -> vector<32x128xf32>
    %c29_i32_396 = arith.constant 29 : i32
    %387 = tpu.dynamic_rotate %386 by %c29_i32_396 dim 0 : vector<32x128xf32>, i32 -> vector<32x128xf32>
    %388 = arith.addf %383, %387 : vector<32x128xf32>
    %c5_397 = arith.constant 5 : index
    %c9_398 = arith.constant 9 : index
    %c0_399 = arith.constant 0 : index
    %c0_400 = arith.constant 0 : index
    %389 = vector.load %arg3[%c5_397, %c9_398, %c0_399, %c0_400] : memref<6x11x128x128xbf16, #tpu.memory_space<vmem>>, vector<1x1x128x128xbf16>
    %390 = vector.shape_cast %389 : vector<1x1x128x128xbf16> to vector<128x128xbf16>
    %cst_401 = arith.constant dense<0.000000e+00> : vector<32x128xf32>
    %391 = tpu.matmul %342, %390, %cst_401 {dimension_numbers = #tpu.dot_dimension_numbers<[1], [0], [0], [1], [0, 0, 1, 1], [], []>} : vector<32x128xbf16>, vector<128x128xbf16>, vector<32x128xf32> -> vector<32x128xf32>
    %c28_i32_402 = arith.constant 28 : i32
    %392 = tpu.dynamic_rotate %391 by %c28_i32_402 dim 0 : vector<32x128xf32>, i32 -> vector<32x128xf32>
    %393 = arith.addf %388, %392 : vector<32x128xf32>
    %c5_403 = arith.constant 5 : index
    %c10_404 = arith.constant 10 : index
    %c0_405 = arith.constant 0 : index
    %c0_406 = arith.constant 0 : index
    %394 = vector.load %arg3[%c5_403, %c10_404, %c0_405, %c0_406] : memref<6x11x128x128xbf16, #tpu.memory_space<vmem>>, vector<1x1x128x128xbf16>
    %395 = vector.shape_cast %394 : vector<1x1x128x128xbf16> to vector<128x128xbf16>
    %cst_407 = arith.constant dense<0.000000e+00> : vector<32x128xf32>
    %396 = tpu.matmul %342, %395, %cst_407 {dimension_numbers = #tpu.dot_dimension_numbers<[1], [0], [0], [1], [0, 0, 1, 1], [], []>} : vector<32x128xbf16>, vector<128x128xbf16>, vector<32x128xf32> -> vector<32x128xf32>
    %c27_i32_408 = arith.constant 27 : i32
    %397 = tpu.dynamic_rotate %396 by %c27_i32_408 dim 0 : vector<32x128xf32>, i32 -> vector<32x128xf32>
    %398 = arith.addf %393, %397 : vector<32x128xf32>
    %c5_409 = arith.constant 5 : index
    %c0_410 = arith.constant 0 : index
    %399 = vector.load %arg4[%c5_409, %c0_410] : memref<6x128xf32, #tpu.memory_space<vmem>>, vector<1x128xf32>
    %400 = vector.shape_cast %399 : vector<1x128xf32> to vector<128xf32>
    %401 = vector.shape_cast %400 : vector<128xf32> to vector<1x128xf32>
    %402 = vector.broadcast %401 : vector<1x128xf32> to vector<32x128xf32>
    %403 = arith.addf %398, %402 : vector<32x128xf32>
    %cst_411 = arith.constant 0xFF800000 : f32
    %404 = vector.broadcast %cst_411 : f32 to vector<32x128xf32>
    %405 = arith.select %12, %403, %404 : vector<32x128xi1>, vector<32x128xf32>
    %406 = vector.extract_strided_slice %405 {offsets = [0, 0], sizes = [16, 128], strides = [1, 1]} : vector<32x128xf32> to vector<16x128xf32>
    %c0_412 = arith.constant 0 : index
    %c0_413 = arith.constant 0 : index
    %c0_414 = arith.constant 0 : index
    %407 = vector.load %arg5[%c0_412, %c0_413, %c0_414] : memref<1x16x128xf32, #tpu.memory_space<vmem>>, vector<1x16x128xf32>
    %408 = vector.shape_cast %407 : vector<1x16x128xf32> to vector<16x128xf32>
    %409 = vector.shape_cast %406 : vector<16x128xf32> to vector<1x16x128xf32>
    tpu.vector_store %arg5[%c0_412, %c0_413, %c0_414], %409 {strides = array<i32>} : memref<1x16x128xf32, #tpu.memory_space<vmem>>, vector<1x16x128xf32>,
    %cst_415 = arith.constant 2.000000e+00 : f32
    %410 = vector.broadcast %cst_415 : f32 to vector<32x128xf32>
    %411 = arith.mulf %410, %405 : vector<32x128xf32>
    %cst_416 = arith.constant dense<0xFF800000> : vector<128xf32>
    %412 = vector.multi_reduction <maximumf>, %411, %cst_416 [0] : vector<32x128xf32> to vector<128xf32>
    %413 = vector.shape_cast %412 : vector<128xf32> to vector<1x128xf32>
    %414 = vector.broadcast %413 : vector<1x128xf32> to vector<32x128xf32>
    %415 = arith.subf %411, %414 : vector<32x128xf32>
    %416 = math.exp %415 : vector<32x128xf32>
    %cst_417 = arith.constant dense<0.000000e+00> : vector<128xf32>
    %417 = vector.multi_reduction <add>, %416, %cst_417 [0] : vector<32x128xf32> to vector<128xf32>
    %418 = vector.shape_cast %417 : vector<128xf32> to vector<1x128xf32>
    %419 = math.log %418 : vector<1x128xf32>
    %420 = arith.addf %419, %413 : vector<1x128xf32>
    %cst_418 = arith.constant 5.000000e-01 : f32
    %421 = vector.broadcast %cst_418 : f32 to vector<1x128xf32>
    %422 = arith.mulf %420, %421 : vector<1x128xf32>
    %c0_419 = arith.constant 0 : index
    %c0_420 = arith.constant 0 : index
    %c0_421 = arith.constant 0 : index
    %423 = vector.load %arg6[%c0_419, %c0_420, %c0_421] : memref<1x1x128xf32, #tpu.memory_space<vmem>>, vector<1x1x128xf32>
    %424 = vector.shape_cast %423 : vector<1x1x128xf32> to vector<1x128xf32>
    %425 = vector.shape_cast %422 : vector<1x128xf32> to vector<1x1x128xf32>
    tpu.vector_store %arg6[%c0_419, %c0_420, %c0_421], %425 {strides = array<i32>} : memref<1x1x128xf32, #tpu.memory_space<vmem>>, vector<1x1x128xf32>,
    return
  }
  func.func @transform_0(%arg0: i32, %arg1: memref<2xi32, #tpu.memory_space<smem>>) -> (i32, i32, i32) {
    %c0_i32 = arith.constant 0 : i32
    %c0_i32_0 = arith.constant 0 : i32
    %c0_i32_1 = arith.constant 0 : i32
    return %arg0, %c0_i32, %c0_i32_0 : i32, i32, i32
  }
  func.func @transform_1(%arg0: i32, %arg1: memref<2xi32, #tpu.memory_space<smem>>) -> (i32, i32, i32, i32) {
    %c0_i32 = arith.constant 0 : i32
    %c0_i32_0 = arith.constant 0 : i32
    %c0_i32_1 = arith.constant 0 : i32
    %c0_i32_2 = arith.constant 0 : i32
    %c0_i32_3 = arith.constant 0 : i32
    return %c0_i32, %c0_i32_0, %c0_i32_1, %c0_i32_2 : i32, i32, i32, i32
  }
  func.func @transform_2(%arg0: i32, %arg1: memref<2xi32, #tpu.memory_space<smem>>) -> (i32, i32) {
    %c0_i32 = arith.constant 0 : i32
    %c0_i32_0 = arith.constant 0 : i32
    %c0_i32_1 = arith.constant 0 : i32
    return %c0_i32, %c0_i32_0 : i32, i32
  }
  func.func @transform_3(%arg0: i32, %arg1: memref<2xi32, #tpu.memory_space<smem>>) -> (i32, i32, i32) {
    %c0_i32 = arith.constant 0 : i32
    %c0_i32_0 = arith.constant 0 : i32
    %c0_i32_1 = arith.constant 0 : i32
    return %arg0, %c0_i32, %c0_i32_0 : i32, i32, i32
  }
  func.func @transform_4(%arg0: i32, %arg1: memref<2xi32, #tpu.memory_space<smem>>) -> (i32, i32, i32) {
    %c0_i32 = arith.constant 0 : i32
    %c0_i32_0 = arith.constant 0 : i32
    %c0_i32_1 = arith.constant 0 : i32
    return %arg0, %c0_i32, %c0_i32_0 : i32, i32, i32
  }
}

</mosaic_0001>

<bundles_post_ra>
// kernel: tpu_custom_call.1
= control target key start
LH: loop header
LB: loop body
LE: loop exit
PB: predicated region body
PF: predicated region fallthrough
CT: control target
= control target key end

     0   :  { %s9875_s21 = smov [#allocation4]   ;;  %s10869_s0 = inlined_call_operand.hbm [shape: s32[2], index: 0, kind: input, shape index: {}]   ;;  %s10870_s1 = inlined_call_operand.hbm [shape: bf16[2,16,128], index: 1, kind: input, shape index: {}]   ;;  %s10871_s2 = inlined_call_operand.hbm [shape: bf16[6,11,128,128], index: 2, kind: input, shape index: {}]   ;;  %s10872_s3 = inlined_call_operand.hbm [shape: f32[6,128], index: 3, kind: input, shape index: {}]   ;;  %s10873_s4 = inlined_call_operand.hbm [shape: f32[2,16,128], index: 4, kind: output, shape index: {0}]   ;;  %s10874_s5 = inlined_call_operand.hbm [shape: f32[2,1,128], index: 5, kind: output, shape index: {1}]  }
   0x1   :  { %s12_s20 = sshll.u32 %s10869_s0, 4  ;;  %s13_s20 = int_to_ptr.hbm [resolvable:$true] %s12_s20 }
   0x2   :  { %15 = dma.hbm_to_smem %s13_s20, 16, %s9875_s21, [#allocation3] }
   0x3   :  { %9841 = dma.done.wait [#allocation3], 16 }
   0x4   :  { %9842 = vsyncadd [#allocation3], 4294967280 }
   0x5   :  { %18 = sfence }
   0x6   :  { %19 = vsyncpa [#allocation6], 0 }
   0x7   :  { %21 = vsyncpa [#allocation6 + $0x1], 0 }
   0x8   :  { %22 = vsyncpa [#allocation9], 0 }
   0x9   :  { %23 = vsyncpa [#allocation7], 0 }
   0xa   :  { %25 = vsyncpa [#allocation7 + $0x1], 0 }
   0xb   :  { %26 = vsyncpa [#allocation13], 0 }
   0xc   :  { %28 = vsyncpa [#allocation13 + $0x1], 0  ;;  %s9917_s22 = smov 0   ;;  %s9919_s23 = smov 0  }
   0xd   :  { %s9921_s24 = smov 0   ;;  %s9923_s0 = smov 0  }
   0xe LB: > { %s9938_s25 = sadd.s32 4294967295, %s9873_s0   ;;  %s6886_s26 = sadd.s32 4294967294, %s9873_s0   ;;  %s9873_s0 = sphi %s9923_s0, %s10884_s0   ;;  %s9869_s24 = sphi %s9921_s24, %s10883_s24   ;;  %s9865_s23 = sphi %s9919_s23, %s10882_s23   ;;  %s9861_s22 = sphi %s9917_s22, %s10881_s22  }
   0xf   : > { %p54_p0 = scmp.ne.s32.totalorder %s9865_s23, %s9861_s22  ;;  %p55_p1 = scmp.eq.s32.totalorder %s9938_s25, 0 }
  0x10   : > { %p120_p2 = scmp.eq.s32.totalorder %s9938_s25, 1  ;;  %p126_p3 = scmp.eq.s32.totalorder %s6886_s26, 1 }
  0x11   : > { %p9947_p4 = por %p55_p1, %p54_p0  ;;  %p6887_p5 = scmp.ge.s32.totalorder %s9873_s0, 1 }
  0x12   : > { %p9952_p6 = por %p126_p3, %p54_p0  ;;  %p159_p7 = scmp.lt.s32.totalorder %s9873_s0, 3 }
  0x13   : > { %s170_s6 = sshll.u32 %s10871_s2, 4  ;;  %s9876_s8 = smov [#allocation8]   ;;  %s171_s6 = int_to_ptr.hbm [resolvable:$true] %s170_s6 }
  0x14   : > { %p9960_p8 = pnand %p6887_p5, %p159_p7  ;;  %s172_s9 = sshll.u32 %s9876_s8, 4  ;;  %s173_s9 = int_to_ptr.vmem [resolvable:$true] %s172_s9 }
  0x15   : > { %s185_s12 = sshll.u32 %s10872_s3, 4  ;;  %s9877_s13 = smov 64   ;;  %s186_s12 = int_to_ptr.hbm [resolvable:$true] %s185_s12 }
  0x16   : > { %p9586_p9 = pneg %p9960_p8  ;;  %s9878_s14 = smov 4  }
  0x17   : > { %s9879_s15 = smov [#allocation10]   ;;  %s9976_s17 = sadd.s32 1, %s9873_s0  }
  0x18   : > { %p9587_p10 = pnand %p9586_p9, %p55_p1  ;;  %s187_s16 = sshll.u32 %s9879_s15, 4  ;;  %s188_s16 = int_to_ptr.vmem [resolvable:$true] %s187_s16 }
  0x19   : > { %s41_s18 = sadd.s32 1, %s9869_s24  ;;  %s38_s19 = ssub.s32 %s9873_s0, %s9976_s17 }
  0x1a   : > { %9589 = dma.hbm_to_vmem [thread:$0]  (!%p9587_p10), %s171_s6, 67584, %s173_s9, [#allocation9], %s9877_s13, %s9877_s13, %s9878_s14  }
  0x1b   : > { %9592 = dma.hbm_to_vmem [thread:$0]  (!%p9587_p10), %s186_s12, 128, %s188_s16, [#allocation9]  }
  0x1c   : > { %p48_p12 = scmp.ne.s32.totalorder %s9869_s24, %s9865_s23  ;;  %p39_p13 = scmp.eq.s32.totalorder %s38_s19, 0 }
  0x1d   : > { %p49_p0 = scmp.eq.s32.totalorder %s9873_s0, 0  ;;  %p9606_p5 = scmp.lt.s32.totalorder %s9873_s0, 2 }
  0x1e   : > { %p9986_p3 = por %p120_p2, %p48_p12  ;;  %s198_s26 = sand.u32 1, %s9869_s24  }
  0x1f   : > { %s9992_s21 = scalar_select %p39_p13, %s9869_s24, %s41_s18  }
  0x20   : > { %p50_p7 = por %p49_p0, %p48_p12  ;;  %s6891_s29 = sshll.u32 %s198_s26, 3 }
  0x21   : > { %s9024_s30 = sshll.u32 %s9873_s0, 3  ;;  %s202_s10 = scalar_lea.vmem [#allocation5], %s6891_s29 }
  0x22   : > { %s207_s9 = scalar_lea.hbm %s10870_s1, %s9024_s30  ;;  %s210_s11 = sshll.u32 %s202_s10, 4  ;;  %s211_s11 = int_to_ptr.vmem [resolvable:$true] %s210_s11 }
  0x23   : > { %s208_s12 = sshll.u32 %s207_s9, 4  ;;  %p9999_p2 = pnand %p9606_p5, %p50_p7  ;;  %s209_s12 = int_to_ptr.hbm [resolvable:$true] %s208_s12 }
  0x24   : > { %s199_s16 = scalar_lea.sflag [#allocation6], %s198_s26  ;;  %s9739_s18 = sshra.s32 %s209_s12, 4  ;;  %s9740_s18 = int_to_ptr.hbm [resolvable:$true] %s9739_s18 }
  0x25   : > { %s9741_s19 = scalar_lea.hbm %s9740_s18, 8  ;;  %p9743_p10 = pneg %p9999_p2 }
  0x26   : > { %p9742_p9 = scmp.ne.s32.totalorder %s9740_s18, %s9741_s19  ;;  %s9746_s6 = scalar_lea.hbm %s10870_s1, 16 }
  0x27   : > { %p9747_p0 = scmp.lt.s32.totalorder %s9740_s18, %s10870_s1  ;;  %p9748_p5 = scmp.lt.s32.totalorder %s9746_s6, %s9741_s19 }
  0x28   : > { %p9744_p12 = pnand %p9743_p10, %p9742_p9 }
  0x29   : > { %p9749_p7 = por %p9748_p5, %p9747_p0 }
  0x2a   : > { %p9745_p13 = pneg %p9744_p12 }
  0x2c   : > { %p9750_p11 = pnand %p9749_p7, %p9745_p13 }
  0x2e   : > { %9753 = shalt.err (!%p9750_p11)
}
  0x2f   : > { %9596 = dma.hbm_to_vmem [thread:$0]  (!%p9999_p2), %s209_s12, 128, %s211_s11, %s199_s16, %s9877_s13, %s9877_s13, %s9878_s14  }
  0x30   : > { %222 = sbr.rel (%p9960_p8) target bundleno = 1524 (0x5f4), region = 32  ;;  %s10019_s26 = sand.u32 (!%p9960_p8), 1, %s9865_s23  }
  0x31   : > { %s6895_s10 = sshll.u32 (!%p9960_p8), %s10019_s26, 3  ;;  %s225_s18 = scalar_lea.sflag (!%p9960_p8), [#allocation6], %s10019_s26 }
  0x32   : > { %s10023_s19 = scalar_lea.vmem (!%p9960_p8), [#allocation5], %s6895_s10 }
  0x35   : > { %9844 = dma.done.wait (%p9947_p4), %s225_s18, 128  }
  0x36   : > { %9846 = vsyncadd (%p9947_p4), %s225_s18, 4294967168 }
  0x37   : > { %9848 = dma.done.wait (%p55_p1), [#allocation9], 67712  }
  0x38   : > { %9850 = vsyncadd (%p55_p1), [#allocation9], 4294899584  ;;  %v9880_v0 = vmov 0   ;;  %v9034_v1 = vld [vmem:[#allocation8 + $0x38] sm:$0xff]  ;;  %v9033_v5 = vld [vmem:[#allocation8 + $0x30] sm:$0xff]  ;;  %s290_s27 = sld [smem:[#allocation4 + %s9938_s25]] }
  0x39   : > { %269 = vst [vmem:[#allocation2] sm:$0xf] %v9880_v0  ;;  %v9042_v2 = vld [vmem:[#allocation8 + $0x78] sm:$0xff]  ;;  %372 = vmatpush.bf16.msra.mxu0 %v9034_v1  ;;  %v9041_v6 = vld [vmem:[#allocation8 + $0x70] sm:$0xff]  ;;  %v9032_v9 = vld [vmem:[#allocation8 + $0x28] sm:$0xff]  ;;  %s6898_s7 = sshll.u32 %s10019_s26, 4 }
  0x3a   : > { %270 = vst [vmem:[#allocation2 + $0x4] sm:$0xf] %v9880_v0  ;;  %v9050_v3 = vld [vmem:[#allocation8 + $0xb8] sm:$0xff]  ;;  %469 = vmatpush.bf16.msra.mxu1 %v9042_v2  ;;  %v9049_v7 = vld [vmem:[#allocation8 + $0xb0] sm:$0xff]  ;;  %v9040_v10 = vld [vmem:[#allocation8 + $0x68] sm:$0xff]  ;;  %s10743_s13 = scalar_lea.vmem [#allocation11], %s6898_s7 }
  0x3b   : > { %271 = vst [vmem:[#allocation2 + $0x8] sm:$0xf] %v9880_v0  ;;  %v9058_v4 = vld [vmem:[#allocation8 + $0xf8] sm:$0xff]  ;;  %566 = vmatpush.bf16.msra.mxu2 %v9050_v3  ;;  %v9057_v8 = vld [vmem:[#allocation8 + $0xf0] sm:$0xff]  ;;  %v9048_v11 = vld [vmem:[#allocation8 + $0xa8] sm:$0xff]  ;;  %s9555_s14 = sshll.u32 %s9938_s25, 4 }
  0x3c   : > { %272 = vst [vmem:[#allocation2 + $0xc] sm:$0xf] %v9880_v0  ;;  %663 = vmatpush.bf16.msra.mxu3 %v9058_v4  ;;  %v9056_v12 = vld [vmem:[#allocation8 + $0xe8] sm:$0xff]  ;;  %v9031_v13 = vld [vmem:[#allocation8 + $0x20] sm:$0xff]  ;;  %v273_v15 = vld [vmem:[%s10023_s19] sm:$0xff]   ;;  %s6749_s15 = scalar_lea.hbm %s10873_s4, %s9555_s14  ;;  %s6750_s16 = sshll.u32 %s10743_s13, 4  ;;  %s10797_s16 = int_to_ptr.vmem [resolvable:$true] %s6750_s16 }
  0x3d   : > { %373 = vmatpush.bf16.msra.mxu0 %v9033_v5  ;;  %v9039_v14 = vld [vmem:[#allocation8 + $0x60] sm:$0xff]  ;;  %275 = vst [vmem:[#allocation2] sm:$0xff] %v273_v15   ;;  %v9030_v18 = vld [vmem:[#allocation8 + $0x18] sm:$0xff]  ;;  %v9029_v22 = vld [vmem:[#allocation8 + $0x10] sm:$0xff]  ;;  %s6752_s30 = sshll.u32 %s6749_s15, 4  ;;  %s6734_s29 = scalar_lea.sflag [#allocation7], %s10019_s26  ;;  %s10799_s30 = int_to_ptr.hbm [resolvable:$true] %s6752_s30 }
  0x3e   : > { %470 = vmatpush.bf16.msra.mxu1 %v9041_v6  ;;  %v9047_v16 = vld [vmem:[#allocation8 + $0xa0] sm:$0xff]  ;;  %v9038_v19 = vld [vmem:[#allocation8 + $0x58] sm:$0xff]  ;;  %v9037_v23 = vld [vmem:[#allocation8 + $0x50] sm:$0xff]  ;;  %s9783_s6 = sshra.s32 %s10799_s30, 4  ;;  %s9789_s18 = scalar_lea.hbm %s10873_s4, 32  ;;  %s9784_s6 = int_to_ptr.hbm [resolvable:$true] %s9783_s6 }
  0x3f   : > { %567 = vmatpush.bf16.msra.mxu2 %v9049_v7  ;;  %v9055_v17 = vld [vmem:[#allocation8 + $0xe0] sm:$0xff]  ;;  %v9046_v20 = vld [vmem:[#allocation8 + $0x98] sm:$0xff]  ;;  %v9045_v24 = vld [vmem:[#allocation8 + $0x90] sm:$0xff]  ;;  %s9785_s8 = scalar_lea.hbm %s9784_s6, 16  ;;  %p9790_p11 = scmp.lt.s32.totalorder %s9784_s6, %s10873_s4 }
  0x40   : > { %664 = vmatpush.bf16.msra.mxu3 %v9057_v8  ;;  %v9054_v21 = vld [vmem:[#allocation8 + $0xd8] sm:$0xff]  ;;  %v9053_v25 = vld [vmem:[#allocation8 + $0xd0] sm:$0xff]  ;;  %v9028_v26 = vld [vmem:[#allocation8 + $0x8] sm:$0xff]  ;;  %p9786_p1 = scmp.ne.s32.totalorder %s9784_s6, %s9785_s8  ;;  %p9791_p2 = scmp.lt.s32.totalorder %s9789_s18, %s9785_s8 }
  0x41   : > { %374 = vmatpush.bf16.msra.mxu0 %v9032_v9  ;;  %v9036_v27 = vld [vmem:[#allocation8 + $0x48] sm:$0xff]  ;;  %v9027_v30 = vld [vmem:[#allocation8] sm:$0xff]  ;;  %v9082_v34 = vld [vmem:[#allocation8 + $0x1b8] sm:$0xff] }
  0x42   : > { %471 = vmatpush.bf16.msra.mxu1 %v9040_v10  ;;  %v9044_v28 = vld [vmem:[#allocation8 + $0x88] sm:$0xff]  ;;  %v9035_v31 = vld [vmem:[#allocation8 + $0x40] sm:$0xff]  ;;  %v9066_v35 = vld [vmem:[#allocation8 + $0x138] sm:$0xff]  ;;  %p9787_p4 = pnand %p9786_p1, %p9986_p3  ;;  %p9792_p9 = por %p9791_p2, %p9790_p11 }
  0x43   : > { %568 = vmatpush.bf16.msra.mxu2 %v9048_v11  ;;  %v9052_v29 = vld [vmem:[#allocation8 + $0xc8] sm:$0xff]  ;;  %v9043_v32 = vld [vmem:[#allocation8 + $0x80] sm:$0xff]  ;;  %v9074_v37 = vld [vmem:[#allocation8 + $0x178] sm:$0xff] }
  0x44   : > { %665 = vmatpush.bf16.msra.mxu3 %v9056_v12  ;;  %v9051_v33 = vld [vmem:[#allocation8 + $0xc0] sm:$0xff]  ;;  %v9090_v38 = vld [vmem:[#allocation8 + $0x1f8] sm:$0xff]  ;;  %v9081_v39 = vld [vmem:[#allocation8 + $0x1b0] sm:$0xff]  ;;  %p9788_p8 = pneg %p9787_p4 }
  0x45   : > { %375 = vmatpush.bf16.msra.mxu0 %v9031_v13  ;;  %v10034_v36 = vld [vmem:[#allocation2] sm:$0xff]  ;;  %v9065_v40 = vld [vmem:[#allocation8 + $0x130] sm:$0xff]  ;;  %v9080_v43 = vld [vmem:[#allocation8 + $0x1a8] sm:$0xff] }
  0x46   : > { %472 = vmatpush.bf16.msra.mxu1 %v9039_v14  ;;  %v9073_v41 = vld [vmem:[#allocation8 + $0x170] sm:$0xff]  ;;  %v9064_v44 = vld [vmem:[#allocation8 + $0x128] sm:$0xff]  ;;  %v9079_v47 = vld [vmem:[#allocation8 + $0x1a0] sm:$0xff]  ;;  %p9793_p10 = pnand %p9792_p9, %p9788_p8 }
  0x47   : > { %569 = vmatpush.bf16.msra.mxu2 %v9047_v16  ;;  %v9089_v42 = vld [vmem:[#allocation8 + $0x1f0] sm:$0xff]  ;;  %v9072_v45 = vld [vmem:[#allocation8 + $0x168] sm:$0xff]  ;;  %v9063_v48 = vld [vmem:[#allocation8 + $0x120] sm:$0xff] }
  0x48   : > { %666 = vmatpush.bf16.msra.mxu3 %v9055_v17  ;;  %v9088_v46 = vld [vmem:[#allocation8 + $0x1e8] sm:$0xff]  ;;  %v9071_v49 = vld [vmem:[#allocation8 + $0x160] sm:$0xff]  ;;  %v9078_v51 = vld [vmem:[#allocation8 + $0x198] sm:$0xff] }
  0x49   : > { %376 = vmatpush.bf16.msra.mxu0 %v9030_v18  ;;  %v9087_v50 = vld [vmem:[#allocation8 + $0x1e0] sm:$0xff]  ;;  %v10040_v52 = vld [vmem:[#allocation2 + $0x8] sm:$0xff]  ;;  %v9062_v53 = vld [vmem:[#allocation8 + $0x118] sm:$0xff] }
  0x4a   : > { %473 = vmatpush.bf16.msra.mxu1 %v9038_v19  ;;  %v9070_v54 = vld [vmem:[#allocation8 + $0x158] sm:$0xff]  ;;  %v9077_v56 = vld [vmem:[#allocation8 + $0x190] sm:$0xff]  ;;  %v9076_v60 = vld [vmem:[#allocation8 + $0x188] sm:$0xff] }
  0x4b   : > { %570 = vmatpush.bf16.msra.mxu2 %v9046_v20  ;;  %v9086_v55 = vld [vmem:[#allocation8 + $0x1d8] sm:$0xff]  ;;  %v9061_v57 = vld [vmem:[#allocation8 + $0x110] sm:$0xff]  ;;  %v9060_v61 = vld [vmem:[#allocation8 + $0x108] sm:$0xff] }
  0x4c   : > { %667 = vmatpush.bf16.msra.mxu3 %v9054_v21  ;;  %v9069_v58 = vld [vmem:[#allocation8 + $0x150] sm:$0xff]  ;;  %v9068_v62 = vld [vmem:[#allocation8 + $0x148] sm:$0xff]  ;;  %v9075_v0 = vld [vmem:[#allocation8 + $0x180] sm:$0xff] }
  0x4d   : > { %377 = vmatpush.bf16.msra.mxu0 %v9029_v22  ;;  %v9085_v59 = vld [vmem:[#allocation8 + $0x1d0] sm:$0xff]  ;;  %v9084_v63 = vld [vmem:[#allocation8 + $0x1c8] sm:$0xff]  ;;  %v9114_v1 = vld [vmem:[#allocation8 + $0x2b8] sm:$0xff] }
  0x4e   : > { %474 = vmatpush.bf16.msra.mxu1 %v9037_v23  ;;  %v9059_v2 = vld [vmem:[#allocation8 + $0x100] sm:$0xff]  ;;  %v9098_v4 = vld [vmem:[#allocation8 + $0x238] sm:$0xff]  ;;  %v9113_v7 = vld [vmem:[#allocation8 + $0x2b0] sm:$0xff] }
  0x4f   : > { %571 = vmatpush.bf16.msra.mxu2 %v9045_v24  ;;  %v9067_v3 = vld [vmem:[#allocation8 + $0x140] sm:$0xff]  ;;  %v9106_v6 = vld [vmem:[#allocation8 + $0x278] sm:$0xff]  ;;  %v9097_v8 = vld [vmem:[#allocation8 + $0x230] sm:$0xff] }
  0x50   : > { %668 = vmatpush.bf16.msra.mxu3 %v9053_v25  ;;  %v9083_v5 = vld [vmem:[#allocation8 + $0x1c0] sm:$0xff]  ;;  %v9105_v9 = vld [vmem:[#allocation8 + $0x270] sm:$0xff]  ;;  %v9112_v10 = vld [vmem:[#allocation8 + $0x2a8] sm:$0xff] }
  0x51   : > { %378 = vmatpush.bf16.msra.mxu0 %v9028_v26  ;;  %v9096_v11 = vld [vmem:[#allocation8 + $0x228] sm:$0xff]  ;;  %v9111_v13 = vld [vmem:[#allocation8 + $0x2a0] sm:$0xff]  ;;  %v9110_v16 = vld [vmem:[#allocation8 + $0x298] sm:$0xff] }
  0x52   : > { %475 = vmatpush.bf16.msra.mxu1 %v9036_v27  ;;  %v9104_v12 = vld [vmem:[#allocation8 + $0x268] sm:$0xff]  ;;  %v9095_v14 = vld [vmem:[#allocation8 + $0x220] sm:$0xff]  ;;  %v9094_v17 = vld [vmem:[#allocation8 + $0x218] sm:$0xff] }
  0x53   : > { %572 = vmatpush.bf16.msra.mxu2 %v9044_v28  ;;  %v9103_v15 = vld [vmem:[#allocation8 + $0x260] sm:$0xff]  ;;  %v9102_v18 = vld [vmem:[#allocation8 + $0x258] sm:$0xff]  ;;  %v9109_v19 = vld [vmem:[#allocation8 + $0x290] sm:$0xff] }
  0x54   : > { %669 = vmatpush.bf16.msra.mxu3 %v9052_v29  ;;  %v9093_v20 = vld [vmem:[#allocation8 + $0x210] sm:$0xff]  ;;  %v9108_v22 = vld [vmem:[#allocation8 + $0x288] sm:$0xff]  ;;  %v9107_v25 = vld [vmem:[#allocation8 + $0x280] sm:$0xff] }
  0x55   : > { %379 = vmatpush.bf16.msra.mxu0 %v9027_v30  ;;  %v9101_v21 = vld [vmem:[#allocation8 + $0x250] sm:$0xff]  ;;  %v9092_v23 = vld [vmem:[#allocation8 + $0x208] sm:$0xff]  ;;  %v9091_v26 = vld [vmem:[#allocation8 + $0x200] sm:$0xff]  ;;  %v281_v30 = vlaneseq }
  0x56   : > { %476 = vmatpush.bf16.msra.mxu1 %v9035_v31  ;;  %v9100_v24 = vld [vmem:[#allocation8 + $0x248] sm:$0xff]  ;;  %v9099_v27 = vld [vmem:[#allocation8 + $0x240] sm:$0xff] }
  0x57   : > { %573 = vmatpush.bf16.msra.mxu2 %v9043_v32  ;;  %v10060_v31 = vshrl.u32 %v281_v30, 7  ;;  %v9143_v30 = vld [vmem:[#allocation8 + $0x3a0] sm:$0xff] }
  0x58   : > { %670 = vmatpush.bf16.msra.mxu3 %v9051_v33  ;;  %380 = vmatmul.bf16.vlgmr.msra.gmra.mxu0 %v10034_v36 }
  0x59   : > { %760 = vmatpush.bf16.msrb.mxu0 %v9066_v35  ;;  %477 = vmatmul.bf16.vlgmr.msra.gmra.mxu1 %v10034_v36  ;;  %vm395_vm0 = vcmp.lt.s32.totalorder %v10060_v31, 5  ;;  %vm492_vm1 = vcmp.lt.s32.totalorder %v10060_v31, 4  ;;  %vm589_vm2 = vcmp.lt.s32.totalorder %v10060_v31, 3  ;;  %vm686_vm3 = vcmp.lt.s32.totalorder %v10060_v31, 2 }
  0x5a   : > { %574 = vmatmul.bf16.vlgmr.msra.gmra.mxu2 %v10034_v36  ;;  %857 = vmatpush.bf16.msrb.mxu1 %v9074_v37  ;;  %vm783_vm4 = vcmp.lt.s32.totalorder %v10060_v31, 1  ;;  %vm968_vm5 = vcmp.lt.s32.totalorder %v10060_v31, 7  ;;  %vm1065_vm6 = vcmp.lt.s32.totalorder %v10060_v31, 6 }
  0x5b   : > { %945 = vmatpush.bf16.msrb.mxu2 %v9082_v34  ;;  %671 = vmatmul.bf16.vlgmr.msra.gmra.mxu3 %v10034_v36 }
  0x5c   : > { %1042 = vmatpush.bf16.msrb.mxu3 %v9090_v38 }
  0x5d   : > { %761 = vmatpush.bf16.msrb.mxu0 %v9065_v40 }
  0x5e   : > { %858 = vmatpush.bf16.msrb.mxu1 %v9073_v41 }
  0x5f   : > { %946 = vmatpush.bf16.msrb.mxu2 %v9081_v39 }
  0x60   : > { %1043 = vmatpush.bf16.msrb.mxu3 %v9089_v42 }
  0x61   : > { %762 = vmatpush.bf16.msrb.mxu0 %v9064_v44 }
  0x62   : > { %859 = vmatpush.bf16.msrb.mxu1 %v9072_v45 }
  0x63   : > { %947 = vmatpush.bf16.msrb.mxu2 %v9080_v43 }
  0x64   : > { %1044 = vmatpush.bf16.msrb.mxu3 %v9088_v46 }
  0x65   : > { %763 = vmatpush.bf16.msrb.mxu0 %v9063_v48 }
  0x66   : > { %860 = vmatpush.bf16.msrb.mxu1 %v9071_v49 }
  0x67   : > { %948 = vmatpush.bf16.msrb.mxu2 %v9079_v47 }
  0x68   : > { %1045 = vmatpush.bf16.msrb.mxu3 %v9087_v50  ;;  %385 = vmatmul.bf16.gmra.mxu0 %v10040_v52 }
  0x69   : > { %482 = vmatmul.bf16.gmra.mxu1 %v10040_v52  ;;  %764 = vmatpush.bf16.msrb.mxu0 %v9062_v53 }
  0x6a   : > { %579 = vmatmul.bf16.gmra.mxu2 %v10040_v52  ;;  %861 = vmatpush.bf16.msrb.mxu1 %v9070_v54 }
  0x6b   : > { %949 = vmatpush.bf16.msrb.mxu2 %v9078_v51  ;;  %676 = vmatmul.bf16.gmra.mxu3 %v10040_v52 }
  0x6c   : > { %1046 = vmatpush.bf16.msrb.mxu3 %v9086_v55 }
  0x6d   : > { %765 = vmatpush.bf16.msrb.mxu0 %v9061_v57 }
  0x6e   : > { %862 = vmatpush.bf16.msrb.mxu1 %v9069_v58 }
  0x6f   : > { %950 = vmatpush.bf16.msrb.mxu2 %v9077_v56 }
  0x70   : > { %1047 = vmatpush.bf16.msrb.mxu3 %v9085_v59 }
  0x71   : > { %766 = vmatpush.bf16.msrb.mxu0 %v9060_v61 }
  0x72   : > { %863 = vmatpush.bf16.msrb.mxu1 %v9068_v62 }
  0x73   : > { %951 = vmatpush.bf16.msrb.mxu2 %v9076_v60 }
  0x74   : > { %1048 = vmatpush.bf16.msrb.mxu3 %v9084_v63 }
  0x75   : > { %767 = vmatpush.bf16.msrb.mxu0 %v9059_v2 }
  0x76   : > { %864 = vmatpush.bf16.msrb.mxu1 %v9067_v3 }
  0x77   : > { %952 = vmatpush.bf16.msrb.mxu2 %v9075_v0 }
  0x78   : > { %1049 = vmatpush.bf16.msrb.mxu3 %v9083_v5  ;;  %768 = vmatmul.bf16.vlgmr.msrb.gmra.mxu0 %v10034_v36 }
  0x79   : > { %1139 = vmatpush.bf16.msra.mxu0 %v9098_v4  ;;  %865 = vmatmul.bf16.vlgmr.msrb.gmra.mxu1 %v10034_v36 }
  0x7a   : > { %1235 = vmatpush.bf16.msra.mxu1 %v9106_v6  ;;  %953 = vmatmul.bf16.vlgmr.msrb.gmra.mxu2 %v10034_v36 }
  0x7b   : > { %1331 = vmatpush.bf16.msra.mxu2 %v9114_v1  ;;  %1050 = vmatmul.bf16.vlgmr.msrb.gmra.mxu3 %v10034_v36 }
  0x7d   : > { %1140 = vmatpush.bf16.msra.mxu0 %v9097_v8  ;;  %v9130_v8 = vld [vmem:[#allocation8 + $0x338] sm:$0xff] }
  0x7e   : > { %1236 = vmatpush.bf16.msra.mxu1 %v9105_v9  ;;  %v9138_v9 = vld [vmem:[#allocation8 + $0x378] sm:$0xff] }
  0x7f   : > { %1332 = vmatpush.bf16.msra.mxu2 %v9113_v7  ;;  %v9122_v7 = vld [vmem:[#allocation8 + $0x2f8] sm:$0xff] }
  0x80   : > { %1443 = vmatpush.bf16.msra.mxu3 %v9122_v7  ;;  %v9161_v7 = vld [vmem:[#allocation8 + $0x430] sm:$0xff] }
  0x81   : > { %1141 = vmatpush.bf16.msra.mxu0 %v9096_v11  ;;  %v9146_v11 = vld [vmem:[#allocation8 + $0x3b8] sm:$0xff] }
  0x82   : > { %1237 = vmatpush.bf16.msra.mxu1 %v9104_v12 }
  0x83   : > { %1333 = vmatpush.bf16.msra.mxu2 %v9112_v10 }
  0x85   : > { %1142 = vmatpush.bf16.msra.mxu0 %v9095_v14  ;;  %v9121_v14 = vld [vmem:[#allocation8 + $0x2f0] sm:$0xff] }
  0x86   : > { %1238 = vmatpush.bf16.msra.mxu1 %v9103_v15  ;;  %v9129_v15 = vld [vmem:[#allocation8 + $0x330] sm:$0xff]  ;;  %1444 = vmatpush.bf16.msra.mxu3 %v9121_v14 }
  0x87   : > { %1334 = vmatpush.bf16.msra.mxu2 %v9111_v13 }
  0x88   : > { %773 = vmatmul.bf16.gmra.mxu0 %v10040_v52 }
  0x89   : > { %1143 = vmatpush.bf16.msra.mxu0 %v9094_v17  ;;  %870 = vmatmul.bf16.gmra.mxu1 %v10040_v52 }
  0x8a   : > { %1239 = vmatpush.bf16.msra.mxu1 %v9102_v18  ;;  %958 = vmatmul.bf16.gmra.mxu2 %v10040_v52  ;;  %v9145_v18 = vld [vmem:[#allocation8 + $0x3b0] sm:$0xff] }
  0x8b   : > { %1335 = vmatpush.bf16.msra.mxu2 %v9110_v16  ;;  %1055 = vmatmul.bf16.gmra.mxu3 %v10040_v52  ;;  %v9137_v16 = vld [vmem:[#allocation8 + $0x370] sm:$0xff] }
  0x8d   : > { %1144 = vmatpush.bf16.msra.mxu0 %v9093_v20 }
  0x8e   : > { %1240 = vmatpush.bf16.msra.mxu1 %v9101_v21 }
  0x8f   : > { %1336 = vmatpush.bf16.msra.mxu2 %v9109_v19 }
  0x91   : > { %1145 = vmatpush.bf16.msra.mxu0 %v9092_v23  ;;  %v9128_v23 = vld [vmem:[#allocation8 + $0x328] sm:$0xff] }
  0x92   : > { %1241 = vmatpush.bf16.msra.mxu1 %v9100_v24  ;;  %v9136_v24 = vld [vmem:[#allocation8 + $0x368] sm:$0xff] }
  0x93   : > { %1337 = vmatpush.bf16.msra.mxu2 %v9108_v22  ;;  %v9120_v22 = vld [vmem:[#allocation8 + $0x2e8] sm:$0xff] }
  0x94   : > { %1445 = vmatpush.bf16.msra.mxu3 %v9120_v22 }
  0x95   : > { %1146 = vmatpush.bf16.msra.mxu0 %v9091_v26  ;;  %v9119_v26 = vld [vmem:[#allocation8 + $0x2e0] sm:$0xff] }
  0x96   : > { %1242 = vmatpush.bf16.msra.mxu1 %v9099_v27  ;;  %v9127_v27 = vld [vmem:[#allocation8 + $0x320] sm:$0xff] }
  0x97   : > { %1338 = vmatpush.bf16.msra.mxu2 %v9107_v25  ;;  %v9144_v25 = vld [vmem:[#allocation8 + $0x3a8] sm:$0xff] }
  0x98   : > { %1147 = vmatmul.bf16.vlgmr.msra.gmra.mxu0 %v10034_v36  ;;  %1446 = vmatpush.bf16.msra.mxu3 %v9119_v26 }
  0x99   : > { %1243 = vmatmul.bf16.vlgmr.msra.gmra.mxu1 %v10034_v36  ;;  %1539 = vmatpush.bf16.msrb.mxu0 %v9130_v8 }
  0x9a   : > { %1339 = vmatmul.bf16.vlgmr.msra.gmra.mxu2 %v10034_v36  ;;  %1635 = vmatpush.bf16.msrb.mxu1 %v9138_v9 }
  0x9b   : > { %1731 = vmatpush.bf16.msrb.mxu2 %v9146_v11  ;;  %v9177_v11 = vld [vmem:[#allocation8 + $0x4b0] sm:$0xff] }
  0x9d   : > { %1540 = vmatpush.bf16.msrb.mxu0 %v9129_v15 }
  0x9e   : > { %1636 = vmatpush.bf16.msrb.mxu1 %v9137_v16 }
  0x9f   : > { %1732 = vmatpush.bf16.msrb.mxu2 %v9145_v18 }
  0xa1   : > { %1541 = vmatpush.bf16.msrb.mxu0 %v9128_v23  ;;  %v9152_v23 = vld [vmem:[#allocation8 + $0x3e8] sm:$0xff] }
  0xa2   : > { %1637 = vmatpush.bf16.msrb.mxu1 %v9136_v24  ;;  %v9160_v24 = vld [vmem:[#allocation8 + $0x428] sm:$0xff] }
  0xa3   : > { %1733 = vmatpush.bf16.msrb.mxu2 %v9144_v25 }
  0xa5   : > { %1542 = vmatpush.bf16.msrb.mxu0 %v9127_v27 }
  0xa7   : > { %1734 = vmatpush.bf16.msrb.mxu2 %v9143_v30 }
  0xa8   : > { %1152 = vmatmul.bf16.gmra.mxu0 %v10040_v52 }
  0xa9   : > { %1248 = vmatmul.bf16.gmra.mxu1 %v10040_v52 }
  0xaa   : > { %1344 = vmatmul.bf16.gmra.mxu2 %v10040_v52 }
  0xd5   : > { %v381_v28 = vpop.f32.mrf.mxu0 }
  0xd6   : > { %v478_v29 = vpop.f32.mrf.mxu1  ;;  %v391_v35 = vrot.slane %v381_v28, 3  ;;  %v9135_v28 = vld [vmem:[#allocation8 + $0x360] sm:$0xff] }
  0xd7   : > { %v488_v36 = vrot.slane %v478_v29, 4  ;;  %1638 = vmatpush.bf16.msrb.mxu1 %v9135_v28 }
  0xdd   : > { %v575_v32 = vpop.f32.mrf.mxu2  ;;  %v383_v33 = vpop.f32.mrf.mxu0 }
  0xde   : > { %v480_v34 = vpop.f32.mrf.mxu1  ;;  %v392_v37 = vrot.slane %v383_v33, 3  ;;  %v672_v39 = vpop.f32.mrf.mxu3  ;;  %v585_v44 = vrot.slane %v575_v32, 5 }
  0xdf   : > { %v489_v38 = vrot.slane %v480_v34, 4  ;;  %v682_v45 = vrot.slane %v672_v39, 6  ;;  %v9117_v39 = vld [vmem:[#allocation8 + $0x2d0] sm:$0xff] }
  0xe0   : > { %v398_v40 = vsel %vm395_vm0, %v391_v35, %v392_v37  ;;  %v9134_v37 = vld [vmem:[#allocation8 + $0x358] sm:$0xff] }
  0xe1   : > { %v495_v41 = vsel %vm492_vm1, %v488_v36, %v489_v38  ;;  %v9142_v38 = vld [vmem:[#allocation8 + $0x398] sm:$0xff]  ;;  %1639 = vmatpush.bf16.msrb.mxu1 %v9134_v37  ;;  %v9175_v37 = vld [vmem:[#allocation8 + $0x4a0] sm:$0xff] }
  0xe2   : > { %v498_v42 = vadd.f32 %v495_v41, %v398_v40  ;;  %1735 = vmatpush.bf16.msrb.mxu2 %v9142_v38  ;;  %v9125_v40 = vld [vmem:[#allocation8 + $0x310] sm:$0xff] }
  0xe3   : > { %v9133_v41 = vld [vmem:[#allocation8 + $0x350] sm:$0xff] }
  0xe5   : > { %v577_v43 = vpop.f32.mrf.mxu2  ;;  %v386_v47 = vpop.f32.mrf.mxu0  ;;  %1640 = vmatpush.bf16.msrb.mxu1 %v9133_v41 }
  0xe6   : > { %v586_v46 = vrot.slane %v577_v43, 5  ;;  %v483_v48 = vpop.f32.mrf.mxu1  ;;  %v674_v49 = vpop.f32.mrf.mxu3  ;;  %v9141_v43 = vld [vmem:[#allocation8 + $0x390] sm:$0xff]  ;;  %v9116_v47 = vld [vmem:[#allocation8 + $0x2c8] sm:$0xff] }
  0xe7   : > { %v683_v51 = vrot.slane %v674_v49, 6  ;;  %1736 = vmatpush.bf16.msrb.mxu2 %v9141_v43  ;;  %v9124_v48 = vld [vmem:[#allocation8 + $0x308] sm:$0xff] }
  0xe8   : > { %v592_v50 = vsel %vm589_vm2, %v585_v44, %v586_v46  ;;  %v9132_v49 = vld [vmem:[#allocation8 + $0x348] sm:$0xff] }
  0xe9   : > { %v595_v52 = vadd.f32 %v592_v50, %v498_v42  ;;  %v689_v53 = vsel %vm686_vm3, %v682_v45, %v683_v51  ;;  %v9140_v50 = vld [vmem:[#allocation8 + $0x388] sm:$0xff]  ;;  %1641 = vmatpush.bf16.msrb.mxu1 %v9132_v49 }
  0xeb   : > { %v10074_v54 = vadd.f32 %v689_v53, %v595_v52  ;;  %1737 = vmatpush.bf16.msrb.mxu2 %v9140_v50  ;;  %v9115_v53 = vld [vmem:[#allocation8 + $0x2c0] sm:$0xff] }
  0xed   : > { %v580_v55 = vpop.f32.mrf.mxu2  ;;  %v388_v56 = vpop.f32.mrf.mxu0 }
  0xee   : > { %v485_v57 = vpop.f32.mrf.mxu1  ;;  %v394_v58 = vrot.slane %v388_v56, 3  ;;  %v677_v60 = vpop.f32.mrf.mxu3  ;;  %v9123_v55 = vld [vmem:[#allocation8 + $0x300] sm:$0xff] }
  0xef   : > { %v491_v59 = vrot.slane %v485_v57, 4  ;;  %v9131_v56 = vld [vmem:[#allocation8 + $0x340] sm:$0xff] }
  0xf0   : > { %v399_v61 = vsel %vm395_vm0, %v394_v58, %v391_v35  ;;  %v9118_v35 = vld [vmem:[#allocation8 + $0x2d8] sm:$0xff]  ;;  %v9139_v58 = vld [vmem:[#allocation8 + $0x380] sm:$0xff]  ;;  %1642 = vmatpush.bf16.msrb.mxu1 %v9131_v56 }
  0xf1   : > { %v496_v62 = vsel %vm492_vm1, %v491_v59, %v488_v36  ;;  %v9126_v36 = vld [vmem:[#allocation8 + $0x318] sm:$0xff]  ;;  %1447 = vmatpush.bf16.msra.mxu3 %v9118_v35  ;;  %1738 = vmatpush.bf16.msrb.mxu2 %v9139_v58 }
  0xf2   : > { %v497_v63 = vadd.f32 %v496_v62, %v399_v61  ;;  %1543 = vmatpush.bf16.msrb.mxu0 %v9126_v36  ;;  %v9167_v36 = vld [vmem:[#allocation8 + $0x460] sm:$0xff]  ;;  %v9174_v58 = vld [vmem:[#allocation8 + $0x498] sm:$0xff] }
  0xf5   : > { %v582_v0 = vpop.f32.mrf.mxu2  ;;  %v10080_v2 = vpop.f32.mrf.mxu0  ;;  %1448 = vmatpush.bf16.msra.mxu3 %v9117_v39 }
  0xf6   : > { %v588_v1 = vrot.slane %v582_v0, 5  ;;  %v679_v3 = vpop.f32.mrf.mxu3  ;;  %v10082_v4 = vpop.f32.mrf.mxu1  ;;  %1544 = vmatpush.bf16.msrb.mxu0 %v9125_v40  ;;  %v779_v52 = vrot.slane %v10080_v2, 7  ;;  %v9162_v2 = vld [vmem:[#allocation8 + $0x438] sm:$0xff] }
  0xf7   : > { %v685_v6 = vrot.slane %v679_v3, 6  ;;  %v9170_v3 = vld [vmem:[#allocation8 + $0x478] sm:$0xff] }
  0xf8   : > { %v593_v5 = vsel %vm589_vm2, %v588_v1, %v585_v44  ;;  %v9154_v1 = vld [vmem:[#allocation8 + $0x3f8] sm:$0xff]  ;;  %2011 = vmatpush.bf16.msra.mxu1 %v9170_v3 }
  0xf9   : > { %v594_v10 = vadd.f32 %v593_v5, %v497_v63  ;;  %v690_v12 = vsel %vm686_vm3, %v685_v6, %v682_v45  ;;  %1449 = vmatpush.bf16.msra.mxu3 %v9116_v47  ;;  %v9178_v5 = vld [vmem:[#allocation8 + $0x4b8] sm:$0xff]  ;;  %v9153_v6 = vld [vmem:[#allocation8 + $0x3f0] sm:$0xff] }
  0xfa   : > { %1545 = vmatpush.bf16.msrb.mxu0 %v9124_v48  ;;  %2107 = vmatpush.bf16.msra.mxu2 %v9178_v5 }
  0xfb   : > { %v10088_v13 = vadd.f32 %v690_v12, %v594_v10  ;;  %v9169_v10 = vld [vmem:[#allocation8 + $0x470] sm:$0xff] }
  0xfc   : > { %2012 = vmatpush.bf16.msra.mxu1 %v9169_v10  ;;  %v9148_v10 = vld [vmem:[#allocation8 + $0x3c8] sm:$0xff] }
  0xfd   : > { %v10090_v17 = vpop.f32.mrf.mxu2  ;;  %v10092_v19 = vpop.f32.mrf.mxu0  ;;  %1450 = vmatpush.bf16.msra.mxu3 %v9115_v53  ;;  %v9166_v53 = vld [vmem:[#allocation8 + $0x458] sm:$0xff] }
  0xfe   : > { %v10094_v20 = vpop.f32.mrf.mxu1  ;;  %v10096_v21 = vpop.f32.mrf.mxu3  ;;  %1546 = vmatpush.bf16.msrb.mxu0 %v9123_v55  ;;  %v780_v63 = vrot.slane %v10092_v19, 7  ;;  %v964_v14 = vrot.slane %v10090_v17, 1  ;;  %2108 = vmatpush.bf16.msra.mxu2 %v9177_v11  ;;  %v9168_v17 = vld [vmem:[#allocation8 + $0x468] sm:$0xff] }
  0xff   : > { %v1061_v15 = vrot.slane %v10096_v21, 2  ;;  %v9176_v21 = vld [vmem:[#allocation8 + $0x4a8] sm:$0xff] }
 0x100   : > { %v786_v8 = vsel %vm783_vm4, %v779_v52, %v780_v63  ;;  %2013 = vmatpush.bf16.msra.mxu1 %v9168_v17  ;;  %v9165_v63 = vld [vmem:[#allocation8 + $0x450] sm:$0xff]  ;;  %v9156_v11 = vld [vmem:[#allocation8 + $0x408] sm:$0xff] }
 0x101   : > { %1827 = vmatpush.bf16.msrb.mxu3 %v9154_v1  ;;  %v789_v19 = vadd.f32 %v786_v8, %v10074_v54 }
 0x102   : > { %1923 = vmatpush.bf16.msra.mxu0 %v9162_v2  ;;  %2109 = vmatpush.bf16.msra.mxu2 %v9176_v21  ;;  %v9651_v2 = vld [vmem:[#allocation10] ss:$0 sm:$0xff]  ;;  %v9186_v21 = vld [vmem:[#allocation8 + $0x4f8] sm:$0xff] }
 0x104   : > { %2014 = vmatpush.bf16.msra.mxu1 %v9167_v36  ;;  %v9191_v36 = vld [vmem:[#allocation8 + $0x520] sm:$0xff] }
 0x105   : > { %v10098_v29 = vpop.f32.mrf.mxu2  ;;  %v774_v32 = vpop.f32.mrf.mxu0  ;;  %1828 = vmatpush.bf16.msrb.mxu3 %v9153_v6 }
 0x106   : > { %v871_v33 = vpop.f32.mrf.mxu1  ;;  %v10100_v34 = vpop.f32.mrf.mxu3  ;;  %v965_v9 = vrot.slane %v10098_v29, 1  ;;  %1924 = vmatpush.bf16.msra.mxu0 %v9161_v7  ;;  %v877_v32 = vadd.f32 %v10094_v20, %v789_v19  ;;  %2110 = vmatpush.bf16.msra.mxu2 %v9175_v37  ;;  %v9147_v19 = vld [vmem:[#allocation8 + $0x3c0] sm:$0xff] }
 0x107   : > { %v9151_v33 = vld [vmem:[#allocation8 + $0x3e0] sm:$0xff] }
 0x108   : > { %v971_v25 = vsel %vm968_vm5, %v964_v14, %v965_v9  ;;  %2015 = vmatpush.bf16.msra.mxu1 %v9166_v53  ;;  %v9172_v14 = vld [vmem:[#allocation8 + $0x488] sm:$0xff]  ;;  %v9199_v37 = vld [vmem:[#allocation8 + $0x560] sm:$0xff] }
 0x109   : > { %1829 = vmatpush.bf16.msrb.mxu3 %v9152_v23  ;;  %v9163_v23 = vld [vmem:[#allocation8 + $0x440] sm:$0xff] }
 0x10a   : > { %1925 = vmatpush.bf16.msra.mxu0 %v9160_v24  ;;  %2111 = vmatpush.bf16.msra.mxu2 %v9174_v58  ;;  %v9171_v24 = vld [vmem:[#allocation8 + $0x480] sm:$0xff] }
 0x10c   : > { %2016 = vmatpush.bf16.msra.mxu1 %v9165_v63 }
 0x10d   : > { %v10102_v42 = vpop.f32.mrf.mxu2  ;;  %v776_v44 = vpop.f32.mrf.mxu0  ;;  %1830 = vmatpush.bf16.msrb.mxu3 %v9151_v33  ;;  %v9192_v33 = vld [vmem:[#allocation8 + $0x528] sm:$0xff] }
 0x10e   : > { %v873_v45 = vpop.f32.mrf.mxu1  ;;  %v10104_v46 = vpop.f32.mrf.mxu3  ;;  %v782_v51 = vrot.slane %v776_v44, 7  ;;  %v966_v16 = vrot.slane %v10102_v42, 1 }
 0x10f   : > { %v1063_v29 = vrot.slane %v10104_v46, 2 }
 0x110   : > { %v787_v59 = vsel %vm783_vm4, %v782_v51, %v779_v52  ;;  %v970_v28 = vsel %vm968_vm5, %v965_v9, %v966_v16  ;;  %v9150_v51 = vld [vmem:[#allocation8 + $0x3d8] sm:$0xff] }
 0x111   : > { %v788_v0 = vadd.f32 %v787_v59, %v10088_v13  ;;  %v974_v38 = vadd.f32 %v970_v28, %v877_v32  ;;  %v9158_v52 = vld [vmem:[#allocation8 + $0x418] sm:$0xff]  ;;  %1831 = vmatpush.bf16.msrb.mxu3 %v9150_v51  ;;  %v9185_v28 = vld [vmem:[#allocation8 + $0x4f0] sm:$0xff]  ;;  %v9184_v32 = vld [vmem:[#allocation8 + $0x4e8] sm:$0xff] }
 0x113   : > { %v876_v12 = vadd.f32 %v10082_v4, %v788_v0  ;;  %v1062_v4 = vrot.slane %v10100_v34, 2  ;;  %v9159_v34 = vld [vmem:[#allocation8 + $0x420] sm:$0xff]  ;;  %v9173_v0 = vld [vmem:[#allocation8 + $0x490] sm:$0xff] }
 0x114   : > { %1926 = vmatpush.bf16.msra.mxu0 %v9159_v34  ;;  %2112 = vmatpush.bf16.msra.mxu2 %v9173_v0  ;;  %v9200_v34 = vld [vmem:[#allocation8 + $0x568] sm:$0xff] }
 0x115   : > { %v961_v57 = vpop.f32.mrf.mxu2  ;;  %v1148_v60 = vpop.f32.mrf.mxu0  ;;  %v973_v27 = vadd.f32 %v971_v25, %v876_v12  ;;  %v1068_v54 = vsel %vm1065_vm6, %v1061_v15, %v1062_v4  ;;  %v1067_v41 = vsel %vm1065_vm6, %v1062_v4, %v1063_v29  ;;  %v9193_v29 = vld [vmem:[#allocation8 + $0x530] sm:$0xff] }
 0x116   : > { %v10110_v61 = vpop.f32.mrf.mxu1  ;;  %v1058_v62 = vpop.f32.mrf.mxu3  ;;  %v1158_v30 = vrot.slane %v1148_v60, 3  ;;  %v1071_v49 = vadd.f32 %v1067_v41, %v974_v38  ;;  %v9881_v38 = vmov 0.0|0.0   ;;  %v9198_v41 = vld [vmem:[#allocation8 + $0x558] sm:$0xff] }
 0x117   : > { %v1070_v39 = vadd.f32 %v1068_v54, %v973_v27  ;;  %v1254_v47 = vrot.slane %v10110_v61, 4  ;;  %v9149_v61 = vld [vmem:[#allocation8 + $0x3d0] sm:$0xff]  ;;  %v9194_v27 = vld [vmem:[#allocation8 + $0x538] sm:$0xff] }
 0x118   : > { %1927 = vmatpush.bf16.msra.mxu0 %v9158_v52  ;;  %v9157_v62 = vld [vmem:[#allocation8 + $0x410] sm:$0xff]  ;;  %1832 = vmatpush.bf16.msrb.mxu3 %v9149_v61  ;;  %v9202_v54 = vld [vmem:[#allocation8 + $0x578] sm:$0xff] }
 0x119   : > { %2113 = vmatpush.bf16.msra.mxu2 %v9172_v14 }
 0x11c   : > { %1928 = vmatpush.bf16.msra.mxu0 %v9157_v62  ;;  %1833 = vmatpush.bf16.msrb.mxu3 %v9148_v10 }
 0x11d   : > { %v1340_v13 = vpop.f32.mrf.mxu2  ;;  %v1150_v18 = vpop.f32.mrf.mxu0  ;;  %2114 = vmatpush.bf16.msra.mxu2 %v9171_v24 }
 0x11e   : > { %v10123_v22 = vpop.f32.mrf.mxu1  ;;  %v1159_v26 = vrot.slane %v1150_v18, 3  ;;  %v1350_v48 = vrot.slane %v1340_v13, 5  ;;  %v9164_v13 = vld [vmem:[#allocation8 + $0x448] sm:$0xff] }
 0x11f   : > { %v1255_v42 = vrot.slane %v10123_v22, 4  ;;  %v9155_v22 = vld [vmem:[#allocation8 + $0x400] sm:$0xff]  ;;  %2017 = vmatpush.bf16.msra.mxu1 %v9164_v13 }
 0x120   : > { %v1164_v35 = vsel %vm395_vm0, %v1158_v30, %v1159_v26  ;;  %1929 = vmatpush.bf16.msra.mxu0 %v9156_v11  ;;  %1834 = vmatpush.bf16.msrb.mxu3 %v9147_v19  ;;  %v9201_v30 = vld [vmem:[#allocation8 + $0x570] sm:$0xff] }
 0x121   : > { %v1166_v44 = vadd.f32 %v1164_v35, %v1070_v39  ;;  %v1260_v55 = vsel %vm492_vm1, %v1254_v47, %v1255_v42  ;;  %v9183_v35 = vld [vmem:[#allocation8 + $0x4e0] sm:$0xff]  ;;  %v9182_v39 = vld [vmem:[#allocation8 + $0x4d8] sm:$0xff] }
 0x122   : > { %v9179_v47 = vld [vmem:[#allocation8 + $0x4c0] sm:$0xff] }
 0x123   : > { %v1262_v59 = vadd.f32 %v1260_v55, %v1166_v44  ;;  %2018 = vmatpush.bf16.msra.mxu1 %v9163_v23  ;;  %v9180_v44 = vld [vmem:[#allocation8 + $0x4c8] sm:$0xff] }
 0x124   : > { %1930 = vmatpush.bf16.msra.mxu0 %v9155_v22 }
 0x125   : > { %v1342_v40 = vpop.f32.mrf.mxu2  ;;  %v1153_v43 = vpop.f32.mrf.mxu0 }
 0x126   : > { %v1351_v20 = vrot.slane %v1342_v40, 5  ;;  %v1160_v45 = vrot.slane %v1153_v43, 3  ;;  %v1249_v46 = vpop.f32.mrf.mxu1  ;;  %v9190_v40 = vld [vmem:[#allocation8 + $0x518] sm:$0xff]  ;;  %v9197_v43 = vld [vmem:[#allocation8 + $0x550] sm:$0xff] }
 0x127   : > { %v1256_v57 = vrot.slane %v1249_v46, 4  ;;  %v9196_v46 = vld [vmem:[#allocation8 + $0x548] sm:$0xff] }
 0x128   : > { %v1163_v50 = vsel %vm395_vm0, %v1159_v26, %v1160_v45  ;;  %v1356_v56 = vsel %vm589_vm2, %v1350_v48, %v1351_v20  ;;  %v9188_v45 = vld [vmem:[#allocation8 + $0x508] sm:$0xff]  ;;  %v9187_v48 = vld [vmem:[#allocation8 + $0x500] sm:$0xff] }
 0x129   : > { %v1167_v60 = vadd.f32 %v1163_v50, %v1071_v49  ;;  %v1358_v1 = vadd.f32 %v1356_v56, %v1262_v59  ;;  %v1259_v5 = vsel %vm492_vm1, %v1255_v42, %v1256_v57  ;;  %v9181_v42 = vld [vmem:[#allocation8 + $0x4d0] sm:$0xff]  ;;  %v9195_v49 = vld [vmem:[#allocation8 + $0x540] sm:$0xff] }
 0x12b   : > { %v1263_v8 = vadd.f32 %v1259_v5, %v1167_v60  ;;  %v1364_v15 = vadd.f32 %v9651_v2, %v1358_v1 }
 0x12d   : > { %v1345_v3 = vpop.f32.mrf.mxu2  ;;  %v1155_v7 = vpop.f32.mrf.mxu0  ;;  %v1368_v25 = vmax.f32 %v1364_v15, 0.0 }
 0x12e   : > { %v1352_v6 = vrot.slane %v1345_v3, 5  ;;  %v1251_v9 = vpop.f32.mrf.mxu1 }
 0x130   : > { %v1355_v12 = vsel %vm589_vm2, %v1351_v20, %v1352_v6  ;;  %v9189_v20 = vld [vmem:[#allocation8 + $0x510] sm:$0xff] }
 0x131   : > { %v1359_v16 = vadd.f32 %v1355_v12, %v1263_v8 }
 0x133   : > { %v1365_v18 = vadd.f32 %v9651_v2, %v1359_v16 }
 0x135   : > { %v1369_v4 = vmax.f32 %v1365_v18, 0.0  ;;  %v1347_v26 = vpop.f32.mrf.mxu2 }
 0x137   : > { %v10151_v17 = vpack.c.bf16 %v1369_v4, %v1368_v25 }
 0x139   : > { %1451 = vmatmul.bf16.vlgmr.msra.gmra.mxu3 %v10151_v17  ;;  %1547 = vmatmul.bf16.vlgmr.msrb.gmra.mxu0 %v10151_v17 }
 0x13a   : > { %1643 = vmatmul.bf16.vlgmr.msrb.gmra.mxu1 %v10151_v17  ;;  %1739 = vmatmul.bf16.vlgmr.msrb.gmra.mxu2 %v10151_v17 }
 0x13b   : > { %2203 = vmatpush.bf16.msra.mxu3 %v9186_v21  ;;  %2299 = vmatpush.bf16.msrb.mxu0 %v9194_v27 }
 0x13c   : > { %2395 = vmatpush.bf16.msrb.mxu1 %v9202_v54 }
 0x13f   : > { %2204 = vmatpush.bf16.msra.mxu3 %v9185_v28  ;;  %2300 = vmatpush.bf16.msrb.mxu0 %v9193_v29 }
 0x140   : > { %2396 = vmatpush.bf16.msrb.mxu1 %v9201_v30 }
 0x143   : > { %2205 = vmatpush.bf16.msra.mxu3 %v9184_v32  ;;  %2301 = vmatpush.bf16.msrb.mxu0 %v9192_v33  ;;  %v9210_v33 = vld [vmem:[#allocation8 + $0x5b8] sm:$0xff] }
 0x144   : > { %2397 = vmatpush.bf16.msrb.mxu1 %v9200_v34  ;;  %v9218_v34 = vld [vmem:[#allocation8 + $0x5f8] sm:$0xff]  ;;  %2507 = vmatpush.bf16.msrb.mxu2 %v9210_v33 }
 0x147   : > { %2206 = vmatpush.bf16.msra.mxu3 %v9183_v35  ;;  %2302 = vmatpush.bf16.msrb.mxu0 %v9191_v36  ;;  %v9226_v35 = vld [vmem:[#allocation8 + $0x638] sm:$0xff] }
 0x148   : > { %2398 = vmatpush.bf16.msrb.mxu1 %v9199_v37  ;;  %v9234_v37 = vld [vmem:[#allocation8 + $0x678] sm:$0xff] }
 0x149   : > { %1456 = vmatmul.bf16.gmra.mxu3 %v9881_v38  ;;  %1552 = vmatmul.bf16.gmra.mxu0 %v9881_v38 }
 0x14a   : > { %1648 = vmatmul.bf16.gmra.mxu1 %v9881_v38  ;;  %1744 = vmatmul.bf16.gmra.mxu2 %v9881_v38 }
 0x14b   : > { %2207 = vmatpush.bf16.msra.mxu3 %v9182_v39  ;;  %2303 = vmatpush.bf16.msrb.mxu0 %v9190_v40 }
 0x14c   : > { %2399 = vmatpush.bf16.msrb.mxu1 %v9198_v41  ;;  %v9209_v41 = vld [vmem:[#allocation8 + $0x5b0] sm:$0xff] }
 0x14d   : > { %2508 = vmatpush.bf16.msrb.mxu2 %v9209_v41 }
 0x14f   : > { %2208 = vmatpush.bf16.msra.mxu3 %v9181_v42  ;;  %2304 = vmatpush.bf16.msrb.mxu0 %v9189_v20  ;;  %v9217_v42 = vld [vmem:[#allocation8 + $0x5f0] sm:$0xff] }
 0x150   : > { %2400 = vmatpush.bf16.msrb.mxu1 %v9197_v43  ;;  %v9225_v20 = vld [vmem:[#allocation8 + $0x630] sm:$0xff] }
 0x151   : > { %v9233_v43 = vld [vmem:[#allocation8 + $0x670] sm:$0xff] }
 0x153   : > { %2209 = vmatpush.bf16.msra.mxu3 %v9180_v44  ;;  %2305 = vmatpush.bf16.msrb.mxu0 %v9188_v45  ;;  %v9208_v45 = vld [vmem:[#allocation8 + $0x5a8] sm:$0xff] }
 0x154   : > { %2401 = vmatpush.bf16.msrb.mxu1 %v9196_v46  ;;  %v9216_v46 = vld [vmem:[#allocation8 + $0x5e8] sm:$0xff]  ;;  %2509 = vmatpush.bf16.msrb.mxu2 %v9208_v45 }
 0x155   : > { %v9240_v45 = vld [vmem:[#allocation8 + $0x6a8] sm:$0xff] }
 0x157   : > { %2210 = vmatpush.bf16.msra.mxu3 %v9179_v47  ;;  %2306 = vmatpush.bf16.msrb.mxu0 %v9187_v48  ;;  %v9224_v47 = vld [vmem:[#allocation8 + $0x628] sm:$0xff] }
 0x158   : > { %2402 = vmatpush.bf16.msrb.mxu1 %v9195_v49  ;;  %v9232_v49 = vld [vmem:[#allocation8 + $0x668] sm:$0xff] }
 0x159   : > { %1835 = vmatmul.bf16.vlgmr.msrb.gmra.mxu3 %v10151_v17  ;;  %1931 = vmatmul.bf16.vlgmr.msra.gmra.mxu0 %v10151_v17 }
 0x15a   : > { %2019 = vmatmul.bf16.vlgmr.msra.gmra.mxu1 %v10151_v17  ;;  %2115 = vmatmul.bf16.vlgmr.msra.gmra.mxu2 %v10151_v17 }
 0x15b   : > { %2603 = vmatpush.bf16.msrb.mxu3 %v9218_v34  ;;  %2699 = vmatpush.bf16.msra.mxu0 %v9226_v35  ;;  %v9249_v35 = vld [vmem:[#allocation8 + $0x6f0] sm:$0xff] }
 0x15c   : > { %2795 = vmatpush.bf16.msra.mxu1 %v9234_v37 }
 0x15f   : > { %2604 = vmatpush.bf16.msrb.mxu3 %v9217_v42  ;;  %2700 = vmatpush.bf16.msra.mxu0 %v9225_v20  ;;  %v9257_v42 = vld [vmem:[#allocation8 + $0x730] sm:$0xff] }
 0x160   : > { %2796 = vmatpush.bf16.msra.mxu1 %v9233_v43  ;;  %v9265_v20 = vld [vmem:[#allocation8 + $0x770] sm:$0xff] }
 0x163   : > { %2605 = vmatpush.bf16.msrb.mxu3 %v9216_v46  ;;  %2701 = vmatpush.bf16.msra.mxu0 %v9224_v47  ;;  %v9248_v46 = vld [vmem:[#allocation8 + $0x6e8] sm:$0xff] }
 0x164   : > { %2797 = vmatpush.bf16.msra.mxu1 %v9232_v49  ;;  %v9256_v47 = vld [vmem:[#allocation8 + $0x728] sm:$0xff] }
 0x165   : > { %v9264_v49 = vld [vmem:[#allocation8 + $0x768] sm:$0xff] }
 0x169   : > { %1840 = vmatmul.bf16.gmra.mxu3 %v9881_v38  ;;  %1936 = vmatmul.bf16.gmra.mxu0 %v9881_v38 }
 0x16a   : > { %2024 = vmatmul.bf16.gmra.mxu1 %v9881_v38  ;;  %2120 = vmatmul.bf16.gmra.mxu2 %v9881_v38 }
 0x179   : > { %2211 = vmatmul.bf16.vlgmr.msra.gmra.mxu3 %v10151_v17  ;;  %2307 = vmatmul.bf16.vlgmr.msrb.gmra.mxu0 %v10151_v17 }
 0x17a   : > { %2403 = vmatmul.bf16.vlgmr.msrb.gmra.mxu1 %v10151_v17 }
 0x189   : > { %2216 = vmatmul.bf16.gmra.mxu3 %v9881_v38  ;;  %2312 = vmatmul.bf16.gmra.mxu0 %v9881_v38 }
 0x18a   : > { %2408 = vmatmul.bf16.gmra.mxu1 %v9881_v38 }
 0x1b6   : > { %v1548_v50 = vpop.f32.mrf.mxu0 }
 0x1b7   : > { %v1644_v51 = vpop.f32.mrf.mxu1  ;;  %v1558_v59 = vrot.slane %v1548_v50, 4 }
 0x1b8   : > { %v1654_v1 = vrot.slane %v1644_v51, 5 }
 0x1bc   : > { %v1452_v52 = vpop.f32.mrf.mxu3 }
 0x1bd   : > { %v1740_v53 = vpop.f32.mrf.mxu2  ;;  %v1462_v60 = vrot.slane %v1452_v52, 3  ;;  %v9207_v52 = vld [vmem:[#allocation8 + $0x5a0] sm:$0xff] }
 0x1be   : > { %v1550_v55 = vpop.f32.mrf.mxu0  ;;  %v1750_v8 = vrot.slane %v1740_v53, 6  ;;  %v9215_v53 = vld [vmem:[#allocation8 + $0x5e0] sm:$0xff]  ;;  %2510 = vmatpush.bf16.msrb.mxu2 %v9207_v52 }
 0x1bf   : > { %v1646_v56 = vpop.f32.mrf.mxu1  ;;  %v1559_v57 = vrot.slane %v1550_v55, 4  ;;  %v9223_v55 = vld [vmem:[#allocation8 + $0x620] sm:$0xff]  ;;  %2606 = vmatpush.bf16.msrb.mxu3 %v9215_v53 }
 0x1c0   : > { %v1655_v61 = vrot.slane %v1646_v56, 5  ;;  %v9231_v56 = vld [vmem:[#allocation8 + $0x660] sm:$0xff]  ;;  %2702 = vmatpush.bf16.msra.mxu0 %v9223_v55 }
 0x1c1   : > { %v1564_v2 = vsel %vm492_vm1, %v1558_v59, %v1559_v57  ;;  %2798 = vmatpush.bf16.msra.mxu1 %v9231_v56 }
 0x1c2   : > { %v1660_v9 = vsel %vm589_vm2, %v1654_v1, %v1655_v61  ;;  %v9222_v61 = vld [vmem:[#allocation8 + $0x618] sm:$0xff] }
 0x1c4   : > { %v1454_v58 = vpop.f32.mrf.mxu3  ;;  %2703 = vmatpush.bf16.msra.mxu0 %v9222_v61 }
 0x1c5   : > { %v1463_v62 = vrot.slane %v1454_v58, 3  ;;  %v1742_v63 = vpop.f32.mrf.mxu2  ;;  %v9206_v58 = vld [vmem:[#allocation8 + $0x598] sm:$0xff] }
 0x1c6   : > { %v1553_v0 = vpop.f32.mrf.mxu0  ;;  %v1751_v5 = vrot.slane %v1742_v63, 6  ;;  %2511 = vmatpush.bf16.msrb.mxu2 %v9206_v58  ;;  %v9239_v58 = vld [vmem:[#allocation8 + $0x6a0] sm:$0xff] }
 0x1c7   : > { %v1468_v3 = vsel %vm395_vm0, %v1462_v60, %v1463_v62  ;;  %v1649_v6 = vpop.f32.mrf.mxu1  ;;  %v9230_v62 = vld [vmem:[#allocation8 + $0x658] sm:$0xff] }
 0x1c8   : > { %v1567_v7 = vadd.f32 %v1564_v2, %v1468_v3  ;;  %v1756_v11 = vsel %vm686_vm3, %v1750_v8, %v1751_v5  ;;  %2799 = vmatpush.bf16.msra.mxu1 %v9230_v62  ;;  %v9213_v2 = vld [vmem:[#allocation8 + $0x5d0] sm:$0xff] }
 0x1c9   : > { %v9221_v3 = vld [vmem:[#allocation8 + $0x610] sm:$0xff] }
 0x1ca   : > { %v1663_v10 = vadd.f32 %v1660_v9, %v1567_v7  ;;  %v9229_v5 = vld [vmem:[#allocation8 + $0x650] sm:$0xff]  ;;  %2704 = vmatpush.bf16.msra.mxu0 %v9221_v3  ;;  %v9204_v7 = vld [vmem:[#allocation8 + $0x588] sm:$0xff] }
 0x1cb   : > { %v9220_v9 = vld [vmem:[#allocation8 + $0x608] sm:$0xff] }
 0x1cc   : > { %v10183_v12 = vadd.f32 %v1756_v11, %v1663_v10  ;;  %v1457_v13 = vpop.f32.mrf.mxu3  ;;  %2800 = vmatpush.bf16.msra.mxu1 %v9229_v5 }
 0x1cd   : > { %v1745_v14 = vpop.f32.mrf.mxu2 }
 0x1ce   : > { %v1555_v15 = vpop.f32.mrf.mxu0  ;;  %v9228_v14 = vld [vmem:[#allocation8 + $0x648] sm:$0xff]  ;;  %2705 = vmatpush.bf16.msra.mxu0 %v9220_v9 }
 0x1cf   : > { %v1651_v16 = vpop.f32.mrf.mxu1  ;;  %v1561_v18 = vrot.slane %v1555_v15, 4 }
 0x1d0   : > { %v1657_v22 = vrot.slane %v1651_v16, 5  ;;  %2801 = vmatpush.bf16.msra.mxu1 %v9228_v14 }
 0x1d1   : > { %v1565_v4 = vsel %vm492_vm1, %v1561_v18, %v1558_v59  ;;  %v9214_v59 = vld [vmem:[#allocation8 + $0x5d8] sm:$0xff] }
 0x1d2   : > { %v1661_v54 = vsel %vm589_vm2, %v1657_v22, %v1654_v1  ;;  %2607 = vmatpush.bf16.msrb.mxu3 %v9214_v59  ;;  %v9205_v1 = vld [vmem:[#allocation8 + $0x590] sm:$0xff]  ;;  %v9211_v22 = vld [vmem:[#allocation8 + $0x5c0] sm:$0xff] }
 0x1d3   : > { %2512 = vmatpush.bf16.msrb.mxu2 %v9205_v1  ;;  %v9247_v59 = vld [vmem:[#allocation8 + $0x6e0] sm:$0xff] }
 0x1d4   : > { %v1459_v19 = vpop.f32.mrf.mxu3  ;;  %v9263_v1 = vld [vmem:[#allocation8 + $0x760] sm:$0xff] }
 0x1d5   : > { %v1465_v23 = vrot.slane %v1459_v19, 3  ;;  %v1747_v24 = vpop.f32.mrf.mxu2  ;;  %v9203_v19 = vld [vmem:[#allocation8 + $0x580] sm:$0xff] }
 0x1d6   : > { %v10185_v25 = vpop.f32.mrf.mxu0  ;;  %v1753_v17 = vrot.slane %v1747_v24, 6  ;;  %2608 = vmatpush.bf16.msrb.mxu3 %v9213_v2  ;;  %v9227_v24 = vld [vmem:[#allocation8 + $0x640] sm:$0xff] }
 0x1d7   : > { %v1469_v26 = vsel %vm395_vm0, %v1465_v23, %v1462_v60  ;;  %v10191_v21 = vpop.f32.mrf.mxu1  ;;  %2513 = vmatpush.bf16.msrb.mxu2 %v9204_v7  ;;  %v9219_v23 = vld [vmem:[#allocation8 + $0x600] sm:$0xff]  ;;  %2802 = vmatpush.bf16.msra.mxu1 %v9227_v24  ;;  %v9237_v24 = vld [vmem:[#allocation8 + $0x690] sm:$0xff] }
 0x1d8   : > { %v1566_v27 = vadd.f32 %v1565_v4, %v1469_v26  ;;  %v1757_v29 = vsel %vm686_vm3, %v1753_v17, %v1750_v8  ;;  %v9212_v8 = vld [vmem:[#allocation8 + $0x5c8] sm:$0xff]  ;;  %2706 = vmatpush.bf16.msra.mxu0 %v9219_v23  ;;  %v9242_v17 = vld [vmem:[#allocation8 + $0x6b8] sm:$0xff]  ;;  %v2030_v37 = vrot.slane %v10191_v21, 1 }
 0x1da   : > { %v1662_v28 = vadd.f32 %v1661_v54, %v1566_v27  ;;  %2609 = vmatpush.bf16.msrb.mxu3 %v9212_v8  ;;  %v9250_v27 = vld [vmem:[#allocation8 + $0x6f8] sm:$0xff] }
 0x1db   : > { %2514 = vmatpush.bf16.msrb.mxu2 %v9203_v19  ;;  %v9258_v54 = vld [vmem:[#allocation8 + $0x738] sm:$0xff] }
 0x1dc   : > { %v10197_v30 = vadd.f32 %v1757_v29, %v1662_v28  ;;  %v10199_v32 = vpop.f32.mrf.mxu3  ;;  %3075 = vmatpush.bf16.msrb.mxu0 %v9258_v54  ;;  %v9262_v19 = vld [vmem:[#allocation8 + $0x758] sm:$0xff] }
 0x1dd   : > { %v10201_v36 = vpop.f32.mrf.mxu2  ;;  %v1846_v10 = vrot.slane %v10199_v32, 7  ;;  %v9266_v32 = vld [vmem:[#allocation8 + $0x778] sm:$0xff] }
 0x1de   : > { %v10203_v39 = vpop.f32.mrf.mxu0  ;;  %2610 = vmatpush.bf16.msrb.mxu3 %v9211_v22  ;;  %3171 = vmatpush.bf16.msrb.mxu1 %v9266_v32  ;;  %v2126_v21 = vrot.slane %v10201_v36, 2  ;;  %v9652_v32 = vld [vmem:[#allocation10 + $0x1] ss:$0 sm:$0xff] }
 0x1df   : > { %v10205_v40 = vpop.f32.mrf.mxu1  ;;  %2891 = vmatpush.bf16.msra.mxu2 %v9242_v17 }
 0x1e0   : > { %v2031_v28 = vrot.slane %v10205_v40, 1  ;;  %3076 = vmatpush.bf16.msrb.mxu0 %v9257_v42  ;;  %v9252_v42 = vld [vmem:[#allocation8 + $0x708] sm:$0xff] }
 0x1e2   : > { %2987 = vmatpush.bf16.msra.mxu3 %v9250_v27  ;;  %v2036_v40 = vsel %vm968_vm5, %v2030_v37, %v2031_v28  ;;  %3172 = vmatpush.bf16.msrb.mxu1 %v9265_v20  ;;  %v9244_v37 = vld [vmem:[#allocation8 + $0x6c8] sm:$0xff] }
 0x1e3   : > { %v9260_v20 = vld [vmem:[#allocation8 + $0x748] sm:$0xff] }
 0x1e4   : > { %v10207_v44 = vpop.f32.mrf.mxu3  ;;  %3077 = vmatpush.bf16.msrb.mxu0 %v9256_v47  ;;  %v9259_v47 = vld [vmem:[#allocation8 + $0x740] sm:$0xff] }
 0x1e5   : > { %v10209_v48 = vpop.f32.mrf.mxu2  ;;  %v1847_v29 = vrot.slane %v10207_v44, 7 }
 0x1e6   : > { %v1937_v50 = vpop.f32.mrf.mxu0  ;;  %v2127_v43 = vrot.slane %v10209_v48, 2  ;;  %2988 = vmatpush.bf16.msra.mxu3 %v9249_v35  ;;  %3173 = vmatpush.bf16.msrb.mxu1 %v9264_v49  ;;  %v9236_v35 = vld [vmem:[#allocation8 + $0x688] sm:$0xff] }
 0x1e7   : > { %v10211_v51 = vpop.f32.mrf.mxu1 }
 0x1e8   : > { %v2132_v53 = vsel %vm1065_vm6, %v2126_v21, %v2127_v43  ;;  %v2032_v36 = vrot.slane %v10211_v51, 1  ;;  %v9251_v21 = vld [vmem:[#allocation8 + $0x700] sm:$0xff] }
 0x1ea   : > { %2989 = vmatpush.bf16.msra.mxu3 %v9248_v46  ;;  %v2035_v51 = vsel %vm968_vm5, %v2031_v28, %v2032_v36  ;;  %3174 = vmatpush.bf16.msrb.mxu1 %v9263_v1  ;;  %v9261_v28 = vld [vmem:[#allocation8 + $0x750] sm:$0xff]  ;;  %v9243_v46 = vld [vmem:[#allocation8 + $0x6c0] sm:$0xff]  ;;  %v9280_v36 = vld [vmem:[#allocation8 + $0x7e8] sm:$0xff] }
 0x1eb   : > { %v9278_v1 = vld [vmem:[#allocation8 + $0x7d8] sm:$0xff] }
 0x1ec   : > { %v1841_v57 = vpop.f32.mrf.mxu3 }
 0x1ed   : > { %v10213_v60 = vpop.f32.mrf.mxu2 }
 0x1ee   : > { %v1939_v63 = vpop.f32.mrf.mxu0  ;;  %v2128_v61 = vrot.slane %v10213_v60, 2  ;;  %2990 = vmatpush.bf16.msra.mxu3 %v9247_v59  ;;  %3175 = vmatpush.bf16.msrb.mxu1 %v9262_v19  ;;  %v9272_v59 = vld [vmem:[#allocation8 + $0x7a8] sm:$0xff] }
 0x1ef   : > { %v2027_v0 = vpop.f32.mrf.mxu1 }
 0x1f0   : > { %v9255_v0 = vld [vmem:[#allocation8 + $0x720] sm:$0xff]  ;;  %v2131_v60 = vsel %vm1065_vm6, %v2127_v43, %v2128_v61  ;;  %v9288_v61 = vld [vmem:[#allocation8 + $0x828] sm:$0xff] }
 0x1f1   : > { %3078 = vmatpush.bf16.msrb.mxu0 %v9255_v0  ;;  %v9270_v0 = vld [vmem:[#allocation8 + $0x798] sm:$0xff] }
 0x1f2   : > { %3176 = vmatpush.bf16.msrb.mxu1 %v9261_v28 }
 0x1f4   : > { %v1843_v6 = vpop.f32.mrf.mxu3 }
 0x1f5   : > { %v1849_v11 = vrot.slane %v1843_v6, 7  ;;  %v2123_v13 = vpop.f32.mrf.mxu2 }
 0x1f6   : > { %v10216_v15 = vpop.f32.mrf.mxu0  ;;  %v9254_v13 = vld [vmem:[#allocation8 + $0x718] sm:$0xff]  ;;  %3177 = vmatpush.bf16.msrb.mxu1 %v9260_v20 }
 0x1f7   : > { %v1853_v16 = vsel %vm783_vm4, %v1849_v11, %v1846_v10  ;;  %v10220_v18 = vpop.f32.mrf.mxu1  ;;  %v2318_v5 = vrot.slane %v10216_v15, 4  ;;  %v9246_v11 = vld [vmem:[#allocation8 + $0x6d8] sm:$0xff]  ;;  %3079 = vmatpush.bf16.msrb.mxu0 %v9254_v13 }
 0x1f8   : > { %v1854_v4 = vadd.f32 %v1853_v16, %v10197_v30  ;;  %v9241_v30 = vld [vmem:[#allocation8 + $0x6b0] sm:$0xff]  ;;  %v2414_v14 = vrot.slane %v10220_v18, 5  ;;  %2991 = vmatpush.bf16.msra.mxu3 %v9246_v11 }
 0x1f9   : > { %2892 = vmatpush.bf16.msra.mxu2 %v9241_v30  ;;  %v9253_v18 = vld [vmem:[#allocation8 + $0x710] sm:$0xff] }
 0x1fa   : > { %v1942_v33 = vadd.f32 %v10185_v25, %v1854_v4  ;;  %v1852_v25 = vsel %vm783_vm4, %v1846_v10, %v1847_v29  ;;  %v9238_v10 = vld [vmem:[#allocation8 + $0x698] sm:$0xff]  ;;  %v9245_v4 = vld [vmem:[#allocation8 + $0x6d0] sm:$0xff]  ;;  %3178 = vmatpush.bf16.msrb.mxu1 %v9259_v47 }
 0x1fb   : > { %v1855_v50 = vadd.f32 %v1852_v25, %v10183_v12  ;;  %3080 = vmatpush.bf16.msrb.mxu0 %v9253_v18 }
 0x1fc   : > { %v2212_v26 = vpop.f32.mrf.mxu3  ;;  %v2038_v44 = vadd.f32 %v2036_v40, %v1942_v33  ;;  %2992 = vmatpush.bf16.msra.mxu3 %v9245_v4 }
 0x1fd   : > { %v2222_v55 = vrot.slane %v2212_v26, 3  ;;  %2893 = vmatpush.bf16.msra.mxu2 %v9240_v45  ;;  %v1943_v2 = vadd.f32 %v10203_v39, %v1855_v50  ;;  %v9235_v45 = vld [vmem:[#allocation8 + $0x680] sm:$0xff] }
 0x1fe   : > { %v10226_v34 = vpop.f32.mrf.mxu0  ;;  %v2134_v48 = vadd.f32 %v2132_v53, %v2038_v44  ;;  %v9274_v53 = vld [vmem:[#allocation8 + $0x7b8] sm:$0xff] }
 0x1ff   : > { %v10229_v41 = vpop.f32.mrf.mxu1  ;;  %v2319_v62 = vrot.slane %v10226_v34, 4  ;;  %v2039_v8 = vadd.f32 %v2035_v51, %v1943_v2  ;;  %3081 = vmatpush.bf16.msrb.mxu0 %v9252_v42  ;;  %v9286_v2 = vld [vmem:[#allocation8 + $0x818] sm:$0xff]  ;;  %v9285_v51 = vld [vmem:[#allocation8 + $0x810] sm:$0xff] }
 0x200   : > { %v2415_v7 = vrot.slane %v10229_v41, 5  ;;  %2993 = vmatpush.bf16.msra.mxu3 %v9244_v37 }
 0x201   : > { %2894 = vmatpush.bf16.msra.mxu2 %v9239_v58  ;;  %v2324_v6 = vsel %vm492_vm1, %v2318_v5, %v2319_v62  ;;  %v2135_v22 = vadd.f32 %v2131_v60, %v2039_v8  ;;  %v9289_v58 = vld [vmem:[#allocation8 + $0x830] sm:$0xff]  ;;  %v9268_v60 = vld [vmem:[#allocation8 + $0x788] sm:$0xff]  ;;  %v9267_v8 = vld [vmem:[#allocation8 + $0x780] sm:$0xff] }
 0x202   : > { %v2420_v26 = vsel %vm589_vm2, %v2414_v14, %v2415_v7  ;;  %v9277_v5 = vld [vmem:[#allocation8 + $0x7d0] sm:$0xff] }
 0x203   : > { %3082 = vmatpush.bf16.msrb.mxu0 %v9251_v21 }
 0x204   : > { %v2214_v52 = vpop.f32.mrf.mxu3  ;;  %2994 = vmatpush.bf16.msra.mxu3 %v9243_v46 }
 0x205   : > { %v2223_v56 = vrot.slane %v2214_v52, 3  ;;  %2895 = vmatpush.bf16.msra.mxu2 %v9238_v10 }
 0x206   : > { %v2313_v57 = vpop.f32.mrf.mxu0 }
 0x207   : > { %v2228_v12 = vsel %vm395_vm0, %v2222_v55, %v2223_v56  ;;  %v2409_v63 = vpop.f32.mrf.mxu1  ;;  %v2320_v15 = vrot.slane %v2313_v57, 4  ;;  %v9282_v55 = vld [vmem:[#allocation8 + $0x7f8] sm:$0xff]  ;;  %v9281_v57 = vld [vmem:[#allocation8 + $0x7f0] sm:$0xff] }
 0x208   : > { %v2230_v3 = vadd.f32 %v2228_v12, %v2134_v48  ;;  %v2416_v17 = vrot.slane %v2409_v63, 5  ;;  %v9273_v48 = vld [vmem:[#allocation8 + $0x7b0] sm:$0xff]  ;;  %v9279_v12 = vld [vmem:[#allocation8 + $0x7e0] sm:$0xff] }
 0x209   : > { %v2323_v34 = vsel %vm492_vm1, %v2319_v62, %v2320_v15  ;;  %2896 = vmatpush.bf16.msra.mxu2 %v9237_v24  ;;  %v9271_v62 = vld [vmem:[#allocation8 + $0x7a0] sm:$0xff] }
 0x20a   : > { %v2326_v39 = vadd.f32 %v2324_v6, %v2230_v3  ;;  %v2419_v41 = vsel %vm589_vm2, %v2415_v7, %v2416_v17  ;;  %v9287_v63 = vld [vmem:[#allocation8 + $0x820] sm:$0xff]  ;;  %v9269_v3 = vld [vmem:[#allocation8 + $0x790] sm:$0xff]  ;;  %v9276_v6 = vld [vmem:[#allocation8 + $0x7c8] sm:$0xff] }
 0x20b   : > { %v9284_v7 = vld [vmem:[#allocation8 + $0x808] sm:$0xff] }
 0x20c   : > { %v2217_v9 = vpop.f32.mrf.mxu3  ;;  %v2422_v29 = vadd.f32 %v2420_v26, %v2326_v39  ;;  %v9275_v39 = vld [vmem:[#allocation8 + $0x7c0] sm:$0xff] }
 0x20d   : > { %v2224_v16 = vrot.slane %v2217_v9, 3  ;;  %2897 = vmatpush.bf16.msra.mxu2 %v9236_v35  ;;  %v9283_v9 = vld [vmem:[#allocation8 + $0x800] sm:$0xff] }
 0x20e   : > { %v2315_v23 = vpop.f32.mrf.mxu0  ;;  %v2428_v40 = vadd.f32 %v9652_v32, %v2422_v29 }
 0x20f   : > { %v2227_v27 = vsel %vm395_vm0, %v2223_v56, %v2224_v16  ;;  %v2411_v54 = vpop.f32.mrf.mxu1  ;;  %v9290_v56 = vld [vmem:[#allocation8 + $0x838] sm:$0xff] }
 0x210   : > { %v2231_v33 = vadd.f32 %v2227_v27, %v2135_v22  ;;  %v2432_v49 = vmax.f32 %v2428_v40, 0.0 }
 0x211   : > { %2898 = vmatpush.bf16.msra.mxu2 %v9235_v45 }
 0x212   : > { %v2327_v30 = vadd.f32 %v2323_v34, %v2231_v33 }
 0x214   : > { %v2423_v25 = vadd.f32 %v2419_v41, %v2327_v30  ;;  %v2219_v43 = vpop.f32.mrf.mxu3 }
 0x216   : > { %v2429_v44 = vadd.f32 %v9652_v32, %v2423_v25 }
 0x218   : > { %v2433_v50 = vmax.f32 %v2429_v44, 0.0 }
 0x21a   : > { %v10263_v52 = vpack.c.bf16 %v2433_v50, %v2432_v49 }
 0x21c   : > { %2515 = vmatmul.bf16.vlgmr.msrb.gmra.mxu2 %v10263_v52  ;;  %2611 = vmatmul.bf16.vlgmr.msrb.gmra.mxu3 %v10263_v52 }
 0x21d   : > { %2707 = vmatmul.bf16.vlgmr.msra.gmra.mxu0 %v10263_v52  ;;  %2803 = vmatmul.bf16.vlgmr.msra.gmra.mxu1 %v10263_v52 }
 0x21e   : > { %3267 = vmatpush.bf16.msrb.mxu2 %v9274_v53  ;;  %3363 = vmatpush.bf16.msrb.mxu3 %v9282_v55 }
 0x21f   : > { %3459 = vmatpush.bf16.msra.mxu0 %v9290_v56 }
 0x222   : > { %3268 = vmatpush.bf16.msrb.mxu2 %v9273_v48  ;;  %3364 = vmatpush.bf16.msrb.mxu3 %v9281_v57 }
 0x223   : > { %3460 = vmatpush.bf16.msra.mxu0 %v9289_v58 }
 0x226   : > { %3269 = vmatpush.bf16.msrb.mxu2 %v9272_v59  ;;  %3365 = vmatpush.bf16.msrb.mxu3 %v9280_v36 }
 0x227   : > { %3461 = vmatpush.bf16.msra.mxu0 %v9288_v61  ;;  %v9306_v61 = vld [vmem:[#allocation8 + $0x8b8] sm:$0xff] }
 0x22a   : > { %3270 = vmatpush.bf16.msrb.mxu2 %v9271_v62  ;;  %3366 = vmatpush.bf16.msrb.mxu3 %v9279_v12  ;;  %v9298_v62 = vld [vmem:[#allocation8 + $0x878] sm:$0xff] }
 0x22b   : > { %3462 = vmatpush.bf16.msra.mxu0 %v9287_v63  ;;  %v9314_v12 = vld [vmem:[#allocation8 + $0x8f8] sm:$0xff]  ;;  %3571 = vmatpush.bf16.msra.mxu1 %v9298_v62  ;;  %v9337_v62 = vld [vmem:[#allocation8 + $0x9b0] sm:$0xff] }
 0x22c   : > { %2520 = vmatmul.bf16.gmra.mxu2 %v9881_v38  ;;  %2616 = vmatmul.bf16.gmra.mxu3 %v9881_v38  ;;  %v9322_v63 = vld [vmem:[#allocation8 + $0x938] sm:$0xff] }
 0x22d   : > { %2712 = vmatmul.bf16.gmra.mxu0 %v9881_v38  ;;  %2808 = vmatmul.bf16.gmra.mxu1 %v9881_v38 }
 0x22e   : > { %3271 = vmatpush.bf16.msrb.mxu2 %v9270_v0  ;;  %3367 = vmatpush.bf16.msrb.mxu3 %v9278_v1 }
 0x22f   : > { %3463 = vmatpush.bf16.msra.mxu0 %v9286_v2  ;;  %v9305_v2 = vld [vmem:[#allocation8 + $0x8b0] sm:$0xff] }
 0x232   : > { %3272 = vmatpush.bf16.msrb.mxu2 %v9269_v3  ;;  %3368 = vmatpush.bf16.msrb.mxu3 %v9277_v5  ;;  %v9297_v3 = vld [vmem:[#allocation8 + $0x870] sm:$0xff] }
 0x233   : > { %3464 = vmatpush.bf16.msra.mxu0 %v9285_v51  ;;  %v9313_v5 = vld [vmem:[#allocation8 + $0x8f0] sm:$0xff]  ;;  %3572 = vmatpush.bf16.msra.mxu1 %v9297_v3 }
 0x234   : > { %v9321_v51 = vld [vmem:[#allocation8 + $0x930] sm:$0xff] }
 0x235   : > { %v9345_v3 = vld [vmem:[#allocation8 + $0x9f0] sm:$0xff] }
 0x236   : > { %3273 = vmatpush.bf16.msrb.mxu2 %v9268_v60  ;;  %3369 = vmatpush.bf16.msrb.mxu3 %v9276_v6 }
 0x237   : > { %3465 = vmatpush.bf16.msra.mxu0 %v9284_v7  ;;  %v9304_v7 = vld [vmem:[#allocation8 + $0x8a8] sm:$0xff] }
 0x23a   : > { %3274 = vmatpush.bf16.msrb.mxu2 %v9267_v8  ;;  %3370 = vmatpush.bf16.msrb.mxu3 %v9275_v39  ;;  %v9296_v8 = vld [vmem:[#allocation8 + $0x868] sm:$0xff] }
 0x23b   : > { %3466 = vmatpush.bf16.msra.mxu0 %v9283_v9  ;;  %v9312_v39 = vld [vmem:[#allocation8 + $0x8e8] sm:$0xff]  ;;  %3573 = vmatpush.bf16.msra.mxu1 %v9296_v8 }
 0x23c   : > { %2899 = vmatmul.bf16.vlgmr.msra.gmra.mxu2 %v10263_v52  ;;  %2995 = vmatmul.bf16.vlgmr.msra.gmra.mxu3 %v10263_v52  ;;  %v9320_v9 = vld [vmem:[#allocation8 + $0x928] sm:$0xff] }
 0x23d   : > { %3083 = vmatmul.bf16.vlgmr.msrb.gmra.mxu0 %v10263_v52  ;;  %3179 = vmatmul.bf16.vlgmr.msrb.gmra.mxu1 %v10263_v52 }
 0x23e   : > { %3667 = vmatpush.bf16.msra.mxu2 %v9306_v61  ;;  %3763 = vmatpush.bf16.msra.mxu3 %v9314_v12 }
 0x23f   : > { %3859 = vmatpush.bf16.msrb.mxu0 %v9322_v63 }
 0x242   : > { %3668 = vmatpush.bf16.msra.mxu2 %v9305_v2  ;;  %3764 = vmatpush.bf16.msra.mxu3 %v9313_v5  ;;  %v9353_v5 = vld [vmem:[#allocation8 + $0xa30] sm:$0xff] }
 0x243   : > { %3860 = vmatpush.bf16.msrb.mxu0 %v9321_v51 }
 0x246   : > { %3669 = vmatpush.bf16.msra.mxu2 %v9304_v7  ;;  %3765 = vmatpush.bf16.msra.mxu3 %v9312_v39  ;;  %v9328_v7 = vld [vmem:[#allocation8 + $0x968] sm:$0xff] }
 0x247   : > { %3861 = vmatpush.bf16.msrb.mxu0 %v9320_v9  ;;  %v9344_v39 = vld [vmem:[#allocation8 + $0x9e8] sm:$0xff] }
 0x248   : > { %v9352_v9 = vld [vmem:[#allocation8 + $0xa28] sm:$0xff] }
 0x24c   : > { %2904 = vmatmul.bf16.gmra.mxu2 %v9881_v38  ;;  %3000 = vmatmul.bf16.gmra.mxu3 %v9881_v38 }
 0x24d   : > { %3088 = vmatmul.bf16.gmra.mxu0 %v9881_v38  ;;  %3184 = vmatmul.bf16.gmra.mxu1 %v9881_v38 }
 0x25c   : > { %3275 = vmatmul.bf16.vlgmr.msrb.gmra.mxu2 %v10263_v52  ;;  %3371 = vmatmul.bf16.vlgmr.msrb.gmra.mxu3 %v10263_v52 }
 0x25d   : > { %3467 = vmatmul.bf16.vlgmr.msra.gmra.mxu0 %v10263_v52 }
 0x26c   : > { %3280 = vmatmul.bf16.gmra.mxu2 %v9881_v38  ;;  %3376 = vmatmul.bf16.gmra.mxu3 %v9881_v38 }
 0x26d   : > { %3472 = vmatmul.bf16.gmra.mxu0 %v9881_v38 }
 0x29a   : > { %v2708_v10 = vpop.f32.mrf.mxu0  ;;  %v2804_v11 = vpop.f32.mrf.mxu1 }
 0x29b   : > { %v2718_v27 = vrot.slane %v2708_v10, 5  ;;  %v2814_v34 = vrot.slane %v2804_v11, 6 }
 0x29f   : > { %v2516_v13 = vpop.f32.mrf.mxu2  ;;  %v2612_v14 = vpop.f32.mrf.mxu3 }
 0x2a0   : > { %v2526_v19 = vrot.slane %v2516_v13, 3  ;;  %v2622_v24 = vrot.slane %v2612_v14, 4  ;;  %v9303_v13 = vld [vmem:[#allocation8 + $0x8a0] sm:$0xff] }
 0x2a1   : > { %v9295_v14 = vld [vmem:[#allocation8 + $0x860] sm:$0xff]  ;;  %3670 = vmatpush.bf16.msra.mxu2 %v9303_v13 }
 0x2a2   : > { %v2710_v15 = vpop.f32.mrf.mxu0  ;;  %v2806_v16 = vpop.f32.mrf.mxu1  ;;  %3574 = vmatpush.bf16.msra.mxu1 %v9295_v14 }
 0x2a3   : > { %v2719_v4 = vrot.slane %v2710_v15, 5  ;;  %v2815_v54 = vrot.slane %v2806_v16, 6  ;;  %v9311_v15 = vld [vmem:[#allocation8 + $0x8e0] sm:$0xff] }
 0x2a4   : > { %v9319_v16 = vld [vmem:[#allocation8 + $0x920] sm:$0xff]  ;;  %3766 = vmatpush.bf16.msra.mxu3 %v9311_v15 }
 0x2a5   : > { %v2724_v30 = vsel %vm589_vm2, %v2718_v27, %v2719_v4  ;;  %v2820_v37 = vsel %vm686_vm3, %v2814_v34, %v2815_v54  ;;  %3862 = vmatpush.bf16.msrb.mxu0 %v9319_v16  ;;  %v9310_v4 = vld [vmem:[#allocation8 + $0x8d8] sm:$0xff]  ;;  %v9301_v54 = vld [vmem:[#allocation8 + $0x890] sm:$0xff] }
 0x2a7   : > { %v2518_v22 = vpop.f32.mrf.mxu2  ;;  %v2614_v23 = vpop.f32.mrf.mxu3 }
 0x2a8   : > { %v2527_v26 = vrot.slane %v2518_v22, 3  ;;  %v2623_v17 = vrot.slane %v2614_v23, 4  ;;  %v9302_v23 = vld [vmem:[#allocation8 + $0x898] sm:$0xff]  ;;  %3767 = vmatpush.bf16.msra.mxu3 %v9310_v4 }
 0x2a9   : > { %3671 = vmatpush.bf16.msra.mxu2 %v9302_v23  ;;  %v9335_v23 = vld [vmem:[#allocation8 + $0x9a0] sm:$0xff] }
 0x2aa   : > { %v2532_v18 = vsel %vm395_vm0, %v2526_v19, %v2527_v26  ;;  %v2628_v28 = vsel %vm492_vm1, %v2622_v24, %v2623_v17  ;;  %v2713_v29 = vpop.f32.mrf.mxu0  ;;  %v2809_v32 = vpop.f32.mrf.mxu1  ;;  %v9318_v26 = vld [vmem:[#allocation8 + $0x918] sm:$0xff] }
 0x2ab   : > { %v2631_v33 = vadd.f32 %v2628_v28, %v2532_v18  ;;  %3863 = vmatpush.bf16.msrb.mxu0 %v9318_v26  ;;  %v9293_v18 = vld [vmem:[#allocation8 + $0x850] sm:$0xff] }
 0x2ac   : > { %v9309_v28 = vld [vmem:[#allocation8 + $0x8d0] sm:$0xff] }
 0x2ad   : > { %v2727_v35 = vadd.f32 %v2724_v30, %v2631_v33  ;;  %v9317_v29 = vld [vmem:[#allocation8 + $0x910] sm:$0xff]  ;;  %3672 = vmatpush.bf16.msra.mxu2 %v9301_v54  ;;  %3768 = vmatpush.bf16.msra.mxu3 %v9309_v28  ;;  %v9292_v30 = vld [vmem:[#allocation8 + $0x848] sm:$0xff] }
 0x2af   : > { %v2521_v41 = vpop.f32.mrf.mxu2  ;;  %v2617_v42 = vpop.f32.mrf.mxu3  ;;  %v10295_v20 = vadd.f32 %v2820_v37, %v2727_v35  ;;  %3864 = vmatpush.bf16.msrb.mxu0 %v9317_v29  ;;  %v9308_v35 = vld [vmem:[#allocation8 + $0x8c8] sm:$0xff] }
 0x2b0   : > { %v9316_v42 = vld [vmem:[#allocation8 + $0x908] sm:$0xff] }
 0x2b1   : > { %3769 = vmatpush.bf16.msra.mxu3 %v9308_v35  ;;  %v9334_v35 = vld [vmem:[#allocation8 + $0x998] sm:$0xff] }
 0x2b2   : > { %v2715_v40 = vpop.f32.mrf.mxu0  ;;  %v2811_v25 = vpop.f32.mrf.mxu1 }
 0x2b3   : > { %v2721_v45 = vrot.slane %v2715_v40, 5  ;;  %v2817_v47 = vrot.slane %v2811_v25, 6  ;;  %3865 = vmatpush.bf16.msrb.mxu0 %v9316_v42 }
 0x2b5   : > { %v2725_v56 = vsel %vm589_vm2, %v2721_v45, %v2718_v27  ;;  %v2821_v57 = vsel %vm686_vm3, %v2817_v47, %v2814_v34  ;;  %v9300_v34 = vld [vmem:[#allocation8 + $0x888] sm:$0xff]  ;;  %v9307_v45 = vld [vmem:[#allocation8 + $0x8c0] sm:$0xff] }
 0x2b6   : > { %3673 = vmatpush.bf16.msra.mxu2 %v9300_v34  ;;  %3770 = vmatpush.bf16.msra.mxu3 %v9307_v45 }
 0x2b7   : > { %v2523_v43 = vpop.f32.mrf.mxu2  ;;  %v2619_v44 = vpop.f32.mrf.mxu3 }
 0x2b8   : > { %v2529_v46 = vrot.slane %v2523_v43, 3  ;;  %v2625_v21 = vrot.slane %v2619_v44, 4  ;;  %v9299_v43 = vld [vmem:[#allocation8 + $0x880] sm:$0xff] }
 0x2b9   : > { %v9291_v44 = vld [vmem:[#allocation8 + $0x840] sm:$0xff] }
 0x2ba   : > { %v2533_v49 = vsel %vm395_vm0, %v2529_v46, %v2526_v19  ;;  %v2629_v50 = vsel %vm492_vm1, %v2625_v21, %v2622_v24  ;;  %v10301_v52 = vpop.f32.mrf.mxu0  ;;  %v10303_v53 = vpop.f32.mrf.mxu1  ;;  %v9294_v24 = vld [vmem:[#allocation8 + $0x858] sm:$0xff]  ;;  %v9315_v46 = vld [vmem:[#allocation8 + $0x900] sm:$0xff]  ;;  %3674 = vmatpush.bf16.msra.mxu2 %v9299_v43 }
 0x2bb   : > { %v2630_v55 = vadd.f32 %v2629_v50, %v2533_v49  ;;  %3575 = vmatpush.bf16.msra.mxu1 %v9294_v24  ;;  %3866 = vmatpush.bf16.msrb.mxu0 %v9315_v46  ;;  %v3094_v12 = vrot.slane %v10301_v52, 1  ;;  %v9336_v52 = vld [vmem:[#allocation8 + $0x9a8] sm:$0xff]  ;;  %v3190_v8 = vrot.slane %v10303_v53, 2  ;;  %v9327_v53 = vld [vmem:[#allocation8 + $0x960] sm:$0xff]  ;;  %v9333_v46 = vld [vmem:[#allocation8 + $0x990] sm:$0xff] }
 0x2bd   : > { %v2726_v48 = vadd.f32 %v2725_v56, %v2630_v55  ;;  %v9338_v55 = vld [vmem:[#allocation8 + $0x9b8] sm:$0xff] }
 0x2be   : > { %v9330_v56 = vld [vmem:[#allocation8 + $0x978] sm:$0xff]  ;;  %4051 = vmatpush.bf16.msrb.mxu2 %v9338_v55 }
 0x2bf   : > { %v10309_v58 = vpop.f32.mrf.mxu2  ;;  %v10311_v59 = vpop.f32.mrf.mxu3  ;;  %v10313_v36 = vadd.f32 %v2821_v57, %v2726_v48  ;;  %3576 = vmatpush.bf16.msra.mxu1 %v9293_v18  ;;  %v9346_v48 = vld [vmem:[#allocation8 + $0x9f8] sm:$0xff] }
 0x2c0   : > { %v2910_v37 = vrot.slane %v10309_v58, 7  ;;  %v9354_v58 = vld [vmem:[#allocation8 + $0xa38] sm:$0xff]  ;;  %4139 = vmatpush.bf16.msrb.mxu3 %v9346_v48 }
 0x2c1   : > { %4235 = vmatpush.bf16.msra.mxu0 %v9354_v58 }
 0x2c2   : > { %v10315_v0 = vpop.f32.mrf.mxu0  ;;  %v10317_v1 = vpop.f32.mrf.mxu1  ;;  %4052 = vmatpush.bf16.msrb.mxu2 %v9337_v62 }
 0x2c3   : > { %3577 = vmatpush.bf16.msra.mxu1 %v9292_v30  ;;  %v3095_v57 = vrot.slane %v10315_v0, 1 }
 0x2c4   : > { %4140 = vmatpush.bf16.msrb.mxu3 %v9345_v3  ;;  %v9348_v3 = vld [vmem:[#allocation8 + $0xa08] sm:$0xff] }
 0x2c5   : > { %v3100_v0 = vsel %vm968_vm5, %v3094_v12, %v3095_v57  ;;  %4236 = vmatpush.bf16.msra.mxu0 %v9353_v5  ;;  %v9324_v12 = vld [vmem:[#allocation8 + $0x948] sm:$0xff] }
 0x2c6   : > { %4053 = vmatpush.bf16.msrb.mxu2 %v9336_v52  ;;  %v9331_v52 = vld [vmem:[#allocation8 + $0x980] sm:$0xff] }
 0x2c7   : > { %v10319_v60 = vpop.f32.mrf.mxu2  ;;  %v10321_v6 = vpop.f32.mrf.mxu3  ;;  %3578 = vmatpush.bf16.msra.mxu1 %v9291_v44  ;;  %v9350_v44 = vld [vmem:[#allocation8 + $0xa18] sm:$0xff] }
 0x2c8   : > { %v2911_v47 = vrot.slane %v10319_v60, 7  ;;  %4141 = vmatpush.bf16.msrb.mxu3 %v9344_v39  ;;  %v9347_v39 = vld [vmem:[#allocation8 + $0xa00] sm:$0xff] }
 0x2c9   : > { %4237 = vmatpush.bf16.msra.mxu0 %v9352_v9 }
 0x2ca   : > { %v10323_v10 = vpop.f32.mrf.mxu0  ;;  %v10325_v11 = vpop.f32.mrf.mxu1  ;;  %v2916_v63 = vsel %vm783_vm4, %v2910_v37, %v2911_v47  ;;  %4054 = vmatpush.bf16.msrb.mxu2 %v9335_v23  ;;  %v9368_v23 = vld [vmem:[#allocation8 + $0xaa8] sm:$0xff] }
 0x2cb   : > { %3955 = vmatpush.bf16.msrb.mxu1 %v9330_v56  ;;  %v2919_v51 = vadd.f32 %v2916_v63, %v10295_v20  ;;  %v9341_v56 = vld [vmem:[#allocation8 + $0x9d0] sm:$0xff] }
 0x2ce   : > { %4055 = vmatpush.bf16.msrb.mxu2 %v9334_v35  ;;  %v9371_v35 = vld [vmem:[#allocation8 + $0xac0] sm:$0xff] }
 0x2cf   : > { %v2905_v19 = vpop.f32.mrf.mxu2  ;;  %v3001_v22 = vpop.f32.mrf.mxu3 }
 0x2d0   : > { %v3007_v19 = vadd.f32 %v10321_v6, %v2919_v51  ;;  %v3192_v6 = vrot.slane %v10325_v11, 2 }
 0x2d2   : > { %v3091_v17 = vpop.f32.mrf.mxu0  ;;  %v3187_v27 = vpop.f32.mrf.mxu1  ;;  %4056 = vmatpush.bf16.msrb.mxu2 %v9333_v46 }
 0x2d3   : > { %v9343_v17 = vld [vmem:[#allocation8 + $0x9e0] sm:$0xff] }
 0x2d4   : > { %v9351_v27 = vld [vmem:[#allocation8 + $0xa20] sm:$0xff]  ;;  %4142 = vmatpush.bf16.msrb.mxu3 %v9343_v17 }
 0x2d5   : > { %4238 = vmatpush.bf16.msra.mxu0 %v9351_v27  ;;  %v9375_v17 = vld [vmem:[#allocation8 + $0xae0] sm:$0xff]  ;;  %v9366_v27 = vld [vmem:[#allocation8 + $0xa98] sm:$0xff] }
 0x2d7   : > { %v2907_v32 = vpop.f32.mrf.mxu2  ;;  %v3003_v33 = vpop.f32.mrf.mxu3 }
 0x2d8   : > { %v2913_v41 = vrot.slane %v2907_v32, 7 }
 0x2d9   : > { %4239 = vmatpush.bf16.msra.mxu0 %v9350_v44 }
 0x2da   : > { %v2917_v40 = vsel %vm783_vm4, %v2913_v41, %v2910_v37  ;;  %v10330_v25 = vpop.f32.mrf.mxu0  ;;  %v9326_v37 = vld [vmem:[#allocation8 + $0x958] sm:$0xff] }
 0x2db   : > { %v2918_v21 = vadd.f32 %v2917_v40, %v10313_v36  ;;  %v9329_v36 = vld [vmem:[#allocation8 + $0x970] sm:$0xff]  ;;  %v9342_v41 = vld [vmem:[#allocation8 + $0x9d8] sm:$0xff]  ;;  %v3478_v42 = vrot.slane %v10330_v25, 5 }
 0x2dc   : > { %3956 = vmatpush.bf16.msrb.mxu1 %v9329_v36  ;;  %4143 = vmatpush.bf16.msrb.mxu3 %v9342_v41  ;;  %v9349_v25 = vld [vmem:[#allocation8 + $0xa10] sm:$0xff]  ;;  %v9332_v36 = vld [vmem:[#allocation8 + $0x988] sm:$0xff] }
 0x2dd   : > { %v3006_v61 = vadd.f32 %v10311_v59, %v2918_v21  ;;  %v3191_v59 = vrot.slane %v10317_v1, 2  ;;  %v3096_v1 = vrot.slane %v10323_v10, 1  ;;  %v9325_v21 = vld [vmem:[#allocation8 + $0x950] sm:$0xff]  ;;  %4240 = vmatpush.bf16.msra.mxu0 %v9349_v25  ;;  %4057 = vmatpush.bf16.msrb.mxu2 %v9332_v36 }
 0x2df   : > { %v3276_v49 = vpop.f32.mrf.mxu2  ;;  %v3372_v50 = vpop.f32.mrf.mxu3  ;;  %v3102_v60 = vadd.f32 %v3100_v0, %v3006_v61  ;;  %v3196_v15 = vsel %vm1065_vm6, %v3190_v8, %v3191_v59  ;;  %v3099_v10 = vsel %vm968_vm5, %v3095_v57, %v3096_v1  ;;  %v3195_v11 = vsel %vm1065_vm6, %v3191_v59, %v3192_v6  ;;  %v9653_v57 = vld [vmem:[#allocation10 + $0x2] ss:$0 sm:$0xff]  ;;  %v9362_v1 = vld [vmem:[#allocation8 + $0xa78] sm:$0xff]  ;;  %v9365_v6 = vld [vmem:[#allocation8 + $0xa90] sm:$0xff] }
 0x2e0   : > { %v3286_v16 = vrot.slane %v3276_v49, 3  ;;  %3957 = vmatpush.bf16.msrb.mxu1 %v9328_v7  ;;  %v3382_v18 = vrot.slane %v3372_v50, 4  ;;  %v3103_v28 = vadd.f32 %v3099_v10, %v3007_v19  ;;  %4144 = vmatpush.bf16.msrb.mxu3 %v9341_v56  ;;  %v9323_v7 = vld [vmem:[#allocation8 + $0x940] sm:$0xff]  ;;  %v9361_v19 = vld [vmem:[#allocation8 + $0xa70] sm:$0xff]  ;;  %v9374_v10 = vld [vmem:[#allocation8 + $0xad8] sm:$0xff] }
 0x2e1   : > { %v3198_v22 = vadd.f32 %v3196_v15, %v3102_v60  ;;  %4241 = vmatpush.bf16.msra.mxu0 %v9348_v3  ;;  %v9339_v8 = vld [vmem:[#allocation8 + $0x9c0] sm:$0xff]  ;;  %4058 = vmatpush.bf16.msrb.mxu2 %v9331_v52  ;;  %v9370_v15 = vld [vmem:[#allocation8 + $0xab8] sm:$0xff] }
 0x2e2   : > { %v10339_v2 = vpop.f32.mrf.mxu0  ;;  %v3199_v45 = vadd.f32 %v3195_v11, %v3103_v28  ;;  %v9373_v28 = vld [vmem:[#allocation8 + $0xad0] sm:$0xff] }
 0x2e3   : > { %v3479_v29 = vrot.slane %v10339_v2, 5  ;;  %v9340_v2 = vld [vmem:[#allocation8 + $0x9c8] sm:$0xff] }
 0x2e4   : > { %3958 = vmatpush.bf16.msrb.mxu1 %v9327_v53  ;;  %4145 = vmatpush.bf16.msrb.mxu3 %v9340_v2  ;;  %v9360_v53 = vld [vmem:[#allocation8 + $0xa68] sm:$0xff] }
 0x2e5   : > { %v3484_v47 = vsel %vm589_vm2, %v3478_v42, %v3479_v29  ;;  %4242 = vmatpush.bf16.msra.mxu0 %v9347_v39 }
 0x2e7   : > { %v3278_v13 = vpop.f32.mrf.mxu2  ;;  %v3374_v14 = vpop.f32.mrf.mxu3 }
 0x2e8   : > { %v3287_v20 = vrot.slane %v3278_v13, 3  ;;  %v3383_v4 = vrot.slane %v3374_v14, 4  ;;  %3959 = vmatpush.bf16.msrb.mxu1 %v9326_v37  ;;  %4146 = vmatpush.bf16.msrb.mxu3 %v9339_v8 }
 0x2ea   : > { %v3292_v24 = vsel %vm395_vm0, %v3286_v16, %v3287_v20  ;;  %v3473_v26 = vpop.f32.mrf.mxu0  ;;  %v3388_v32 = vsel %vm492_vm1, %v3382_v18, %v3383_v4  ;;  %v9378_v16 = vld [vmem:[#allocation8 + $0xaf8] sm:$0xff]  ;;  %v9357_v18 = vld [vmem:[#allocation8 + $0xa50] sm:$0xff] }
 0x2eb   : > { %v3294_v54 = vadd.f32 %v3292_v24, %v3198_v22  ;;  %v3480_v49 = vrot.slane %v3473_v26, 5  ;;  %v9377_v22 = vld [vmem:[#allocation8 + $0xaf0] sm:$0xff]  ;;  %v9376_v24 = vld [vmem:[#allocation8 + $0xae8] sm:$0xff]  ;;  %v9359_v26 = vld [vmem:[#allocation8 + $0xa60] sm:$0xff] }
 0x2ec   : > { %3960 = vmatpush.bf16.msrb.mxu1 %v9325_v21 }
 0x2ed   : > { %v3390_v33 = vadd.f32 %v3388_v32, %v3294_v54  ;;  %v3483_v63 = vsel %vm589_vm2, %v3479_v29, %v3480_v49  ;;  %v9358_v54 = vld [vmem:[#allocation8 + $0xa58] sm:$0xff]  ;;  %v9364_v29 = vld [vmem:[#allocation8 + $0xa88] sm:$0xff] }
 0x2ee   : > { %v9356_v32 = vld [vmem:[#allocation8 + $0xa48] sm:$0xff] }
 0x2ef   : > { %v3281_v34 = vpop.f32.mrf.mxu2  ;;  %v3377_v30 = vpop.f32.mrf.mxu3  ;;  %v3486_v48 = vadd.f32 %v3484_v47, %v3390_v33  ;;  %v9372_v33 = vld [vmem:[#allocation8 + $0xac8] sm:$0xff] }
 0x2f0   : > { %v3288_v40 = vrot.slane %v3281_v34, 3  ;;  %v3384_v43 = vrot.slane %v3377_v30, 4  ;;  %3961 = vmatpush.bf16.msrb.mxu1 %v9324_v12  ;;  %v9363_v34 = vld [vmem:[#allocation8 + $0xa80] sm:$0xff] }
 0x2f1   : > { %v3492_v5 = vadd.f32 %v9653_v57, %v3486_v48  ;;  %v9355_v30 = vld [vmem:[#allocation8 + $0xa40] sm:$0xff] }
 0x2f2   : > { %v3291_v50 = vsel %vm395_vm0, %v3287_v20, %v3288_v40  ;;  %v3475_v55 = vpop.f32.mrf.mxu0  ;;  %v3387_v61 = vsel %vm492_vm1, %v3383_v4, %v3384_v43  ;;  %v9369_v20 = vld [vmem:[#allocation8 + $0xab0] sm:$0xff]  ;;  %v9367_v4 = vld [vmem:[#allocation8 + $0xaa0] sm:$0xff] }
 0x2f3   : > { %v3295_v58 = vadd.f32 %v3291_v50, %v3199_v45  ;;  %v3496_v9 = vmax.f32 %v3492_v5, 0.0 }
 0x2f4   : > { %3962 = vmatpush.bf16.msrb.mxu1 %v9323_v7 }
 0x2f5   : > { %v3391_v62 = vadd.f32 %v3387_v61, %v3295_v58 }
 0x2f7   : > { %v3487_v0 = vadd.f32 %v3483_v63, %v3391_v62  ;;  %v3283_v59 = vpop.f32.mrf.mxu2  ;;  %v3379_v51 = vpop.f32.mrf.mxu3 }
 0x2f9   : > { %v3493_v60 = vadd.f32 %v9653_v57, %v3487_v0 }
 0x2fb   : > { %v3497_v13 = vmax.f32 %v3493_v60, 0.0 }
 0x2fd   : > { %v10369_v14 = vpack.c.bf16 %v3497_v13, %v3496_v9 }
 0x2ff   : > { %3579 = vmatmul.bf16.vlgmr.msra.gmra.mxu1 %v10369_v14  ;;  %3675 = vmatmul.bf16.vlgmr.msra.gmra.mxu2 %v10369_v14 }
 0x300   : > { %3771 = vmatmul.bf16.vlgmr.msra.gmra.mxu3 %v10369_v14  ;;  %3867 = vmatmul.bf16.vlgmr.msrb.gmra.mxu0 %v10369_v14 }
 0x301   : > { %4427 = vmatpush.bf16.msra.mxu2 %v9370_v15  ;;  %4331 = vmatpush.bf16.msra.mxu1 %v9362_v1  ;;  %v9402_v1 = vld [vmem:[#allocation8 + $0xbb8] sm:$0xff] }
 0x302   : > { %4523 = vmatpush.bf16.msra.mxu3 %v9378_v16  ;;  %v9386_v16 = vld [vmem:[#allocation8 + $0xb38] sm:$0xff] }
 0x303   : > { %4635 = vmatpush.bf16.msrb.mxu0 %v9386_v16 }
 0x305   : > { %4428 = vmatpush.bf16.msra.mxu2 %v9369_v20  ;;  %4332 = vmatpush.bf16.msra.mxu1 %v9361_v19  ;;  %v9394_v20 = vld [vmem:[#allocation8 + $0xb78] sm:$0xff] }
 0x306   : > { %4524 = vmatpush.bf16.msra.mxu3 %v9377_v22  ;;  %v9410_v22 = vld [vmem:[#allocation8 + $0xbf8] sm:$0xff] }
 0x309   : > { %4429 = vmatpush.bf16.msra.mxu2 %v9368_v23  ;;  %4333 = vmatpush.bf16.msra.mxu1 %v9360_v53 }
 0x30a   : > { %4525 = vmatpush.bf16.msra.mxu3 %v9376_v24 }
 0x30d   : > { %4430 = vmatpush.bf16.msra.mxu2 %v9367_v4  ;;  %4334 = vmatpush.bf16.msra.mxu1 %v9359_v26 }
 0x30e   : > { %4526 = vmatpush.bf16.msra.mxu3 %v9375_v17 }
 0x30f   : > { %3584 = vmatmul.bf16.gmra.mxu1 %v9881_v38  ;;  %3680 = vmatmul.bf16.gmra.mxu2 %v9881_v38 }
 0x310   : > { %3776 = vmatmul.bf16.gmra.mxu3 %v9881_v38  ;;  %3872 = vmatmul.bf16.gmra.mxu0 %v9881_v38 }
 0x311   : > { %4431 = vmatpush.bf16.msra.mxu2 %v9366_v27  ;;  %4335 = vmatpush.bf16.msra.mxu1 %v9358_v54  ;;  %v9401_v54 = vld [vmem:[#allocation8 + $0xbb0] sm:$0xff] }
 0x312   : > { %4527 = vmatpush.bf16.msra.mxu3 %v9374_v10  ;;  %v9385_v10 = vld [vmem:[#allocation8 + $0xb30] sm:$0xff] }
 0x313   : > { %4636 = vmatpush.bf16.msrb.mxu0 %v9385_v10 }
 0x315   : > { %4432 = vmatpush.bf16.msra.mxu2 %v9365_v6  ;;  %4336 = vmatpush.bf16.msra.mxu1 %v9357_v18  ;;  %v9393_v6 = vld [vmem:[#allocation8 + $0xb70] sm:$0xff] }
 0x316   : > { %4528 = vmatpush.bf16.msra.mxu3 %v9373_v28  ;;  %v9409_v28 = vld [vmem:[#allocation8 + $0xbf0] sm:$0xff] }
 0x319   : > { %4433 = vmatpush.bf16.msra.mxu2 %v9364_v29  ;;  %4337 = vmatpush.bf16.msra.mxu1 %v9356_v32  ;;  %v9400_v29 = vld [vmem:[#allocation8 + $0xba8] sm:$0xff] }
 0x31a   : > { %4529 = vmatpush.bf16.msra.mxu3 %v9372_v33  ;;  %v9384_v32 = vld [vmem:[#allocation8 + $0xb28] sm:$0xff] }
 0x31b   : > { %v9392_v33 = vld [vmem:[#allocation8 + $0xb68] sm:$0xff]  ;;  %4637 = vmatpush.bf16.msrb.mxu0 %v9384_v32 }
 0x31d   : > { %4434 = vmatpush.bf16.msra.mxu2 %v9363_v34  ;;  %4338 = vmatpush.bf16.msra.mxu1 %v9355_v30  ;;  %v9408_v34 = vld [vmem:[#allocation8 + $0xbe8] sm:$0xff] }
 0x31e   : > { %4530 = vmatpush.bf16.msra.mxu3 %v9371_v35 }
 0x31f   : > { %3963 = vmatmul.bf16.vlgmr.msrb.gmra.mxu1 %v10369_v14  ;;  %4059 = vmatmul.bf16.vlgmr.msrb.gmra.mxu2 %v10369_v14 }
 0x320   : > { %4147 = vmatmul.bf16.vlgmr.msrb.gmra.mxu3 %v10369_v14  ;;  %4243 = vmatmul.bf16.vlgmr.msra.gmra.mxu0 %v10369_v14 }
 0x321   : > { %4827 = vmatpush.bf16.msrb.mxu2 %v9402_v1  ;;  %4731 = vmatpush.bf16.msrb.mxu1 %v9394_v20  ;;  %v9442_v1 = vld [vmem:[#allocation8 + $0xcf8] sm:$0xff]  ;;  %v9433_v20 = vld [vmem:[#allocation8 + $0xcb0] sm:$0xff] }
 0x322   : > { %4923 = vmatpush.bf16.msrb.mxu3 %v9410_v22 }
 0x325   : > { %4828 = vmatpush.bf16.msrb.mxu2 %v9401_v54  ;;  %4732 = vmatpush.bf16.msrb.mxu1 %v9393_v6 }
 0x326   : > { %4924 = vmatpush.bf16.msrb.mxu3 %v9409_v28  ;;  %v9432_v28 = vld [vmem:[#allocation8 + $0xca8] sm:$0xff] }
 0x329   : > { %4829 = vmatpush.bf16.msrb.mxu2 %v9400_v29  ;;  %4733 = vmatpush.bf16.msrb.mxu1 %v9392_v33  ;;  %v9416_v29 = vld [vmem:[#allocation8 + $0xc28] sm:$0xff] }
 0x32a   : > { %4925 = vmatpush.bf16.msrb.mxu3 %v9408_v34 }
 0x32f   : > { %3968 = vmatmul.bf16.gmra.mxu1 %v9881_v38  ;;  %4064 = vmatmul.bf16.gmra.mxu2 %v9881_v38 }
 0x330   : > { %4152 = vmatmul.bf16.gmra.mxu3 %v9881_v38  ;;  %4248 = vmatmul.bf16.gmra.mxu0 %v9881_v38 }
 0x33f   : > { %4339 = vmatmul.bf16.vlgmr.msra.gmra.mxu1 %v10369_v14  ;;  %4435 = vmatmul.bf16.vlgmr.msra.gmra.mxu2 %v10369_v14 }
 0x340   : > { %4531 = vmatmul.bf16.vlgmr.msra.gmra.mxu3 %v10369_v14 }
 0x34f   : > { %4344 = vmatmul.bf16.gmra.mxu1 %v9881_v38  ;;  %4440 = vmatmul.bf16.gmra.mxu2 %v9881_v38 }
 0x350   : > { %4536 = vmatmul.bf16.gmra.mxu3 %v9881_v38 }
 0x37c   : > { %v3580_v37 = vpop.f32.mrf.mxu1 }
 0x37d   : > { %v3868_v41 = vpop.f32.mrf.mxu0  ;;  %v3590_v46 = vrot.slane %v3580_v37, 3 }
 0x37e   : > { %v3878_v62 = vrot.slane %v3868_v41, 6  ;;  %v9399_v41 = vld [vmem:[#allocation8 + $0xba0] sm:$0xff] }
 0x37f   : > { %4830 = vmatpush.bf16.msrb.mxu2 %v9399_v41 }
 0x382   : > { %v3676_v11 = vpop.f32.mrf.mxu2 }
 0x383   : > { %v3772_v42 = vpop.f32.mrf.mxu3  ;;  %v3686_v21 = vrot.slane %v3676_v11, 4  ;;  %v9383_v11 = vld [vmem:[#allocation8 + $0xb20] sm:$0xff] }
 0x384   : > { %v3582_v40 = vpop.f32.mrf.mxu1  ;;  %v3782_v56 = vrot.slane %v3772_v42, 5  ;;  %v9391_v42 = vld [vmem:[#allocation8 + $0xb60] sm:$0xff]  ;;  %4638 = vmatpush.bf16.msrb.mxu0 %v9383_v11 }
 0x385   : > { %v3870_v43 = vpop.f32.mrf.mxu0  ;;  %v3591_v44 = vrot.slane %v3582_v40, 3  ;;  %4734 = vmatpush.bf16.msrb.mxu1 %v9391_v42 }
 0x386   : > { %v3879_v48 = vrot.slane %v3870_v43, 6  ;;  %v9407_v43 = vld [vmem:[#allocation8 + $0xbe0] sm:$0xff] }
 0x387   : > { %v3596_v25 = vsel %vm395_vm0, %v3590_v46, %v3591_v44  ;;  %4926 = vmatpush.bf16.msrb.mxu3 %v9407_v43  ;;  %v9398_v44 = vld [vmem:[#allocation8 + $0xb98] sm:$0xff]  ;;  %v9431_v43 = vld [vmem:[#allocation8 + $0xca0] sm:$0xff] }
 0x388   : > { %v3884_v63 = vsel %vm686_vm3, %v3878_v62, %v3879_v48  ;;  %4831 = vmatpush.bf16.msrb.mxu2 %v9398_v44  ;;  %v9415_v44 = vld [vmem:[#allocation8 + $0xc20] sm:$0xff] }
 0x38a   : > { %v3678_v45 = vpop.f32.mrf.mxu2 }
 0x38b   : > { %v3687_v47 = vrot.slane %v3678_v45, 4  ;;  %v3774_v49 = vpop.f32.mrf.mxu3  ;;  %v9382_v45 = vld [vmem:[#allocation8 + $0xb18] sm:$0xff] }
 0x38c   : > { %v3783_v50 = vrot.slane %v3774_v49, 5  ;;  %v3585_v55 = vpop.f32.mrf.mxu1  ;;  %4639 = vmatpush.bf16.msrb.mxu0 %v9382_v45 }
 0x38d   : > { %v3692_v57 = vsel %vm492_vm1, %v3686_v21, %v3687_v47  ;;  %v3873_v58 = vpop.f32.mrf.mxu0  ;;  %v9397_v55 = vld [vmem:[#allocation8 + $0xb90] sm:$0xff] }
 0x38e   : > { %v3695_v61 = vadd.f32 %v3692_v57, %v3596_v25  ;;  %v3788_v36 = vsel %vm589_vm2, %v3782_v56, %v3783_v50  ;;  %v9389_v25 = vld [vmem:[#allocation8 + $0xb50] sm:$0xff]  ;;  %4832 = vmatpush.bf16.msrb.mxu2 %v9397_v55  ;;  %v9396_v58 = vld [vmem:[#allocation8 + $0xb88] sm:$0xff] }
 0x38f   : > { %v9405_v57 = vld [vmem:[#allocation8 + $0xbd0] sm:$0xff] }
 0x390   : > { %v3791_v12 = vadd.f32 %v3788_v36, %v3695_v61  ;;  %v9380_v61 = vld [vmem:[#allocation8 + $0xb08] sm:$0xff] }
 0x392   : > { %v3681_v2 = vpop.f32.mrf.mxu2  ;;  %v10401_v3 = vadd.f32 %v3884_v63, %v3791_v12  ;;  %v9404_v12 = vld [vmem:[#allocation8 + $0xbc8] sm:$0xff]  ;;  %4833 = vmatpush.bf16.msrb.mxu2 %v9396_v58 }
 0x393   : > { %v3777_v5 = vpop.f32.mrf.mxu3 }
 0x394   : > { %v3587_v0 = vpop.f32.mrf.mxu1 }
 0x395   : > { %v3875_v59 = vpop.f32.mrf.mxu0  ;;  %v3593_v51 = vrot.slane %v3587_v0, 3 }
 0x396   : > { %v3881_v13 = vrot.slane %v3875_v59, 6  ;;  %v9395_v59 = vld [vmem:[#allocation8 + $0xb80] sm:$0xff] }
 0x397   : > { %v3597_v9 = vsel %vm395_vm0, %v3593_v51, %v3590_v46  ;;  %v9390_v46 = vld [vmem:[#allocation8 + $0xb58] sm:$0xff]  ;;  %v9379_v51 = vld [vmem:[#allocation8 + $0xb00] sm:$0xff]  ;;  %4834 = vmatpush.bf16.msrb.mxu2 %v9395_v59 }
 0x398   : > { %v3885_v24 = vsel %vm686_vm3, %v3881_v13, %v3878_v62  ;;  %4735 = vmatpush.bf16.msrb.mxu1 %v9390_v46  ;;  %v9388_v62 = vld [vmem:[#allocation8 + $0xb48] sm:$0xff]  ;;  %v9418_v13 = vld [vmem:[#allocation8 + $0xc38] sm:$0xff] }
 0x39a   : > { %v3683_v60 = vpop.f32.mrf.mxu2 }
 0x39b   : > { %v3689_v52 = vrot.slane %v3683_v60, 4  ;;  %v3779_v7 = vpop.f32.mrf.mxu3  ;;  %v9387_v60 = vld [vmem:[#allocation8 + $0xb40] sm:$0xff] }
 0x39c   : > { %v3785_v8 = vrot.slane %v3779_v7, 5  ;;  %v10403_v39 = vpop.f32.mrf.mxu1  ;;  %4736 = vmatpush.bf16.msrb.mxu1 %v9389_v25  ;;  %v9403_v7 = vld [vmem:[#allocation8 + $0xbc0] sm:$0xff] }
 0x39d   : > { %v3693_v14 = vsel %vm492_vm1, %v3689_v52, %v3686_v21  ;;  %v10409_v15 = vpop.f32.mrf.mxu0  ;;  %v9406_v21 = vld [vmem:[#allocation8 + $0xbd8] sm:$0xff]  ;;  %v3974_v2 = vrot.slane %v10403_v39, 7 }
 0x39e   : > { %v3694_v19 = vadd.f32 %v3693_v14, %v3597_v9  ;;  %v3789_v23 = vsel %vm589_vm2, %v3785_v8, %v3782_v56  ;;  %4927 = vmatpush.bf16.msrb.mxu3 %v9406_v21  ;;  %v9381_v56 = vld [vmem:[#allocation8 + $0xb10] sm:$0xff]  ;;  %v9434_v9 = vld [vmem:[#allocation8 + $0xcb8] sm:$0xff] }
 0x39f   : > { %4640 = vmatpush.bf16.msrb.mxu0 %v9381_v56  ;;  %v9426_v39 = vld [vmem:[#allocation8 + $0xc78] sm:$0xff]  ;;  %5203 = vmatpush.bf16.msra.mxu2 %v9434_v9 }
 0x3a0   : > { %v3790_v53 = vadd.f32 %v3789_v23, %v3694_v19  ;;  %4737 = vmatpush.bf16.msrb.mxu1 %v9388_v62  ;;  %v9417_v19 = vld [vmem:[#allocation8 + $0xc30] sm:$0xff] }
 0x3a2   : > { %v10415_v4 = vpop.f32.mrf.mxu2  ;;  %v10417_v26 = vadd.f32 %v3885_v24, %v3790_v53  ;;  %4928 = vmatpush.bf16.msrb.mxu3 %v9405_v57  ;;  %v9425_v53 = vld [vmem:[#allocation8 + $0xc70] sm:$0xff] }
 0x3a3   : > { %v10419_v17 = vpop.f32.mrf.mxu3  ;;  %4641 = vmatpush.bf16.msrb.mxu0 %v9380_v61  ;;  %v9441_v24 = vld [vmem:[#allocation8 + $0xcf0] sm:$0xff]  ;;  %5204 = vmatpush.bf16.msra.mxu2 %v9433_v20 }
 0x3a4   : > { %v10421_v27 = vpop.f32.mrf.mxu1  ;;  %4738 = vmatpush.bf16.msrb.mxu1 %v9387_v60  ;;  %v4158_v10 = vrot.slane %v10419_v17, 1  ;;  %v4254_v17 = vrot.slane %v10409_v15, 2  ;;  %v9429_v60 = vld [vmem:[#allocation8 + $0xc90] sm:$0xff] }
 0x3a5   : > { %v10423_v18 = vpop.f32.mrf.mxu0  ;;  %v3975_v14 = vrot.slane %v10421_v27, 7 }
 0x3a6   : > { %4929 = vmatpush.bf16.msrb.mxu3 %v9404_v12  ;;  %v4255_v6 = vrot.slane %v10423_v18, 2  ;;  %v9430_v12 = vld [vmem:[#allocation8 + $0xc98] sm:$0xff] }
 0x3a7   : > { %4642 = vmatpush.bf16.msrb.mxu0 %v9379_v51  ;;  %v3980_v27 = vsel %vm783_vm4, %v3974_v2, %v3975_v14  ;;  %5205 = vmatpush.bf16.msra.mxu2 %v9432_v28 }
 0x3a8   : > { %5115 = vmatpush.bf16.msra.mxu1 %v9426_v39  ;;  %v4260_v11 = vsel %vm1065_vm6, %v4254_v17, %v4255_v6  ;;  %v9437_v39 = vld [vmem:[#allocation8 + $0xcd0] sm:$0xff] }
 0x3aa   : > { %v10425_v30 = vpop.f32.mrf.mxu2  ;;  %4930 = vmatpush.bf16.msrb.mxu3 %v9403_v7 }
 0x3ab   : > { %v10427_v35 = vpop.f32.mrf.mxu3  ;;  %5019 = vmatpush.bf16.msra.mxu0 %v9418_v13  ;;  %5206 = vmatpush.bf16.msra.mxu2 %v9431_v43  ;;  %v9421_v13 = vld [vmem:[#allocation8 + $0xc50] sm:$0xff] }
 0x3ac   : > { %v3969_v37 = vpop.f32.mrf.mxu1  ;;  %v4159_v22 = vrot.slane %v10427_v35, 1  ;;  %5116 = vmatpush.bf16.msra.mxu1 %v9425_v53  ;;  %v9440_v35 = vld [vmem:[#allocation8 + $0xce8] sm:$0xff]  ;;  %v9465_v43 = vld [vmem:[#allocation8 + $0xdb0] sm:$0xff] }
 0x3ad   : > { %v10429_v40 = vpop.f32.mrf.mxu0  ;;  %v3983_v37 = vadd.f32 %v3980_v27, %v10401_v3  ;;  %v9423_v3 = vld [vmem:[#allocation8 + $0xc60] sm:$0xff]  ;;  %v9428_v53 = vld [vmem:[#allocation8 + $0xc88] sm:$0xff] }
 0x3ae   : > { %5299 = vmatpush.bf16.msra.mxu3 %v9442_v1  ;;  %v4164_v32 = vsel %vm968_vm5, %v4158_v10, %v4159_v22  ;;  %v4256_v25 = vrot.slane %v10429_v40, 2  ;;  %v9654_v1 = vld [vmem:[#allocation10 + $0x3] ss:$0 sm:$0xff]  ;;  %v9436_v10 = vld [vmem:[#allocation8 + $0xcc8] sm:$0xff] }
 0x3af   : > { %5020 = vmatpush.bf16.msra.mxu0 %v9417_v19  ;;  %5207 = vmatpush.bf16.msra.mxu2 %v9430_v12  ;;  %v9443_v12 = vld [vmem:[#allocation8 + $0xd00] sm:$0xff] }
 0x3b2   : > { %v4065_v47 = vpop.f32.mrf.mxu2  ;;  %5300 = vmatpush.bf16.msra.mxu3 %v9441_v24  ;;  %v9412_v24 = vld [vmem:[#allocation8 + $0xc08] sm:$0xff] }
 0x3b3   : > { %v10431_v49 = vpop.f32.mrf.mxu3  ;;  %5021 = vmatpush.bf16.msra.mxu0 %v9416_v29  ;;  %5208 = vmatpush.bf16.msra.mxu2 %v9429_v60 }
 0x3b4   : > { %v3971_v50 = vpop.f32.mrf.mxu1  ;;  %v4160_v33 = vrot.slane %v10431_v49, 1  ;;  %v9439_v49 = vld [vmem:[#allocation8 + $0xce0] sm:$0xff] }
 0x3b5   : > { %v4251_v48 = vpop.f32.mrf.mxu0  ;;  %v3977_v36 = vrot.slane %v3971_v50, 7  ;;  %v4071_v50 = vadd.f32 %v10425_v30, %v3983_v37  ;;  %v4259_v30 = vsel %vm1065_vm6, %v4255_v6, %v4256_v25  ;;  %v9461_v25 = vld [vmem:[#allocation8 + $0xd90] sm:$0xff] }
 0x3b6   : > { %v4163_v45 = vsel %vm968_vm5, %v4159_v22, %v4160_v33  ;;  %5301 = vmatpush.bf16.msra.mxu3 %v9440_v35  ;;  %v9411_v33 = vld [vmem:[#allocation8 + $0xc00] sm:$0xff] }
 0x3b7   : > { %v3981_v52 = vsel %vm783_vm4, %v3977_v36, %v3974_v2  ;;  %v4167_v58 = vadd.f32 %v4163_v45, %v4071_v50  ;;  %5022 = vmatpush.bf16.msra.mxu0 %v9415_v44  ;;  %v9422_v2 = vld [vmem:[#allocation8 + $0xc58] sm:$0xff]  ;;  %5209 = vmatpush.bf16.msra.mxu2 %v9428_v53  ;;  %v9435_v35 = vld [vmem:[#allocation8 + $0xcc0] sm:$0xff]  ;;  %v9449_v44 = vld [vmem:[#allocation8 + $0xd30] sm:$0xff] }
 0x3b8   : > { %v3982_v8 = vadd.f32 %v3981_v52, %v10417_v26  ;;  %v9413_v52 = vld [vmem:[#allocation8 + $0xc10] sm:$0xff]  ;;  %v9462_v50 = vld [vmem:[#allocation8 + $0xd98] sm:$0xff] }
 0x3b9   : > { %v4263_v59 = vadd.f32 %v4259_v30, %v4167_v58  ;;  %v9457_v45 = vld [vmem:[#allocation8 + $0xd70] sm:$0xff]  ;;  %v9460_v58 = vld [vmem:[#allocation8 + $0xd88] sm:$0xff] }
 0x3ba   : > { %v4067_v63 = vpop.f32.mrf.mxu2  ;;  %v4070_v26 = vadd.f32 %v10415_v4, %v3982_v8  ;;  %v9424_v4 = vld [vmem:[#allocation8 + $0xc68] sm:$0xff]  ;;  %5302 = vmatpush.bf16.msra.mxu3 %v9439_v49  ;;  %v9455_v49 = vld [vmem:[#allocation8 + $0xd60] sm:$0xff] }
 0x3bb   : > { %v4155_v5 = vpop.f32.mrf.mxu3  ;;  %5117 = vmatpush.bf16.msra.mxu1 %v9424_v4  ;;  %v9414_v63 = vld [vmem:[#allocation8 + $0xc18] sm:$0xff]  ;;  %v9419_v4 = vld [vmem:[#allocation8 + $0xc40] sm:$0xff] }
 0x3bc   : > { %v4340_v0 = vpop.f32.mrf.mxu1  ;;  %v4166_v41 = vadd.f32 %v4164_v32, %v4070_v26  ;;  %5023 = vmatpush.bf16.msra.mxu0 %v9414_v63  ;;  %v9427_v32 = vld [vmem:[#allocation8 + $0xc80] sm:$0xff] }
 0x3bd   : > { %v4350_v18 = vrot.slane %v4340_v0, 3  ;;  %v9438_v0 = vld [vmem:[#allocation8 + $0xcd8] sm:$0xff]  ;;  %5210 = vmatpush.bf16.msra.mxu2 %v9427_v32  ;;  %v9451_v63 = vld [vmem:[#allocation8 + $0xd40] sm:$0xff] }
 0x3be   : > { %v4262_v55 = vadd.f32 %v4260_v11, %v4166_v41  ;;  %5303 = vmatpush.bf16.msra.mxu3 %v9438_v0  ;;  %v9450_v11 = vld [vmem:[#allocation8 + $0xd38] sm:$0xff] }
 0x3bf   : > { %5118 = vmatpush.bf16.msra.mxu1 %v9423_v3  ;;  %v9447_v3 = vld [vmem:[#allocation8 + $0xd20] sm:$0xff] }
 0x3c0   : > { %5024 = vmatpush.bf16.msra.mxu0 %v9413_v52 }
 0x3c2   : > { %v4436_v16 = vpop.f32.mrf.mxu2  ;;  %5304 = vmatpush.bf16.msra.mxu3 %v9437_v39 }
 0x3c3   : > { %v10439_v23 = vpop.f32.mrf.mxu3  ;;  %v4446_v46 = vrot.slane %v4436_v16, 4  ;;  %5119 = vmatpush.bf16.msra.mxu1 %v9422_v2 }
 0x3c4   : > { %v4342_v54 = vpop.f32.mrf.mxu1  ;;  %v4542_v40 = vrot.slane %v10439_v23, 5  ;;  %5025 = vmatpush.bf16.msra.mxu0 %v9412_v24 }
 0x3c5   : > { %v4351_v34 = vrot.slane %v4342_v54, 3  ;;  %v9420_v54 = vld [vmem:[#allocation8 + $0xc48] sm:$0xff] }
 0x3c6   : > { %5305 = vmatpush.bf16.msra.mxu3 %v9436_v10 }
 0x3c7   : > { %v4356_v21 = vsel %vm395_vm0, %v4350_v18, %v4351_v34  ;;  %5120 = vmatpush.bf16.msra.mxu1 %v9421_v13  ;;  %v9466_v18 = vld [vmem:[#allocation8 + $0xdb8] sm:$0xff] }
 0x3c8   : > { %v4358_v61 = vadd.f32 %v4356_v21, %v4262_v55  ;;  %5026 = vmatpush.bf16.msra.mxu0 %v9411_v33  ;;  %v9448_v21 = vld [vmem:[#allocation8 + $0xd28] sm:$0xff]  ;;  %v9446_v55 = vld [vmem:[#allocation8 + $0xd18] sm:$0xff] }
 0x3ca   : > { %v4438_v42 = vpop.f32.mrf.mxu2  ;;  %5306 = vmatpush.bf16.msra.mxu3 %v9435_v35 }
 0x3cb   : > { %v4447_v15 = vrot.slane %v4438_v42, 4  ;;  %v4534_v47 = vpop.f32.mrf.mxu3  ;;  %5121 = vmatpush.bf16.msra.mxu1 %v9420_v54  ;;  %v9458_v42 = vld [vmem:[#allocation8 + $0xd78] sm:$0xff] }
 0x3cc   : > { %v4345_v56 = vpop.f32.mrf.mxu1  ;;  %v4543_v62 = vrot.slane %v4534_v47, 5  ;;  %v9463_v47 = vld [vmem:[#allocation8 + $0xda0] sm:$0xff] }
 0x3cd   : > { %v4452_v48 = vsel %vm492_vm1, %v4446_v46, %v4447_v15  ;;  %v4352_v57 = vrot.slane %v4345_v56, 3  ;;  %v9464_v46 = vld [vmem:[#allocation8 + $0xda8] sm:$0xff]  ;;  %v9454_v56 = vld [vmem:[#allocation8 + $0xd58] sm:$0xff] }
 0x3ce   : > { %v4454_v36 = vadd.f32 %v4452_v48, %v4358_v61  ;;  %v4548_v7 = vsel %vm589_vm2, %v4542_v40, %v4543_v62  ;;  %v9445_v48 = vld [vmem:[#allocation8 + $0xd10] sm:$0xff]  ;;  %v9444_v61 = vld [vmem:[#allocation8 + $0xd08] sm:$0xff] }
 0x3cf   : > { %v4355_v5 = vsel %vm395_vm0, %v4351_v34, %v4352_v57  ;;  %5122 = vmatpush.bf16.msra.mxu1 %v9419_v4  ;;  %v9453_v57 = vld [vmem:[#allocation8 + $0xd50] sm:$0xff] }
 0x3d0   : > { %v4550_v14 = vadd.f32 %v4548_v7, %v4454_v36  ;;  %v4359_v16 = vadd.f32 %v4355_v5, %v4263_v59  ;;  %v9459_v36 = vld [vmem:[#allocation8 + $0xd80] sm:$0xff] }
 0x3d2   : > { %v4441_v51 = vpop.f32.mrf.mxu2  ;;  %v4556_v27 = vadd.f32 %v9654_v1, %v4550_v14 }
 0x3d3   : > { %v4448_v8 = vrot.slane %v4441_v51, 4  ;;  %v4537_v9 = vpop.f32.mrf.mxu3 }
 0x3d4   : > { %v4544_v20 = vrot.slane %v4537_v9, 5  ;;  %v4347_v19 = vpop.f32.mrf.mxu1  ;;  %v4560_v17 = vmax.f32 %v4556_v27, 0.0 }
 0x3d5   : > { %v4451_v22 = vsel %vm492_vm1, %v4447_v15, %v4448_v8  ;;  %v9456_v15 = vld [vmem:[#allocation8 + $0xd68] sm:$0xff] }
 0x3d6   : > { %v4455_v23 = vadd.f32 %v4451_v22, %v4359_v16  ;;  %v4547_v26 = vsel %vm589_vm2, %v4543_v62, %v4544_v20  ;;  %v9452_v62 = vld [vmem:[#allocation8 + $0xd48] sm:$0xff] }
 0x3d8   : > { %v4551_v6 = vadd.f32 %v4547_v26, %v4455_v23 }
 0x3da   : > { %v4557_v28 = vadd.f32 %v9654_v1, %v4551_v6  ;;  %v4443_v29 = vpop.f32.mrf.mxu2 }
 0x3db   : > { %v4539_v34 = vpop.f32.mrf.mxu3 }
 0x3dc   : > { %v4561_v37 = vmax.f32 %v4557_v28, 0.0 }
 0x3de   : > { %v10472_v41 = vpack.c.bf16 %v4561_v37, %v4560_v17 }
 0x3e0   : > { %4643 = vmatmul.bf16.vlgmr.msrb.gmra.mxu0 %v10472_v41  ;;  %4739 = vmatmul.bf16.vlgmr.msrb.gmra.mxu1 %v10472_v41 }
 0x3e1   : > { %4835 = vmatmul.bf16.vlgmr.msrb.gmra.mxu2 %v10472_v41  ;;  %4931 = vmatmul.bf16.vlgmr.msrb.gmra.mxu3 %v10472_v41 }
 0x3e2   : > { %5587 = vmatpush.bf16.msrb.mxu2 %v9466_v18  ;;  %5395 = vmatpush.bf16.msrb.mxu0 %v9450_v11 }
 0x3e3   : > { %5491 = vmatpush.bf16.msrb.mxu1 %v9458_v42  ;;  %v9474_v42 = vld [vmem:[#allocation8 + $0xdf8] sm:$0xff] }
 0x3e4   : > { %5699 = vmatpush.bf16.msrb.mxu3 %v9474_v42  ;;  %v9530_v42 = vld [vmem:[#allocation8 + $0xfb8] sm:$0xff] }
 0x3e6   : > { %5588 = vmatpush.bf16.msrb.mxu2 %v9465_v43  ;;  %5396 = vmatpush.bf16.msrb.mxu0 %v9449_v44  ;;  %v9482_v43 = vld [vmem:[#allocation8 + $0xe38] sm:$0xff] }
 0x3e7   : > { %5492 = vmatpush.bf16.msrb.mxu1 %v9457_v45  ;;  %v9490_v44 = vld [vmem:[#allocation8 + $0xe78] sm:$0xff] }
 0x3ea   : > { %5589 = vmatpush.bf16.msrb.mxu2 %v9464_v46  ;;  %5397 = vmatpush.bf16.msrb.mxu0 %v9448_v21  ;;  %v9498_v46 = vld [vmem:[#allocation8 + $0xeb8] sm:$0xff] }
 0x3eb   : > { %5493 = vmatpush.bf16.msrb.mxu1 %v9456_v15 }
 0x3ee   : > { %5590 = vmatpush.bf16.msrb.mxu2 %v9463_v47  ;;  %5398 = vmatpush.bf16.msrb.mxu0 %v9447_v3  ;;  %v9473_v3 = vld [vmem:[#allocation8 + $0xdf0] sm:$0xff] }
 0x3ef   : > { %5494 = vmatpush.bf16.msrb.mxu1 %v9455_v49  ;;  %v9481_v49 = vld [vmem:[#allocation8 + $0xe30] sm:$0xff]  ;;  %5700 = vmatpush.bf16.msrb.mxu3 %v9473_v3 }
 0x3f0   : > { %4648 = vmatmul.bf16.gmra.mxu0 %v9881_v38  ;;  %4744 = vmatmul.bf16.gmra.mxu1 %v9881_v38 }
 0x3f1   : > { %4840 = vmatmul.bf16.gmra.mxu2 %v9881_v38  ;;  %4936 = vmatmul.bf16.gmra.mxu3 %v9881_v38 }
 0x3f2   : > { %5591 = vmatpush.bf16.msrb.mxu2 %v9462_v50  ;;  %5399 = vmatpush.bf16.msrb.mxu0 %v9446_v55  ;;  %v9489_v50 = vld [vmem:[#allocation8 + $0xe70] sm:$0xff] }
 0x3f3   : > { %5495 = vmatpush.bf16.msrb.mxu1 %v9454_v56 }
 0x3f6   : > { %5592 = vmatpush.bf16.msrb.mxu2 %v9461_v25  ;;  %5400 = vmatpush.bf16.msrb.mxu0 %v9445_v48  ;;  %v9497_v25 = vld [vmem:[#allocation8 + $0xeb0] sm:$0xff] }
 0x3f7   : > { %5496 = vmatpush.bf16.msrb.mxu1 %v9453_v57 }
 0x3fa   : > { %5593 = vmatpush.bf16.msrb.mxu2 %v9460_v58  ;;  %5401 = vmatpush.bf16.msrb.mxu0 %v9444_v61  ;;  %v9472_v58 = vld [vmem:[#allocation8 + $0xde8] sm:$0xff] }
 0x3fb   : > { %5497 = vmatpush.bf16.msrb.mxu1 %v9452_v62  ;;  %v9480_v61 = vld [vmem:[#allocation8 + $0xe28] sm:$0xff]  ;;  %5701 = vmatpush.bf16.msrb.mxu3 %v9472_v58 }
 0x3fc   : > { %v9488_v62 = vld [vmem:[#allocation8 + $0xe68] sm:$0xff] }
 0x3fe   : > { %5594 = vmatpush.bf16.msrb.mxu2 %v9459_v36  ;;  %5402 = vmatpush.bf16.msrb.mxu0 %v9443_v12  ;;  %v9496_v36 = vld [vmem:[#allocation8 + $0xea8] sm:$0xff]  ;;  %v9471_v12 = vld [vmem:[#allocation8 + $0xde0] sm:$0xff] }
 0x3ff   : > { %5498 = vmatpush.bf16.msrb.mxu1 %v9451_v63  ;;  %v9479_v63 = vld [vmem:[#allocation8 + $0xe20] sm:$0xff]  ;;  %5702 = vmatpush.bf16.msrb.mxu3 %v9471_v12 }
 0x400   : > { %5027 = vmatmul.bf16.vlgmr.msra.gmra.mxu0 %v10472_v41  ;;  %5123 = vmatmul.bf16.vlgmr.msra.gmra.mxu1 %v10472_v41 }
 0x401   : > { %5211 = vmatmul.bf16.vlgmr.msra.gmra.mxu2 %v10472_v41  ;;  %5307 = vmatmul.bf16.vlgmr.msra.gmra.mxu3 %v10472_v41 }
 0x402   : > { %5795 = vmatpush.bf16.msra.mxu0 %v9482_v43  ;;  %5987 = vmatpush.bf16.msra.mxu2 %v9498_v46  ;;  %v9505_v43 = vld [vmem:[#allocation8 + $0xef0] sm:$0xff] }
 0x403   : > { %5891 = vmatpush.bf16.msra.mxu1 %v9490_v44  ;;  %v9513_v44 = vld [vmem:[#allocation8 + $0xf30] sm:$0xff] }
 0x406   : > { %5796 = vmatpush.bf16.msra.mxu0 %v9481_v49  ;;  %5988 = vmatpush.bf16.msra.mxu2 %v9497_v25 }
 0x407   : > { %5892 = vmatpush.bf16.msra.mxu1 %v9489_v50 }
 0x40a   : > { %5797 = vmatpush.bf16.msra.mxu0 %v9480_v61  ;;  %5989 = vmatpush.bf16.msra.mxu2 %v9496_v36  ;;  %v9504_v61 = vld [vmem:[#allocation8 + $0xee8] sm:$0xff] }
 0x40b   : > { %5893 = vmatpush.bf16.msra.mxu1 %v9488_v62  ;;  %v9512_v62 = vld [vmem:[#allocation8 + $0xf28] sm:$0xff] }
 0x40e   : > { %5798 = vmatpush.bf16.msra.mxu0 %v9479_v63  ;;  %v9528_v63 = vld [vmem:[#allocation8 + $0xfa8] sm:$0xff] }
 0x410   : > { %5032 = vmatmul.bf16.gmra.mxu0 %v9881_v38  ;;  %5128 = vmatmul.bf16.gmra.mxu1 %v9881_v38 }
 0x411   : > { %5216 = vmatmul.bf16.gmra.mxu2 %v9881_v38  ;;  %5312 = vmatmul.bf16.gmra.mxu3 %v9881_v38 }
 0x420   : > { %5403 = vmatmul.bf16.vlgmr.msrb.gmra.mxu0 %v10472_v41  ;;  %5499 = vmatmul.bf16.vlgmr.msrb.gmra.mxu1 %v10472_v41 }
 0x421   : > { %5595 = vmatmul.bf16.vlgmr.msrb.gmra.mxu2 %v10472_v41 }
 0x430   : > { %5408 = vmatmul.bf16.gmra.mxu0 %v9881_v38  ;;  %5504 = vmatmul.bf16.gmra.mxu1 %v9881_v38 }
 0x431   : > { %5600 = vmatmul.bf16.gmra.mxu2 %v9881_v38 }
 0x45d   : > { %v4644_v2 = vpop.f32.mrf.mxu0  ;;  %v4740_v30 = vpop.f32.mrf.mxu1 }
 0x45e   : > { %v4654_v51 = vrot.slane %v4644_v2, 3  ;;  %v4750_v60 = vrot.slane %v4740_v30, 4  ;;  %v9487_v2 = vld [vmem:[#allocation8 + $0xe60] sm:$0xff] }
 0x45f   : > { %5894 = vmatpush.bf16.msra.mxu1 %v9487_v2 }
 0x464   : > { %v4836_v40 = vpop.f32.mrf.mxu2  ;;  %v4932_v5 = vpop.f32.mrf.mxu3 }
 0x465   : > { %v4646_v0 = vpop.f32.mrf.mxu0  ;;  %v4742_v59 = vpop.f32.mrf.mxu1  ;;  %v4846_v1 = vrot.slane %v4836_v40, 5  ;;  %v4942_v23 = vrot.slane %v4932_v5, 6  ;;  %v9495_v5 = vld [vmem:[#allocation8 + $0xea0] sm:$0xff] }
 0x466   : > { %v4655_v52 = vrot.slane %v4646_v0, 3  ;;  %v4751_v7 = vrot.slane %v4742_v59, 4  ;;  %5990 = vmatpush.bf16.msra.mxu2 %v9495_v5 }
 0x468   : > { %v4660_v8 = vsel %vm395_vm0, %v4654_v51, %v4655_v52  ;;  %v4756_v9 = vsel %vm492_vm1, %v4750_v60, %v4751_v7  ;;  %v9486_v52 = vld [vmem:[#allocation8 + $0xe58] sm:$0xff] }
 0x469   : > { %v4759_v13 = vadd.f32 %v4756_v9, %v4660_v8  ;;  %v9494_v7 = vld [vmem:[#allocation8 + $0xe98] sm:$0xff]  ;;  %5895 = vmatpush.bf16.msra.mxu1 %v9486_v52  ;;  %v9469_v8 = vld [vmem:[#allocation8 + $0xdd0] sm:$0xff] }
 0x46a   : > { %5991 = vmatpush.bf16.msra.mxu2 %v9494_v7  ;;  %v9477_v9 = vld [vmem:[#allocation8 + $0xe10] sm:$0xff]  ;;  %v9527_v7 = vld [vmem:[#allocation8 + $0xfa0] sm:$0xff] }
 0x46c   : > { %v4838_v39 = vpop.f32.mrf.mxu2  ;;  %v4934_v14 = vpop.f32.mrf.mxu3 }
 0x46d   : > { %v4847_v16 = vrot.slane %v4838_v39, 5  ;;  %v4943_v20 = vrot.slane %v4934_v14, 6  ;;  %v4649_v19 = vpop.f32.mrf.mxu0  ;;  %v4745_v22 = vpop.f32.mrf.mxu1 }
 0x46e   : > { %v9468_v19 = vld [vmem:[#allocation8 + $0xdc8] sm:$0xff] }
 0x46f   : > { %v4852_v53 = vsel %vm589_vm2, %v4846_v1, %v4847_v16  ;;  %v4948_v26 = vsel %vm686_vm3, %v4942_v23, %v4943_v20  ;;  %v9476_v22 = vld [vmem:[#allocation8 + $0xe08] sm:$0xff] }
 0x470   : > { %v4855_v24 = vadd.f32 %v4852_v53, %v4759_v13  ;;  %v9485_v13 = vld [vmem:[#allocation8 + $0xe50] sm:$0xff]  ;;  %v9492_v53 = vld [vmem:[#allocation8 + $0xe88] sm:$0xff] }
 0x471   : > { %5896 = vmatpush.bf16.msra.mxu1 %v9485_v13 }
 0x472   : > { %v10504_v54 = vadd.f32 %v4948_v26, %v4855_v24 }
 0x474   : > { %v4841_v10 = vpop.f32.mrf.mxu2  ;;  %v4937_v27 = vpop.f32.mrf.mxu3 }
 0x475   : > { %v4651_v6 = vpop.f32.mrf.mxu0  ;;  %v4747_v28 = vpop.f32.mrf.mxu1  ;;  %v9467_v10 = vld [vmem:[#allocation8 + $0xdc0] sm:$0xff] }
 0x476   : > { %v4657_v29 = vrot.slane %v4651_v6, 3  ;;  %v4753_v32 = vrot.slane %v4747_v28, 4  ;;  %v9475_v27 = vld [vmem:[#allocation8 + $0xe00] sm:$0xff] }
 0x477   : > { %v9483_v6 = vld [vmem:[#allocation8 + $0xe40] sm:$0xff] }
 0x478   : > { %v4661_v33 = vsel %vm395_vm0, %v4657_v29, %v4654_v51  ;;  %v4757_v34 = vsel %vm492_vm1, %v4753_v32, %v4750_v60  ;;  %v9470_v51 = vld [vmem:[#allocation8 + $0xdd8] sm:$0xff]  ;;  %v9491_v32 = vld [vmem:[#allocation8 + $0xe80] sm:$0xff] }
 0x479   : > { %v4758_v4 = vadd.f32 %v4757_v34, %v4661_v33  ;;  %v9478_v60 = vld [vmem:[#allocation8 + $0xe18] sm:$0xff]  ;;  %5703 = vmatpush.bf16.msrb.mxu3 %v9470_v51  ;;  %v9511_v51 = vld [vmem:[#allocation8 + $0xf20] sm:$0xff] }
 0x47a   : > { %5799 = vmatpush.bf16.msra.mxu0 %v9478_v60 }
 0x47c   : > { %v4843_v35 = vpop.f32.mrf.mxu2  ;;  %v4939_v17 = vpop.f32.mrf.mxu3 }
 0x47d   : > { %v4849_v37 = vrot.slane %v4843_v35, 5  ;;  %v4945_v41 = vrot.slane %v4939_v17, 6  ;;  %v10510_v18 = vpop.f32.mrf.mxu0  ;;  %v10512_v11 = vpop.f32.mrf.mxu1  ;;  %5704 = vmatpush.bf16.msrb.mxu3 %v9469_v8 }
 0x47e   : > { %5800 = vmatpush.bf16.msra.mxu0 %v9477_v9  ;;  %v5038_v26 = vrot.slane %v10510_v18, 7  ;;  %v9522_v18 = vld [vmem:[#allocation8 + $0xf78] sm:$0xff] }
 0x47f   : > { %v4853_v45 = vsel %vm589_vm2, %v4849_v37, %v4846_v1  ;;  %v4949_v15 = vsel %vm686_vm3, %v4945_v41, %v4942_v23  ;;  %v9493_v1 = vld [vmem:[#allocation8 + $0xe90] sm:$0xff]  ;;  %v9484_v23 = vld [vmem:[#allocation8 + $0xe48] sm:$0xff]  ;;  %v9506_v37 = vld [vmem:[#allocation8 + $0xef8] sm:$0xff] }
 0x480   : > { %v4854_v21 = vadd.f32 %v4853_v45, %v4758_v4  ;;  %5992 = vmatpush.bf16.msra.mxu2 %v9493_v1  ;;  %5897 = vmatpush.bf16.msra.mxu1 %v9484_v23  ;;  %v9514_v41 = vld [vmem:[#allocation8 + $0xf38] sm:$0xff] }
 0x481   : > { %5705 = vmatpush.bf16.msrb.mxu3 %v9468_v19 }
 0x482   : > { %v10518_v47 = vadd.f32 %v4949_v15, %v4854_v21  ;;  %5801 = vmatpush.bf16.msra.mxu0 %v9476_v22  ;;  %v9521_v21 = vld [vmem:[#allocation8 + $0xf70] sm:$0xff] }
 0x483   : > { %v9529_v15 = vld [vmem:[#allocation8 + $0xfb0] sm:$0xff] }
 0x484   : > { %v10520_v55 = vpop.f32.mrf.mxu2  ;;  %v10522_v56 = vpop.f32.mrf.mxu3  ;;  %5993 = vmatpush.bf16.msra.mxu2 %v9492_v53  ;;  %5898 = vmatpush.bf16.msra.mxu1 %v9483_v6 }
 0x485   : > { %v10524_v48 = vpop.f32.mrf.mxu0  ;;  %v10526_v57 = vpop.f32.mrf.mxu1  ;;  %5706 = vmatpush.bf16.msrb.mxu3 %v9467_v10  ;;  %v5222_v49 = vrot.slane %v10520_v55, 1  ;;  %v9520_v55 = vld [vmem:[#allocation8 + $0xf68] sm:$0xff]  ;;  %v9510_v10 = vld [vmem:[#allocation8 + $0xf18] sm:$0xff] }
 0x486   : > { %5802 = vmatpush.bf16.msra.mxu0 %v9475_v27  ;;  %v5039_v35 = vrot.slane %v10524_v48, 7  ;;  %v9518_v27 = vld [vmem:[#allocation8 + $0xf58] sm:$0xff] }
 0x488   : > { %5994 = vmatpush.bf16.msra.mxu2 %v9491_v32  ;;  %v5044_v45 = vsel %vm783_vm4, %v5038_v26, %v5039_v35  ;;  %6267 = vmatpush.bf16.msrb.mxu1 %v9522_v18  ;;  %v9526_v32 = vld [vmem:[#allocation8 + $0xf98] sm:$0xff]  ;;  %v9509_v35 = vld [vmem:[#allocation8 + $0xf10] sm:$0xff]  ;;  %v9655_v18 = vld [vmem:[#allocation10 + $0x4] ss:$0 sm:$0xff] }
 0x489   : > { %6083 = vmatpush.bf16.msra.mxu3 %v9506_v37  ;;  %v5047_v58 = vadd.f32 %v5044_v45, %v10504_v54  ;;  %v9525_v37 = vld [vmem:[#allocation8 + $0xf90] sm:$0xff] }
 0x48a   : > { %6179 = vmatpush.bf16.msrb.mxu0 %v9514_v41 }
 0x48c   : > { %v10528_v30 = vpop.f32.mrf.mxu2  ;;  %v10530_v40 = vpop.f32.mrf.mxu3  ;;  %6363 = vmatpush.bf16.msrb.mxu2 %v9530_v42  ;;  %6268 = vmatpush.bf16.msrb.mxu1 %v9521_v21 }
 0x48d   : > { %v5033_v0 = vpop.f32.mrf.mxu0  ;;  %v5129_v59 = vpop.f32.mrf.mxu1  ;;  %v5223_v46 = vrot.slane %v10528_v30, 1  ;;  %6084 = vmatpush.bf16.msra.mxu3 %v9505_v43  ;;  %v5319_v12 = vrot.slane %v10530_v40, 2  ;;  %v5318_v30 = vrot.slane %v10522_v56, 2  ;;  %v9519_v56 = vld [vmem:[#allocation8 + $0xf60] sm:$0xff] }
 0x48e   : > { %6180 = vmatpush.bf16.msrb.mxu0 %v9513_v44  ;;  %v5135_v0 = vadd.f32 %v10526_v57, %v5047_v58  ;;  %v9503_v59 = vld [vmem:[#allocation8 + $0xee0] sm:$0xff] }
 0x48f   : > { %v5228_v36 = vsel %vm968_vm5, %v5222_v49, %v5223_v46  ;;  %v5324_v40 = vsel %vm1065_vm6, %v5318_v30, %v5319_v12  ;;  %v9516_v49 = vld [vmem:[#allocation8 + $0xf48] sm:$0xff]  ;;  %v9538_v30 = vld [vmem:[#allocation8 + $0xff8] sm:$0xff] }
 0x490   : > { %6364 = vmatpush.bf16.msrb.mxu2 %v9529_v15  ;;  %6269 = vmatpush.bf16.msrb.mxu1 %v9520_v55  ;;  %v9500_v15 = vld [vmem:[#allocation8 + $0xec8] sm:$0xff] }
 0x491   : > { %6085 = vmatpush.bf16.msra.mxu3 %v9504_v61  ;;  %v9499_v61 = vld [vmem:[#allocation8 + $0xec0] sm:$0xff] }
 0x492   : > { %6181 = vmatpush.bf16.msrb.mxu0 %v9512_v62  ;;  %v9507_v62 = vld [vmem:[#allocation8 + $0xf00] sm:$0xff] }
 0x494   : > { %v10532_v39 = vpop.f32.mrf.mxu2  ;;  %v10534_v14 = vpop.f32.mrf.mxu3  ;;  %6365 = vmatpush.bf16.msrb.mxu2 %v9528_v63  ;;  %6270 = vmatpush.bf16.msrb.mxu1 %v9519_v56  ;;  %v9535_v56 = vld [vmem:[#allocation8 + $0xfe0] sm:$0xff] }
 0x495   : > { %v5035_v16 = vpop.f32.mrf.mxu0  ;;  %v5131_v20 = vpop.f32.mrf.mxu1  ;;  %v5224_v50 = vrot.slane %v10532_v39, 1  ;;  %v5320_v60 = vrot.slane %v10534_v14, 2  ;;  %6086 = vmatpush.bf16.msra.mxu3 %v9503_v59  ;;  %v9545_v59 = vld [vmem:[#allocation8 + $0x1030] sm:$0xff] }
 0x496   : > { %v5041_v24 = vrot.slane %v5035_v16, 7  ;;  %6182 = vmatpush.bf16.msrb.mxu0 %v9511_v51  ;;  %v9553_v51 = vld [vmem:[#allocation8 + $0x1070] sm:$0xff] }
 0x497   : > { %v5227_v54 = vsel %vm968_vm5, %v5223_v46, %v5224_v50  ;;  %v5323_v14 = vsel %vm1065_vm6, %v5319_v12, %v5320_v60  ;;  %v9524_v50 = vld [vmem:[#allocation8 + $0xf88] sm:$0xff]  ;;  %v9523_v12 = vld [vmem:[#allocation8 + $0xf80] sm:$0xff] }
 0x498   : > { %v5045_v33 = vsel %vm783_vm4, %v5041_v24, %v5038_v26  ;;  %v5231_v8 = vadd.f32 %v5227_v54, %v5135_v0  ;;  %6366 = vmatpush.bf16.msrb.mxu2 %v9527_v7  ;;  %v9502_v26 = vld [vmem:[#allocation8 + $0xed8] sm:$0xff]  ;;  %6271 = vmatpush.bf16.msrb.mxu1 %v9518_v27  ;;  %v9537_v0 = vld [vmem:[#allocation8 + $0xff0] sm:$0xff]  ;;  %v9544_v60 = vld [vmem:[#allocation8 + $0x1028] sm:$0xff] }
 0x499   : > { %v5046_v17 = vadd.f32 %v5045_v33, %v10518_v47  ;;  %6087 = vmatpush.bf16.msra.mxu3 %v9502_v26  ;;  %v9546_v54 = vld [vmem:[#allocation8 + $0x1038] sm:$0xff]  ;;  %v9543_v7 = vld [vmem:[#allocation8 + $0x1020] sm:$0xff] }
 0x49a   : > { %v5327_v53 = vadd.f32 %v5323_v14, %v5231_v8  ;;  %6183 = vmatpush.bf16.msrb.mxu0 %v9510_v10  ;;  %v9551_v8 = vld [vmem:[#allocation8 + $0x1060] sm:$0xff]  ;;  %v9548_v14 = vld [vmem:[#allocation8 + $0x1048] sm:$0xff] }
 0x49b   : > { %v5134_v3 = vadd.f32 %v10512_v11, %v5046_v17  ;;  %v9517_v17 = vld [vmem:[#allocation8 + $0xf50] sm:$0xff] }
 0x49c   : > { %v5219_v28 = vpop.f32.mrf.mxu2  ;;  %v5315_v29 = vpop.f32.mrf.mxu3  ;;  %6367 = vmatpush.bf16.msrb.mxu2 %v9526_v32  ;;  %6272 = vmatpush.bf16.msrb.mxu1 %v9517_v17 }
 0x49d   : > { %v5404_v34 = vpop.f32.mrf.mxu0  ;;  %v10539_v4 = vpop.f32.mrf.mxu1  ;;  %v5230_v2 = vadd.f32 %v5228_v36, %v5134_v3  ;;  %v9508_v3 = vld [vmem:[#allocation8 + $0xf08] sm:$0xff]  ;;  %v9515_v36 = vld [vmem:[#allocation8 + $0xf40] sm:$0xff] }
 0x49e   : > { %v5414_v5 = vrot.slane %v5404_v34, 3  ;;  %v5510_v22 = vrot.slane %v10539_v4, 4  ;;  %v9501_v4 = vld [vmem:[#allocation8 + $0xed0] sm:$0xff]  ;;  %6184 = vmatpush.bf16.msrb.mxu0 %v9509_v35 }
 0x49f   : > { %v5326_v9 = vadd.f32 %v5324_v40, %v5230_v2  ;;  %6088 = vmatpush.bf16.msra.mxu3 %v9501_v4  ;;  %v9536_v40 = vld [vmem:[#allocation8 + $0xfe8] sm:$0xff] }
 0x4a0   : > { %6368 = vmatpush.bf16.msrb.mxu2 %v9525_v37  ;;  %6273 = vmatpush.bf16.msrb.mxu1 %v9516_v49 }
 0x4a2   : > { %6185 = vmatpush.bf16.msrb.mxu0 %v9508_v3 }
 0x4a3   : > { %6089 = vmatpush.bf16.msra.mxu3 %v9500_v15 }
 0x4a4   : > { %v5596_v47 = vpop.f32.mrf.mxu2  ;;  %6369 = vmatpush.bf16.msrb.mxu2 %v9524_v50  ;;  %6274 = vmatpush.bf16.msrb.mxu1 %v9515_v36 }
 0x4a5   : > { %v5406_v25 = vpop.f32.mrf.mxu0  ;;  %v10549_v48 = vpop.f32.mrf.mxu1  ;;  %v5606_v23 = vrot.slane %v5596_v47, 5 }
 0x4a6   : > { %v5415_v11 = vrot.slane %v5406_v25, 3  ;;  %v5511_v57 = vrot.slane %v10549_v48, 4  ;;  %6186 = vmatpush.bf16.msrb.mxu0 %v9507_v62 }
 0x4a7   : > { %6090 = vmatpush.bf16.msra.mxu3 %v9499_v61 }
 0x4a8   : > { %v5420_v52 = vsel %vm395_vm0, %v5414_v5, %v5415_v11  ;;  %v5516_v6 = vsel %vm492_vm1, %v5510_v22, %v5511_v57  ;;  %6370 = vmatpush.bf16.msrb.mxu2 %v9523_v12  ;;  %v10582_v5 = vld [vmem:[#allocation8 + $0x1078] sm:$0xff]  ;;  %v9531_v22 = vld [vmem:[#allocation8 + $0xfc0] sm:$0xff] }
 0x4a9   : > { %v5422_v20 = vadd.f32 %v5420_v52, %v5326_v9  ;;  %v9552_v52 = vld [vmem:[#allocation8 + $0x1068] sm:$0xff]  ;;  %v9534_v9 = vld [vmem:[#allocation8 + $0xfd8] sm:$0xff] }
 0x4ab   : > { %v5518_v33 = vadd.f32 %v5516_v6, %v5422_v20  ;;  %v9532_v20 = vld [vmem:[#allocation8 + $0xfc8] sm:$0xff] }
 0x4ac   : > { %v5598_v13 = vpop.f32.mrf.mxu2 }
 0x4ad   : > { %v5607_v39 = vrot.slane %v5598_v13, 5  ;;  %v5409_v1 = vpop.f32.mrf.mxu0  ;;  %v5505_v16 = vpop.f32.mrf.mxu1  ;;  %v9542_v13 = vld [vmem:[#allocation8 + $0x1018] sm:$0xff] }
 0x4ae   : > { %v5416_v19 = vrot.slane %v5409_v1, 3  ;;  %v5512_v29 = vrot.slane %v5505_v16, 4  ;;  %v9541_v1 = vld [vmem:[#allocation8 + $0x1010] sm:$0xff] }
 0x4af   : > { %v5612_v28 = vsel %vm589_vm2, %v5606_v23, %v5607_v39  ;;  %v9549_v16 = vld [vmem:[#allocation8 + $0x1050] sm:$0xff]  ;;  %v9539_v23 = vld [vmem:[#allocation8 + $0x1000] sm:$0xff] }
 0x4b0   : > { %v5419_v24 = vsel %vm395_vm0, %v5415_v11, %v5416_v19  ;;  %v5614_v41 = vadd.f32 %v5612_v28, %v5518_v33  ;;  %v5515_v43 = vsel %vm492_vm1, %v5511_v57, %v5512_v29  ;;  %v9550_v57 = vld [vmem:[#allocation8 + $0x1058] sm:$0xff]  ;;  %v9540_v19 = vld [vmem:[#allocation8 + $0x1008] sm:$0xff] }
 0x4b1   : > { %v5423_v34 = vadd.f32 %v5419_v24, %v5327_v53  ;;  %v9547_v53 = vld [vmem:[#allocation8 + $0x1040] sm:$0xff] }
 0x4b2   : > { %v5620_v25 = vadd.f32 %v9655_v18, %v5614_v41 }
 0x4b3   : > { %v5519_v21 = vadd.f32 %v5515_v43, %v5423_v34 }
 0x4b4   : > { %v5601_v42 = vpop.f32.mrf.mxu2  ;;  %v5624_v11 = vmax.f32 %v5620_v25, 0.0 }
 0x4b5   : > { %v5608_v44 = vrot.slane %v5601_v42, 5  ;;  %v5411_v45 = vpop.f32.mrf.mxu0  ;;  %v5507_v46 = vpop.f32.mrf.mxu1 }
 0x4b7   : > { %v5611_v47 = vsel %vm589_vm2, %v5607_v39, %v5608_v44  ;;  %v9533_v39 = vld [vmem:[#allocation8 + $0xfd0] sm:$0xff] }
 0x4b8   : > { %v5615_v48 = vadd.f32 %v5611_v47, %v5519_v21 }
 0x4ba   : > { %v5621_v58 = vadd.f32 %v9655_v18, %v5615_v48 }
 0x4bc   : > { %v5625_v55 = vmax.f32 %v5621_v58, 0.0  ;;  %v5603_v63 = vpop.f32.mrf.mxu2 }
 0x4be   : > { %v10578_v2 = vpack.c.bf16 %v5625_v55, %v5624_v11 }
 0x4c0   : > { %5707 = vmatmul.bf16.vlgmr.msrb.gmra.mxu3 %v10578_v2  ;;  %5803 = vmatmul.bf16.vlgmr.msra.gmra.mxu0 %v10578_v2 }
 0x4c1   : > { %5899 = vmatmul.bf16.vlgmr.msra.gmra.mxu1 %v10578_v2  ;;  %5995 = vmatmul.bf16.vlgmr.msra.gmra.mxu2 %v10578_v2 }
 0x4c2   : > { %6459 = vmatpush.bf16.msrb.mxu3 %v9538_v30  ;;  %6555 = vmatpush.bf16.msra.mxu0 %v9546_v54 }
 0x4c3   : > { %9556 = vmatpush.bf16.msra.mxu2 %v9546_v54  ;;  %6651 = vmatpush.bf16.msra.mxu1 %v10582_v5 }
 0x4c6   : > { %6460 = vmatpush.bf16.msrb.mxu3 %v9537_v0  ;;  %6556 = vmatpush.bf16.msra.mxu0 %v9545_v59 }
 0x4c7   : > { %9557 = vmatpush.bf16.msra.mxu2 %v9545_v59  ;;  %6652 = vmatpush.bf16.msra.mxu1 %v9553_v51 }
 0x4ca   : > { %6461 = vmatpush.bf16.msrb.mxu3 %v9536_v40  ;;  %6557 = vmatpush.bf16.msra.mxu0 %v9544_v60 }
 0x4cb   : > { %9558 = vmatpush.bf16.msra.mxu2 %v9544_v60  ;;  %6653 = vmatpush.bf16.msra.mxu1 %v9552_v52 }
 0x4ce   : > { %6462 = vmatpush.bf16.msrb.mxu3 %v9535_v56  ;;  %6558 = vmatpush.bf16.msra.mxu0 %v9543_v7 }
 0x4cf   : > { %9559 = vmatpush.bf16.msra.mxu2 %v9543_v7  ;;  %6654 = vmatpush.bf16.msra.mxu1 %v9551_v8 }
 0x4d0   : > { %5712 = vmatmul.bf16.gmra.mxu3 %v9881_v38  ;;  %5808 = vmatmul.bf16.gmra.mxu0 %v9881_v38 }
 0x4d1   : > { %5904 = vmatmul.bf16.gmra.mxu1 %v9881_v38  ;;  %6000 = vmatmul.bf16.gmra.mxu2 %v9881_v38 }
 0x4d2   : > { %6463 = vmatpush.bf16.msrb.mxu3 %v9534_v9  ;;  %6559 = vmatpush.bf16.msra.mxu0 %v9542_v13 }
 0x4d3   : > { %9560 = vmatpush.bf16.msra.mxu2 %v9542_v13  ;;  %6655 = vmatpush.bf16.msra.mxu1 %v9550_v57 }
 0x4d6   : > { %6464 = vmatpush.bf16.msrb.mxu3 %v9533_v39  ;;  %6560 = vmatpush.bf16.msra.mxu0 %v9541_v1 }
 0x4d7   : > { %9561 = vmatpush.bf16.msra.mxu2 %v9541_v1  ;;  %6656 = vmatpush.bf16.msra.mxu1 %v9549_v16 }
 0x4da   : > { %6465 = vmatpush.bf16.msrb.mxu3 %v9532_v20  ;;  %6561 = vmatpush.bf16.msra.mxu0 %v9540_v19 }
 0x4db   : > { %9562 = vmatpush.bf16.msra.mxu2 %v9540_v19  ;;  %6657 = vmatpush.bf16.msra.mxu1 %v9548_v14 }
 0x4de   : > { %6466 = vmatpush.bf16.msrb.mxu3 %v9531_v22  ;;  %6562 = vmatpush.bf16.msra.mxu0 %v9539_v23 }
 0x4df   : > { %9563 = vmatpush.bf16.msra.mxu2 %v9539_v23  ;;  %6658 = vmatpush.bf16.msra.mxu1 %v9547_v53 }
 0x4e0   : > { %6091 = vmatmul.bf16.vlgmr.msra.gmra.mxu3 %v10578_v2  ;;  %6187 = vmatmul.bf16.vlgmr.msrb.gmra.mxu0 %v10578_v2 }
 0x4e1   : > { %6275 = vmatmul.bf16.vlgmr.msrb.gmra.mxu1 %v10578_v2  ;;  %6371 = vmatmul.bf16.vlgmr.msrb.gmra.mxu2 %v10578_v2 }
 0x4e2   : > { %9564 = vmatpush.bf16.msra.mxu3 %v10582_v5 }
 0x4e6   : > { %9565 = vmatpush.bf16.msra.mxu3 %v9553_v51 }
 0x4ea   : > { %9566 = vmatpush.bf16.msra.mxu3 %v9552_v52 }
 0x4ee   : > { %9567 = vmatpush.bf16.msra.mxu3 %v9551_v8 }
 0x4f0   : > { %6096 = vmatmul.bf16.gmra.mxu3 %v9881_v38  ;;  %6192 = vmatmul.bf16.gmra.mxu0 %v9881_v38 }
 0x4f1   : > { %6280 = vmatmul.bf16.gmra.mxu1 %v9881_v38  ;;  %6376 = vmatmul.bf16.gmra.mxu2 %v9881_v38 }
 0x4f2   : > { %9568 = vmatpush.bf16.msra.mxu3 %v9550_v57 }
 0x4f6   : > { %9569 = vmatpush.bf16.msra.mxu3 %v9549_v16 }
 0x4fa   : > { %9570 = vmatpush.bf16.msra.mxu3 %v9548_v14 }
 0x4fe   : > { %9571 = vmatpush.bf16.msra.mxu3 %v9547_v53 }
 0x500   : > { %6467 = vmatmul.bf16.vlgmr.msrb.gmra.mxu3 %v10578_v2  ;;  %6563 = vmatmul.bf16.vlgmr.msra.gmra.mxu0 %v10578_v2 }
 0x501   : > { %6568 = vmatmul.bf16.vlgmr.msra.gmra.mxu2 %v9881_v38  ;;  %6659 = vmatmul.bf16.vlgmr.msra.gmra.mxu1 %v10578_v2 }
 0x510   : > { %6472 = vmatmul.bf16.gmra.mxu3 %v9881_v38 }
 0x520   : > { %6664 = vmatmul.bf16.vlgmr.msra.gmra.mxu3 %v9881_v38 }
 0x53d   : > { %v5804_v24 = vpop.f32.mrf.mxu0 }
 0x53e   : > { %v5900_v26 = vpop.f32.mrf.mxu1  ;;  %v5814_v33 = vrot.slane %v5804_v24, 4 }
 0x53f   : > { %v5910_v37 = vrot.slane %v5900_v26, 5 }
 0x543   : > { %v5708_v10 = vpop.f32.mrf.mxu3 }
 0x544   : > { %v10606_v29 = vpop.f32.mrf.mxu2  ;;  %v5718_v34 = vrot.slane %v5708_v10, 3 }
 0x545   : > { %v5806_v27 = vpop.f32.mrf.mxu0  ;;  %v6006_v53 = vrot.slane %v10606_v29, 6 }
 0x546   : > { %v5902_v6 = vpop.f32.mrf.mxu1  ;;  %v5815_v28 = vrot.slane %v5806_v27, 4 }
 0x547   : > { %v5911_v4 = vrot.slane %v5902_v6, 5 }
 0x548   : > { %v5820_v41 = vsel %vm492_vm1, %v5814_v33, %v5815_v28 }
 0x549   : > { %v5916_v45 = vsel %vm589_vm2, %v5910_v37, %v5911_v4 }
 0x54b   : > { %v5710_v32 = vpop.f32.mrf.mxu3 }
 0x54c   : > { %v5719_v35 = vrot.slane %v5710_v32, 3  ;;  %v10620_v49 = vpop.f32.mrf.mxu2 }
 0x54d   : > { %v5809_v17 = vpop.f32.mrf.mxu0 }
 0x54e   : > { %v5724_v38 = vsel %vm395_vm0, %v5718_v34, %v5719_v35  ;;  %v5816_v18 = vrot.slane %v5809_v17, 4  ;;  %v5905_v42 = vpop.f32.mrf.mxu1 }
 0x54f   : > { %v5823_v43 = vadd.f32 %v5820_v41, %v5724_v38  ;;  %v5912_v44 = vrot.slane %v5905_v42, 5 }
 0x550   : > { %v5819_v46 = vsel %vm492_vm1, %v5815_v28, %v5816_v18 }
 0x551   : > { %v10616_v21 = vadd.f32 %v5916_v45, %v5823_v43  ;;  %v5915_v15 = vsel %vm589_vm2, %v5911_v4, %v5912_v44 }
 0x553   : > { %v5713_v3 = vpop.f32.mrf.mxu3 }
 0x554   : > { %v5720_v47 = vrot.slane %v5713_v3, 3  ;;  %v10634_v5 = vpop.f32.mrf.mxu2 }
 0x555   : > { %v5811_v50 = vpop.f32.mrf.mxu0 }
 0x556   : > { %v5723_v25 = vsel %vm395_vm0, %v5719_v35, %v5720_v47  ;;  %v5907_v48 = vpop.f32.mrf.mxu1  ;;  %v5817_v62 = vrot.slane %v5811_v50, 4  ;;  %v6007_v50 = vrot.slane %v10620_v49, 6 }
 0x557   : > { %v5824_v58 = vadd.f32 %v5819_v46, %v5723_v25  ;;  %v5913_v11 = vrot.slane %v5907_v48, 5 }
 0x558   : > { %v5818_v12 = vsel %vm492_vm1, %v5816_v18, %v5817_v62  ;;  %v5821_v1 = vsel %vm492_vm1, %v5817_v62, %v5814_v33 }
 0x559   : > { %v10624_v61 = vadd.f32 %v5915_v15, %v5824_v58  ;;  %v5914_v2 = vsel %vm589_vm2, %v5912_v44, %v5913_v11  ;;  %v5917_v19 = vsel %vm589_vm2, %v5913_v11, %v5910_v37 }
 0x55b   : > { %v5715_v36 = vpop.f32.mrf.mxu3 }
 0x55c   : > { %v5721_v55 = vrot.slane %v5715_v36, 3  ;;  %v10642_v52 = vpop.f32.mrf.mxu2 }
 0x55d   : > { %v6188_v63 = vpop.f32.mrf.mxu0  ;;  %v6009_v14 = vrot.slane %v10642_v52, 6 }
 0x55e   : > { %v5722_v30 = vsel %vm395_vm0, %v5720_v47, %v5721_v55  ;;  %v10632_v54 = vpop.f32.mrf.mxu1  ;;  %v5725_v57 = vsel %vm395_vm0, %v5721_v55, %v5718_v34 }
 0x55f   : > { %v5825_v0 = vadd.f32 %v5818_v12, %v5722_v30  ;;  %v5822_v16 = vadd.f32 %v5821_v1, %v5725_v57  ;;  %v6013_v27 = vsel %vm686_vm3, %v6009_v14, %v6006_v53  ;;  %v6286_v17 = vrot.slane %v10632_v54, 1  ;;  %v10716_v30 = vld [vmem:[#allocation10 + $0x5] ss:$0 sm:$0xff] }
 0x560   : > { %v6008_v1 = vrot.slane %v10634_v5, 6  ;;  %v283_v54 = vadd.s32 8, %v10060_v31 }
 0x561   : > { %v10636_v59 = vadd.f32 %v5914_v2, %v5825_v0  ;;  %v5918_v22 = vadd.f32 %v5917_v19, %v5822_v16  ;;  %v6012_v0 = vsel %vm686_vm3, %v6006_v53, %v6007_v50 }
 0x562   : > { %v6015_v52 = vadd.f32 %v6012_v0, %v10616_v21 }
 0x563   : > { %v6092_v51 = vpop.f32.mrf.mxu3  ;;  %v6014_v28 = vadd.f32 %v6013_v27, %v5918_v22  ;;  %v6010_v22 = vsel %vm686_vm3, %v6008_v1, %v6009_v14 }
 0x564   : > { %v10650_v9 = vpop.f32.mrf.mxu2  ;;  %v6102_v24 = vrot.slane %v6092_v51, 7 }
 0x565   : > { %v10638_v40 = vpop.f32.mrf.mxu0  ;;  %v6382_v43 = vrot.slane %v10650_v9, 2 }
 0x566   : > { %v10640_v60 = vpop.f32.mrf.mxu1 }
 0x567   : > { %v6287_v29 = vrot.slane %v10640_v60, 1 }
 0x569   : > { %v6292_v41 = vsel %vm968_vm5, %v6286_v17, %v6287_v29 }
 0x56b   : > { %v10644_v56 = vpop.f32.mrf.mxu3 }
 0x56c   : > { %v10666_v10 = vpop.f32.mrf.mxu2  ;;  %v6103_v48 = vrot.slane %v10644_v56, 7 }
 0x56d   : > { %v10646_v7 = vpop.f32.mrf.mxu0  ;;  %v6383_v38 = vrot.slane %v10666_v10, 2  ;;  %v6017_v10 = vadd.f32 %v6010_v22, %v10636_v59 }
 0x56e   : > { %v10648_v8 = vpop.f32.mrf.mxu1  ;;  %v6108_v51 = vsel %vm783_vm4, %v6102_v24, %v6103_v48 }
 0x56f   : > { %v6388_v46 = vsel %vm1065_vm6, %v6382_v43, %v6383_v38  ;;  %v6111_v16 = vadd.f32 %v6108_v51, %v6015_v52 }
 0x571   : > { %v6199_v14 = vadd.f32 %v10638_v40, %v6111_v16  ;;  %v285_v16 = vadd.s32 24, %v10060_v31 }
 0x573   : > { %v10652_v13 = vpop.f32.mrf.mxu3 }
 0x574   : > { %v10680_v37 = vpop.f32.mrf.mxu2 }
 0x575   : > { %v10656_v39 = vpop.f32.mrf.mxu0  ;;  %v6384_v21 = vrot.slane %v10680_v37, 2 }
 0x576   : > { %v10660_v20 = vpop.f32.mrf.mxu1 }
 0x577   : > { %v6387_v59 = vsel %vm1065_vm6, %v6383_v38, %v6384_v21 }
 0x57b   : > { %v6099_v23 = vpop.f32.mrf.mxu3 }
 0x57c   : > { %v6105_v26 = vrot.slane %v6099_v23, 7  ;;  %v6379_v55 = vpop.f32.mrf.mxu2  ;;  %v6104_v23 = vrot.slane %v10652_v13, 7  ;;  %v6011_v13 = vsel %vm686_vm3, %v6007_v50, %v6008_v1  ;;  %v284_v1 = vadd.s32 16, %v10060_v31 }
 0x57d   : > { %v10672_v32 = vpop.f32.mrf.mxu0 }
 0x57e   : > { %v6109_v6 = vsel %vm783_vm4, %v6105_v26, %v6102_v24  ;;  %v10674_v34 = vpop.f32.mrf.mxu1  ;;  %v6574_v58 = vrot.slane %v10672_v32, 4  ;;  %v6288_v24 = vrot.slane %v10648_v8, 1  ;;  %v6106_v5 = vsel %vm783_vm4, %v6104_v23, %v6105_v26 }
 0x57f   : > { %v6110_v33 = vadd.f32 %v6109_v6, %v6014_v28  ;;  %v6670_v11 = vrot.slane %v10674_v34, 5  ;;  %v6107_v8 = vsel %vm783_vm4, %v6103_v48, %v6104_v23  ;;  %v6016_v6 = vadd.f32 %v6011_v13, %v10624_v61 }
 0x580   : > { %v6113_v26 = vadd.f32 %v6106_v5, %v6017_v10  ;;  %v6385_v61 = vrot.slane %v6379_v55, 2 }
 0x581   : > { %v6198_v35 = vadd.f32 %v6188_v63, %v6110_v33  ;;  %v10714_v63 = vstv %s290_s27  ;;  %v6112_v37 = vadd.f32 %v6107_v8, %v6016_v6 }
 0x582   : > { %vm292_vm7 = vcmp.lt.s32.totalorder %v10060_v31, %v10714_v63  ;;  %vm293_vm8 = vcmp.lt.s32.totalorder %v283_v54, %v10714_v63 }
 0x583   : > { %v10676_v4 = vpop.f32.mrf.mxu3  ;;  %v6294_v42 = vadd.f32 %v6292_v41, %v6198_v35  ;;  %v6291_v35 = vsel %vm968_vm5, %v6287_v29, %v6288_v24  ;;  %v6289_v41 = vrot.slane %v10660_v20, 1 }
 0x584   : > { %v6478_v15 = vrot.slane %v10676_v4, 3  ;;  %v6569_v28 = vpop.f32.mrf.mxu2  ;;  %v6295_v40 = vadd.f32 %v6291_v35, %v6199_v14 }
 0x585   : > { %v10687_v18 = vpop.f32.mrf.mxu0  ;;  %v6390_v25 = vadd.f32 %v6388_v46, %v6294_v42  ;;  %v6201_v46 = vadd.f32 %v10656_v39, %v6113_v26  ;;  %v6576_v50 = vrot.slane %v6569_v28, 4  ;;  %v6290_v29 = vsel %vm968_vm5, %v6288_v24, %v6289_v41 }
 0x586   : > { %v10691_v44 = vpop.f32.mrf.mxu1  ;;  %v6575_v3 = vrot.slane %v10687_v18, 4  ;;  %v6293_v20 = vsel %vm968_vm5, %v6289_v41, %v6286_v17 }
 0x587   : > { %v6671_v62 = vrot.slane %v10691_v44, 5 }
 0x588   : > { %v6580_v49 = vsel %vm492_vm1, %v6574_v58, %v6575_v3  ;;  %v6579_v39 = vsel %vm492_vm1, %v6575_v3, %v6576_v50 }
 0x589   : > { %v6676_v60 = vsel %vm589_vm2, %v6670_v11, %v6671_v62 }
 0x58b   : > { %v6470_v45 = vpop.f32.mrf.mxu3 }
 0x58c   : > { %v6479_v47 = vrot.slane %v6470_v45, 3  ;;  %v6391_v45 = vadd.f32 %v6387_v59, %v6295_v40 }
 0x58e   : > { %v6484_v36 = vsel %vm395_vm0, %v6478_v15, %v6479_v47 }
 0x58f   : > { %v6486_v12 = vadd.f32 %v6484_v36, %v6390_v25  ;;  %v6200_v25 = vadd.f32 %v10646_v7, %v6112_v37  ;;  %v6386_v7 = vsel %vm1065_vm6, %v6384_v21, %v6385_v61 }
 0x591   : > { %v6582_v2 = vadd.f32 %v6580_v49, %v6486_v12  ;;  %v6296_v17 = vadd.f32 %v6290_v29, %v6200_v25  ;;  %v6571_v49 = vpop.f32.mrf.mxu2 }
 0x593   : > { %v6678_v56 = vadd.f32 %v6676_v60, %v6582_v2  ;;  %v6473_v57 = vpop.f32.mrf.mxu3  ;;  %v6389_v2 = vsel %vm1065_vm6, %v6385_v61, %v6382_v43  ;;  %v6392_v9 = vadd.f32 %v6386_v7, %v6296_v17  ;;  %v6577_v43 = vrot.slane %v6571_v49, 4 }
 0x594   : > { %v6480_v27 = vrot.slane %v6473_v57, 3 }
 0x595   : > { %v6684_v19 = vadd.f32 %v10716_v30, %v6678_v56  ;;  %v6578_v44 = vsel %vm492_vm1, %v6576_v50, %v6577_v43  ;;  %v6581_v57 = vsel %vm492_vm1, %v6577_v43, %v6574_v58 }
 0x596   : > { %v6483_v42 = vsel %vm395_vm0, %v6479_v47, %v6480_v27  ;;  %v6297_v47 = vadd.f32 %v6293_v20, %v6201_v46 }
 0x597   : > { %v10737_v53 = vsel %vm292_vm7, %v6684_v19, -inf  ;;  %v6487_v48 = vadd.f32 %v6483_v42, %v6391_v45 }
 0x598   : > { %6692 = vst [vmem:[%s10743_s13] sm:$0xff] %v10737_v53  ;;  %v6393_v51 = vadd.f32 %v6389_v2, %v6297_v47 }
 0x599   : > { %v6583_v55 = vadd.f32 %v6579_v39, %v6487_v48 }
 0x59b   : > { %v6475_v33 = vpop.f32.mrf.mxu3 }
 0x59c   : > { %v6481_v38 = vrot.slane %v6475_v33, 3 }
 0x59e   : > { %v6482_v0 = vsel %vm395_vm0, %v6480_v27, %v6481_v38  ;;  %v6485_v18 = vsel %vm395_vm0, %v6481_v38, %v6478_v15 }
 0x59f   : > { %v6488_v52 = vadd.f32 %v6482_v0, %v6392_v9  ;;  %v6489_v4 = vadd.f32 %v6485_v18, %v6393_v51 }
 0x5a1   : > { %v6584_v22 = vadd.f32 %v6578_v44, %v6488_v52  ;;  %v6585_v23 = vadd.f32 %v6581_v57, %v6489_v4 }
 0x5a3   : > { %v6665_v36 = vpop.f32.mrf.mxu3 }
 0x5a4   : > { %v6672_v12 = vrot.slane %v6665_v36, 5 }
 0x5a6   : > { %v6675_v3 = vsel %vm589_vm2, %v6671_v62, %v6672_v12 }
 0x5a7   : > { %v6679_v60 = vadd.f32 %v6675_v3, %v6583_v55 }
 0x5a9   : > { %v6685_v56 = vadd.f32 %v10716_v30, %v6679_v60 }
 0x5ab   : > { %v6689_v15 = vsel %vm293_vm8, %v6685_v56, -inf  ;;  %v6667_v62 = vpop.f32.mrf.mxu3 }
 0x5ac   : > { %6693 = vst [vmem:[%s10743_s13 + $0x8] sm:$0xff] %v6689_v15  ;;  %v6673_v19 = vrot.slane %v6667_v62, 5 }
 0x5ad   : > { %9796 = shalt.err (!%p9793_p10)
}
 0x5ae   : > { %s9882_s7 = smov 128   ;;  %s9883_s13 = smov 8   ;;  %v6674_v32 = vsel %vm589_vm2, %v6672_v12, %v6673_v19  ;;  %v6677_v58 = vsel %vm589_vm2, %v6673_v19, %v6670_v11  ;;  %vm294_vm9 = vcmp.lt.s32.totalorder %v284_v1, %v10714_v63  ;;  %vm295_vm10 = vcmp.lt.s32.totalorder %v285_v16, %v10714_v63 }
 0x5af   : > { %9582 = dma.vmem_to_hbm [thread:$0]  (%p9986_p3), %s10797_s16, 256, %s10799_s30, %s6734_s29, %s9882_s7, %s9882_s7, %s9883_s13   ;;  %v6680_v24 = vadd.f32 %v6674_v32, %v6584_v22  ;;  %v6681_v21 = vadd.f32 %v6677_v58, %v6585_v23  ;;  %v6695_v14 = vmul.f32 2.0, %v6689_v15  ;;  %v6694_v27 = vmul.f32 2.0, %v10737_v53 }
 0x5b0   : > { %s6764_s12 = scalar_lea.hbm %s10874_s5, %s9938_s25  ;;  %s267_s15 = scalar_lea.vmem [#allocation12], %s10019_s26 }
 0x5b1   : > { %v6686_v5 = vadd.f32 %v10716_v30, %v6680_v24  ;;  %v6687_v10 = vadd.f32 %v10716_v30, %v6681_v21  ;;  %v6698_v26 = vmax.f32 %v6694_v27, %v6695_v14  ;;  %s6766_s16 = sshll.u32 %s267_s15, 4  ;;  %s6768_s30 = sshll.u32 %s6764_s12, 4  ;;  %s6767_s16 = int_to_ptr.vmem [resolvable:$true] %s6766_s16  ;;  %s6769_s30 = int_to_ptr.hbm [resolvable:$true] %s6768_s30 }
 0x5b2   : > { %s6739_s29 = scalar_lea.sflag [#allocation13], %s10019_s26  ;;  %s9811_s6 = sshra.s32 %s6769_s30, 4  ;;  %s9812_s6 = int_to_ptr.hbm [resolvable:$true] %s9811_s6 }
 0x5b3   : > { %v6690_v13 = vsel %vm294_vm9, %v6686_v5, -inf  ;;  %v6691_v8 = vsel %vm295_vm10, %v6687_v10, -inf  ;;  %s9813_s8 = scalar_lea.hbm %s9812_s6, 1  ;;  %s9817_s10 = scalar_lea.hbm %s10874_s5, 2 }
 0x5b4   : > { %v6696_v6 = vmul.f32 2.0, %v6690_v13  ;;  %v6697_v34 = vmul.f32 2.0, %v6691_v8  ;;  %p9814_p12 = scmp.ne.s32.totalorder %s9812_s6, %s9813_s8  ;;  %p9818_p5 = scmp.lt.s32.totalorder %s9812_s6, %s10874_s5 }
 0x5b5   : > { %p9819_p7 = scmp.lt.s32.totalorder %s9817_s10, %s9813_s8 }
 0x5b6   : > { %v6699_v31 = vmax.f32 %v6696_v6, %v6697_v34  ;;  %p9815_p13 = pnand %p9814_p12, %p9986_p3 }
 0x5b7   : > { %p9820_p1 = por %p9819_p7, %p9818_p5 }
 0x5b8   : > { %v6700_v11 = vmax.f32 %v6698_v26, %v6699_v31  ;;  %p9816_p0 = pneg %p9815_p13 }
 0x5ba   : > { %v6701_v28 = vrot.slane %v6700_v11, 4  ;;  %p9821_p4 = pnand %p9820_p1, %p9816_p0 }
 0x5bc   : > { %v6702_v33 = vmax.f32 %v6700_v11, %v6701_v28 }
 0x5be   : > { %v6703_v35 = vrot.slane %v6702_v33, 2 }
 0x5c0   : > { %v6704_v59 = vmax.f32 %v6702_v33, %v6703_v35 }
 0x5c2   : > { %v6705_v40 = vrot.slane %v6704_v59, 1 }
 0x5c4   : > { %v6706_v63 = vmax.f32 %v6704_v59, %v6705_v40 }
 0x5c6   : > { %v6707_v37 = vsub.f32 %v6694_v27, %v6706_v63  ;;  %v6708_v41 = vsub.f32 %v6695_v14, %v6706_v63  ;;  %v6709_v42 = vsub.f32 %v6696_v6, %v6706_v63  ;;  %v6710_v30 = vsub.f32 %v6697_v34, %v6706_v63 }
 0x5c8   : > { %v6711_v45 = vmul.f32 1.442695, %v6707_v37  ;;  %v6713_v46 = vmul.f32 1.442695, %v6708_v41  ;;  %v6715_v61 = vmul.f32 1.442695, %v6709_v42 }
 0x5c9   : > { %v6717_v53 = vmul.f32 1.442695, %v6710_v30 }
 0x5ca   : > { %9657 = vpow2.f32 %v6711_v45 }
 0x5cb   : > { %9659 = vpow2.f32 %v6713_v46 }
 0x5cc   : > { %9661 = vpow2.f32 %v6715_v61 }
 0x5cd   : > { %9663 = vpow2.f32 %v6717_v53 }
 0x5d0   : > { %v9658_v50 = vpop.eup %9657 }
 0x5d1   : > { %v9660_v25 = vpop.eup %9659 }
 0x5d2   : > { %v6719_v48 = vadd.f32 %v9660_v25, %v9658_v50  ;;  %v9662_v29 = vpop.eup %9661 }
 0x5d3   : > { %v9664_v38 = vpop.eup %9663 }
 0x5d4   : > { %v6720_v20 = vadd.f32 %v9662_v29, %v6719_v48 }
 0x5d6   : > { %v6721_v47 = vadd.f32 %v9664_v38, %v6720_v20 }
 0x5d8   : > { %v6722_v36 = vrot.slane %v6721_v47, 4 }
 0x5da   : > { %v6723_v7 = vadd.f32 %v6722_v36, %v6721_v47 }
 0x5dc   : > { %v6724_v39 = vrot.slane %v6723_v7, 2 }
 0x5de   : > { %v6725_v54 = vadd.f32 %v6724_v39, %v6723_v7 }
 0x5e0   : > { %v6726_v12 = vrot.slane %v6725_v54, 1 }
 0x5e2   : > { %v6727_v17 = vadd.f32 %v6726_v12, %v6725_v54 }
 0x5e4   : > { %9665 = vlog2.f32 %v6727_v17 }
 0x5ea   : > { %v9666_v49 = vpop.eup %9665 }
 0x5eb   : > { %v6729_v55 = vmul.f32 0.6931472, %v9666_v49 }
 0x5ed   : > { %v6730_v2 = vadd.f32 %v6729_v55, %v6706_v63 }
 0x5ef   : > { %v6731_v0 = vmul.f32 0.5, %v6730_v2 }
 0x5f1   : > { %6732 = vst [vmem:[%s267_s15] sm:$0x1] %v6731_v0 }
 0x5f2   : > { %9824 = shalt.err (!%p9821_p4)
}
 0x5f3   : > { %9583 = dma.vmem_to_hbm [thread:$0]  (%p9986_p3), %s6767_s16, 16, %s6769_s30, %s6739_s29  }
 0x5f4 PF: > { %s6780_s26 = sand.u32 1, %s9861_s22   ;;  %p10880_p8 = scmp.ge.s32.totalorder %s9873_s0, 2 }
 0x5f5   : > { %s6781_s27 = scalar_lea.sflag [#allocation7], %s6780_s26 }
 0x5f6   : > { %p9598_p11 = pnand %p10880_p8, %p9952_p6 }
 0x5f8   : > { %p9599_p2 = pneg %p9598_p11 }
 0x5fa   : > { %9852 = dma.done.wait (%p9599_p2), %s6781_s27, 256  }
 0x5fb   : > { %9854 = vsyncadd (%p9599_p2), %s6781_s27, 4294967040  ;;  %s6791_s7 = scalar_lea.sflag [#allocation13], %s6780_s26 }
 0x5fc   : > { %9856 = dma.done.wait (%p9599_p2), %s6791_s7, 16  }
 0x5fd   : > { %9858 = vsyncadd (%p9599_p2), %s6791_s7, 4294967280  ;;  %p31_p3 = scmp.ge.s32.totalorder %s9976_s17, 4   ;;  %s10881_s22 = smov %s9865_s23 }
 0x5fe   : > { %s10882_s23 = smov %s9869_s24  ;;  %s10883_s24 = smov %s9992_s21 }
 0x5ff   : > { %s10884_s0 = smov %s9976_s17  ;;  %33 = sbr.rel (!%p31_p3) target bundleno = 14 (0xe), region = 167 }
 0x604   :  { %6796 = vsyncpa [#allocation6], 1 }
 0x605   :  { %6798 = vsyncpa [#allocation6 + $0x1], 1 }
 0x606   :  { %6799 = vsyncpa [#allocation9], 1 }
 0x607   :  { %6800 = vsyncpa [#allocation7], 1 }
 0x608   :  { %6802 = vsyncpa [#allocation7 + $0x1], 1 }
 0x609   :  { %6803 = vsyncpa [#allocation13], 1 }
 0x60a   :  { %6805 = vsyncpa [#allocation13 + $0x1], 1 }

</bundles_post_ra>
